<compile_context>
chip_gen: v7x
topology: tpu7x:2x2x1
jax: 0.10.0
libtpu: 0.0.40
codegen_flags: <defaults>
</compile_context>

<pallas_src>
import jax
import jax.numpy as jnp
from jax import lax
from jax.experimental import pallas as pl
from jax.experimental.pallas import tpu as pltpu

BN_EPS = 1e-5
LANES = 128


# ----------------------------------------------------------------------------
# Pallas kernels
# ----------------------------------------------------------------------------
def _conv_bn_relu_pool_kernel(x_ref, w_ref, s_ref, t_ref, o_ref):
    """Fused Conv2d + BatchNorm2d + MaxPool2d(2) + ReLU as ONE matmul.

    x_ref: (4*N*M, K) bf16  im2col rows, pool-offset-major, then (n, oh, ow)
    w_ref: (K, 128)   bf16  conv weight, output channels zero-padded to 128
    s_ref, t_ref: (1, 128) f32  folded BN scale / shift (conv bias folded in)
    o_ref: (N*M, 128) bf16  pooled activation (lane-dense)
    """
    z = jnp.dot(x_ref[...], w_ref[...], preferred_element_type=jnp.float32)
    z = z * s_ref[...] + t_ref[...]              # affine before max (scale may be <0)
    nm = o_ref.shape[0]
    zr = z.reshape(4, nm, z.shape[-1])           # sublane split at multiple of 8
    pooled = jnp.maximum(jnp.maximum(zr[0], zr[1]), jnp.maximum(zr[2], zr[3]))
    o_ref[...] = jnp.maximum(pooled, 0.0).astype(o_ref.dtype)   # ReLU commutes w/ max


def _fc_head_kernel(x_ref, w1_ref, b1_ref, w2_ref, s2_ref, t2_ref,
                    w3_ref, b3_ref, o_ref):
    """fc1 -> (drop) -> fc2 -> (drop) -> BatchNorm1d(folded) -> out, fused.

    bf16 operands, f32 accumulation + f32 affine epilogues.
    """
    h1 = jnp.dot(x_ref[...], w1_ref[...], preferred_element_type=jnp.float32)
    h1 = h1 + b1_ref[...]                                                 # (N, 512)
    h2 = jnp.dot(h1.astype(jnp.bfloat16), w2_ref[...],
                 preferred_element_type=jnp.float32)
    h2 = h2 * s2_ref[...] + t2_ref[...]                                   # (N, 128)
    y = jnp.dot(h2.astype(jnp.bfloat16), w3_ref[...],
                preferred_element_type=jnp.float32)
    o_ref[...] = y + b3_ref[...]                                          # (N, 128)


# ----------------------------------------------------------------------------
# Wrappers
# ----------------------------------------------------------------------------
def _vmem_spec():
    return pl.BlockSpec(memory_space=pltpu.MemorySpace.VMEM)


def conv_bn_relu_pool(cols, wmat, scale, shift):
    """cols: (4*N*M, K) bf16. Returns pooled activation (N*M, 128) bf16."""
    rows, _ = cols.shape
    nm = rows // 4
    return pl.pallas_call(
        _conv_bn_relu_pool_kernel,
        out_shape=jax.ShapeDtypeStruct((nm, LANES), jnp.bfloat16),
        in_specs=[_vmem_spec() for _ in range(4)],
        out_specs=_vmem_spec(),
    )(cols, wmat, scale, shift)


def fc_head(xf, prep):
    """xf: (N, 2304) bf16. Returns (N, 128) f32 (first 10 lanes are the logits)."""
    N = xf.shape[0]
    return pl.pallas_call(
        _fc_head_kernel,
        out_shape=jax.ShapeDtypeStruct((N, LANES), jnp.float32),
        in_specs=[_vmem_spec() for _ in range(8)],
        out_specs=_vmem_spec(),
    )(xf, prep["fc1_w"], prep["fc1_b"], prep["fc2_w"], prep["fc2_s"],
      prep["fc2_t"], prep["out_w"], prep["out_b"])


# ----------------------------------------------------------------------------
# JAX glue
# ----------------------------------------------------------------------------
def im2col_pool_groups(x, kh, kw, pad):
    """im2col with rows grouped by 2x2 pool offset (pool-offset-major).

    x: (N, H, W, C). Returns (4*N*OHp*OWp, C*kh*kw) with the K axis ordered
    (Cin, KH, KW) to match PyTorch's conv_w.reshape(Cout, -1), and rows
    ordered (pool_offset, n, oh, ow).
    """
    N, H, W, C = x.shape
    xp = jnp.pad(x, ((0, 0), (pad, pad), (pad, pad), (0, 0)))
    OH = H + 2 * pad - kh + 1
    OW = W + 2 * pad - kw + 1
    OHp, OWp = OH // 2, OW // 2
    views = [xp[:, i:i + OH, j:j + OW, :] for i in range(kh) for j in range(kw)]
    t = jnp.stack(views, axis=-1)                      # (N, OH, OW, C, kh*kw)
    t = t[:, :2 * OHp, :2 * OWp]
    t = t.reshape(N, OHp, 2, OWp, 2, C * kh * kw)
    t = t.transpose(2, 4, 0, 1, 3, 5)                  # (2, 2, N, OHp, OWp, K)
    return t.reshape(4 * N * OHp * OWp, C * kh * kw), OHp, OWp


def prepare_params(p):
    """One-time (outside jit) BN folding, weight layout, padding, bf16 cast."""
    def fold(gamma, beta, mean, var, bias):
        s = gamma / jnp.sqrt(var + BN_EPS)
        t = (bias - mean) * s + beta
        return s, t

    def pad_lanes(a, n=LANES):
        return jnp.pad(a, [(0, 0)] * (a.ndim - 1) + [(0, n - a.shape[-1])])

    s1, t1 = fold(p["bn1_g"], p["bn1_b"], p["bn1_m"], p["bn1_v"], p["conv1_b"])
    s2, t2 = fold(p["bn2_g"], p["bn2_b"], p["bn2_m"], p["bn2_v"], p["conv2_b"])
    s3 = p["bn3_g"] / jnp.sqrt(p["bn3_v"] + BN_EPS)
    t3 = (p["fc2_b"] - p["bn3_m"]) * s3 + p["bn3_b"]

    # fc1 weight rows permuted from PyTorch's (C, H, W) flatten order to the
    # NHWC-natural (H, W, C) order -> no runtime transpose before the FC head.
    w1 = p["fc1_w"].reshape(512, 64, 6, 6).transpose(2, 3, 1, 0).reshape(2304, 512)

    return {
        # conv1: (Cin*KH*KW, Cout) padded to 128 lanes, bf16
        "c1_w": pad_lanes(p["conv1_w"].reshape(32, -1).T).astype(jnp.bfloat16),
        "c1_s": pad_lanes(s1.reshape(1, 32)).astype(jnp.float32),
        "c1_t": pad_lanes(t1.reshape(1, 32)).astype(jnp.float32),
        # conv2
        "c2_w": pad_lanes(p["conv2_w"].reshape(64, -1).T).astype(jnp.bfloat16),
        "c2_s": pad_lanes(s2.reshape(1, 64)).astype(jnp.float32),
        "c2_t": pad_lanes(t2.reshape(1, 64)).astype(jnp.float32),
        # FC head: bf16 weights, f32 bias / folded-BN affine
        "fc1_w": w1.astype(jnp.bfloat16),                            # (2304, 512)
        "fc1_b": p["fc1_b"].reshape(1, 512).astype(jnp.float32),
        "fc2_w": p["fc2_w"].T.astype(jnp.bfloat16),                  # (512, 128)
        "fc2_s": s3.reshape(1, 128).astype(jnp.float32),
        "fc2_t": t3.reshape(1, 128).astype(jnp.float32),
        "out_w": pad_lanes(p["out_w"].T.astype(jnp.bfloat16)),       # (128, 128)
        "out_b": pad_lanes(p["out_b"].reshape(1, 10)).astype(jnp.float32),
    }


def fashion_convnet_forward(prep, x_nchw):
    N = x_nchw.shape[0]
    x = x_nchw.transpose(0, 2, 3, 1).astype(jnp.bfloat16)            # NCHW -> NHWC

    # conv1 block: Conv(1->32,k3,p1)+BN+ReLU+MaxPool2, one matmul
    cols, OHp, OWp = im2col_pool_groups(x, 3, 3, 1)                  # (4*N*196, 9)
    y = conv_bn_relu_pool(cols, prep["c1_w"], prep["c1_s"], prep["c1_t"])
    y = y[:, :32].reshape(N, OHp, OWp, 32)                           # (N,14,14,32)

    # conv2 block: Conv(32->64,k5,p1)+BN+ReLU+MaxPool2, one matmul
    cols, OHp, OWp = im2col_pool_groups(y, 5, 5, 1)                  # (4*N*36, 800)
    y = conv_bn_relu_pool(cols, prep["c2_w"], prep["c2_s"], prep["c2_t"])

    # flatten: rows are already (n, h, w), channels in lanes -> free reshape;
    # fc1_w rows were permuted to (h, w, c) order in prepare_params.
    xf = y[:, :64].reshape(N, OHp * OWp * 64)                        # (N, 2304) bf16

    # fused fc1 -> fc2 -> BN1d -> out (dropouts identity in eval)
    logits = fc_head(xf, prep)                                       # (N, 128)
    return logits[:, :10]


# ----------------------------------------------------------------------------
# Pure-JAX reference (NCHW, lax.conv, f32) for correctness checking
# ----------------------------------------------------------------------------
def reference_forward(params, x_nchw):
    hp = lax.Precision.HIGHEST

    def bn_nchw(y, g, b, m, v):
        sc = (g / jnp.sqrt(v + BN_EPS))[None, :, None, None]
        return (y - m[None, :, None, None]) * sc + b[None, :, None, None]

    def pool_nchw(y):
        n, c, h, w = y.shape
        return y.reshape(n, c, h // 2, 2, w // 2, 2).max(axis=(3, 5))

    y = lax.conv_general_dilated(x_nchw, params["conv1_w"], (1, 1),
                                 [(1, 1), (1, 1)],
                                 dimension_numbers=("NCHW", "OIHW", "NCHW"),
                                 precision=hp) + params["conv1_b"][None, :, None, None]
    y = pool_nchw(jnp.maximum(bn_nchw(y, params["bn1_g"], params["bn1_b"],
                                      params["bn1_m"], params["bn1_v"]), 0.0))
    y = lax.conv_general_dilated(y, params["conv2_w"], (1, 1),
                                 [(1, 1), (1, 1)],
                                 dimension_numbers=("NCHW", "OIHW", "NCHW"),
                                 precision=hp) + params["conv2_b"][None, :, None, None]
    y = pool_nchw(jnp.maximum(bn_nchw(y, params["bn2_g"], params["bn2_b"],
                                      params["bn2_m"], params["bn2_v"]), 0.0))
    y = y.reshape(y.shape[0], -1)
    y = jnp.matmul(y, params["fc1_w"].T, precision=hp) + params["fc1_b"]
    y = jnp.matmul(y, params["fc2_w"].T, precision=hp) + params["fc2_b"]
    y = (y - params["bn3_m"]) / jnp.sqrt(params["bn3_v"] + BN_EPS) * params["bn3_g"] + params["bn3_b"]
    y = jnp.matmul(y, params["out_w"].T, precision=hp) + params["out_b"]
    return y


# ----------------------------------------------------------------------------
if __name__ == "__main__":
    key = jax.random.PRNGKey(0)
    ks = jax.random.split(key, 24)

    def nrm(k, shape, s=0.05):
        return (s * jax.random.normal(k, shape)).astype(jnp.float32)

    params = {
        "conv1_w": nrm(ks[0], (32, 1, 3, 3)),  "conv1_b": nrm(ks[1], (32,)),
        "bn1_g": 1.0 + nrm(ks[2], (32,)),      "bn1_b": nrm(ks[3], (32,)),
        "bn1_m": nrm(ks[4], (32,)),            "bn1_v": 1.0 + jnp.abs(nrm(ks[5], (32,))),
        "conv2_w": nrm(ks[6], (64, 32, 5, 5)), "conv2_b": nrm(ks[7], (64,)),
        "bn2_g": 1.0 + nrm(ks[8], (64,)),      "bn2_b": nrm(ks[9], (64,)),
        "bn2_m": nrm(ks[10], (64,)),           "bn2_v": 1.0 + jnp.abs(nrm(ks[11], (64,))),
        "fc1_w": nrm(ks[12], (512, 2304)),     "fc1_b": nrm(ks[13], (512,)),
        "fc2_w": nrm(ks[14], (128, 512)),      "fc2_b": nrm(ks[15], (128,)),
        "bn3_g": 1.0 + nrm(ks[16], (128,)),    "bn3_b": nrm(ks[17], (128,)),
        "bn3_m": nrm(ks[18], (128,)),          "bn3_v": 1.0 + jnp.abs(nrm(ks[19], (128,))),
        "out_w": nrm(ks[20], (10, 128)),       "out_b": nrm(ks[21], (10,)),
    }

    # Spatial size is fixed to 28x28x1 by fc1's 64*6*6 input dim; batch kept small.
    x = jax.random.normal(ks[22], (2, 1, 28, 28), jnp.float32)

    prep = prepare_params(params)          # one-time fold/permute/pad/cast, outside jit
    fwd = jax.jit(fashion_convnet_forward)
    out = jax.block_until_ready(fwd(prep, x))
    assert out.shape == (2, 10) and out.dtype == jnp.float32

    ref = reference_forward(params, x)
    err = float(jnp.max(jnp.abs(out - ref)))
    # Tolerance accommodates bf16 operands throughout (f32 accumulation).
    if not jnp.allclose(out, ref, rtol=3e-2, atol=3e-2):
        raise SystemExit(f"mismatch vs reference: max abs err = {err}")

    print("KERNEL_OK")
</pallas_src>

<mosaic_0001>
module attributes {stable_mosaic.version = 11 : i64} {
  func.func @_conv_bn_relu_pool_kernel(%arg0: memref<1568x9xbf16, #tpu.memory_space<vmem>>, %arg1: memref<9x128xbf16, #tpu.memory_space<vmem>>, %arg2: memref<1x128xf32, #tpu.memory_space<vmem>>, %arg3: memref<1x128xf32, #tpu.memory_space<vmem>>, %arg4: memref<392x128xbf16, #tpu.memory_space<vmem>>) attributes {dimension_semantics = [], scalar_prefetch = 0 : i64, scratch_operands = 0 : i64, tpu.core_type = #tpu.core_type<tc>} {
    %c0 = arith.constant 0 : index
    %c0_0 = arith.constant 0 : index
    %0 = vector.load %arg0[%c0, %c0_0] : memref<1568x9xbf16, #tpu.memory_space<vmem>>, vector<1568x9xbf16>
    %c0_1 = arith.constant 0 : index
    %c0_2 = arith.constant 0 : index
    %1 = vector.load %arg1[%c0_1, %c0_2] : memref<9x128xbf16, #tpu.memory_space<vmem>>, vector<9x128xbf16>
    %cst = arith.constant dense<0.000000e+00> : vector<1568x128xf32>
    %2 = tpu.matmul %0, %1, %cst {dimension_numbers = #tpu.dot_dimension_numbers<[1], [0], [0], [1], [0, 0, 1, 1], [], []>} : vector<1568x9xbf16>, vector<9x128xbf16>, vector<1568x128xf32> -> vector<1568x128xf32>
    %c0_3 = arith.constant 0 : index
    %c0_4 = arith.constant 0 : index
    %3 = vector.load %arg2[%c0_3, %c0_4] : memref<1x128xf32, #tpu.memory_space<vmem>>, vector<1x128xf32>
    %4 = vector.broadcast %3 : vector<1x128xf32> to vector<1568x128xf32>
    %5 = arith.mulf %2, %4 : vector<1568x128xf32>
    %c0_5 = arith.constant 0 : index
    %c0_6 = arith.constant 0 : index
    %6 = vector.load %arg3[%c0_5, %c0_6] : memref<1x128xf32, #tpu.memory_space<vmem>>, vector<1x128xf32>
    %7 = vector.broadcast %6 : vector<1x128xf32> to vector<1568x128xf32>
    %8 = arith.addf %5, %7 : vector<1568x128xf32>
    %9 = vector.shape_cast %8 : vector<1568x128xf32> to vector<4x392x128xf32>
    %10 = vector.extract_strided_slice %9 {offsets = [0, 0, 0], sizes = [1, 392, 128], strides = [1, 1, 1]} : vector<4x392x128xf32> to vector<1x392x128xf32>
    %11 = vector.shape_cast %10 : vector<1x392x128xf32> to vector<392x128xf32>
    %12 = vector.extract_strided_slice %9 {offsets = [1, 0, 0], sizes = [1, 392, 128], strides = [1, 1, 1]} : vector<4x392x128xf32> to vector<1x392x128xf32>
    %13 = vector.shape_cast %12 : vector<1x392x128xf32> to vector<392x128xf32>
    %14 = arith.maximumf %11, %13 : vector<392x128xf32>
    %15 = vector.extract_strided_slice %9 {offsets = [2, 0, 0], sizes = [1, 392, 128], strides = [1, 1, 1]} : vector<4x392x128xf32> to vector<1x392x128xf32>
    %16 = vector.shape_cast %15 : vector<1x392x128xf32> to vector<392x128xf32>
    %17 = vector.extract_strided_slice %9 {offsets = [3, 0, 0], sizes = [1, 392, 128], strides = [1, 1, 1]} : vector<4x392x128xf32> to vector<1x392x128xf32>
    %18 = vector.shape_cast %17 : vector<1x392x128xf32> to vector<392x128xf32>
    %19 = arith.maximumf %16, %18 : vector<392x128xf32>
    %20 = arith.maximumf %14, %19 : vector<392x128xf32>
    %cst_7 = arith.constant 0.000000e+00 : f32
    %21 = vector.broadcast %cst_7 : f32 to vector<392x128xf32>
    %22 = arith.maximumf %20, %21 : vector<392x128xf32>
    %23 = arith.truncf %22 : vector<392x128xf32> to vector<392x128xbf16>
    %c0_8 = arith.constant 0 : index
    %c0_9 = arith.constant 0 : index
    %24 = vector.load %arg4[%c0_8, %c0_9] : memref<392x128xbf16, #tpu.memory_space<vmem>>, vector<392x128xbf16>
    tpu.vector_store %arg4[%c0_8, %c0_9], %23 {strides = array<i32>} : memref<392x128xbf16, #tpu.memory_space<vmem>>, vector<392x128xbf16>,
    return
  }
}

module attributes {stable_mosaic.version = 11 : i64} {
  func.func @_conv_bn_relu_pool_kernel(%arg0: memref<288x800xbf16, #tpu.memory_space<vmem>>, %arg1: memref<800x128xbf16, #tpu.memory_space<vmem>>, %arg2: memref<1x128xf32, #tpu.memory_space<vmem>>, %arg3: memref<1x128xf32, #tpu.memory_space<vmem>>, %arg4: memref<72x128xbf16, #tpu.memory_space<vmem>>) attributes {dimension_semantics = [], scalar_prefetch = 0 : i64, scratch_operands = 0 : i64, tpu.core_type = #tpu.core_type<tc>} {
    %c0 = arith.constant 0 : index
    %c0_0 = arith.constant 0 : index
    %0 = vector.load %arg0[%c0, %c0_0] : memref<288x800xbf16, #tpu.memory_space<vmem>>, vector<288x800xbf16>
    %c0_1 = arith.constant 0 : index
    %c0_2 = arith.constant 0 : index
    %1 = vector.load %arg1[%c0_1, %c0_2] : memref<800x128xbf16, #tpu.memory_space<vmem>>, vector<800x128xbf16>
    %cst = arith.constant dense<0.000000e+00> : vector<288x128xf32>
    %2 = tpu.matmul %0, %1, %cst {dimension_numbers = #tpu.dot_dimension_numbers<[1], [0], [0], [1], [0, 0, 1, 1], [], []>} : vector<288x800xbf16>, vector<800x128xbf16>, vector<288x128xf32> -> vector<288x128xf32>
    %c0_3 = arith.constant 0 : index
    %c0_4 = arith.constant 0 : index
    %3 = vector.load %arg2[%c0_3, %c0_4] : memref<1x128xf32, #tpu.memory_space<vmem>>, vector<1x128xf32>
    %4 = vector.broadcast %3 : vector<1x128xf32> to vector<288x128xf32>
    %5 = arith.mulf %2, %4 : vector<288x128xf32>
    %c0_5 = arith.constant 0 : index
    %c0_6 = arith.constant 0 : index
    %6 = vector.load %arg3[%c0_5, %c0_6] : memref<1x128xf32, #tpu.memory_space<vmem>>, vector<1x128xf32>
    %7 = vector.broadcast %6 : vector<1x128xf32> to vector<288x128xf32>
    %8 = arith.addf %5, %7 : vector<288x128xf32>
    %9 = vector.shape_cast %8 : vector<288x128xf32> to vector<4x72x128xf32>
    %10 = vector.extract_strided_slice %9 {offsets = [0, 0, 0], sizes = [1, 72, 128], strides = [1, 1, 1]} : vector<4x72x128xf32> to vector<1x72x128xf32>
    %11 = vector.shape_cast %10 : vector<1x72x128xf32> to vector<72x128xf32>
    %12 = vector.extract_strided_slice %9 {offsets = [1, 0, 0], sizes = [1, 72, 128], strides = [1, 1, 1]} : vector<4x72x128xf32> to vector<1x72x128xf32>
    %13 = vector.shape_cast %12 : vector<1x72x128xf32> to vector<72x128xf32>
    %14 = arith.maximumf %11, %13 : vector<72x128xf32>
    %15 = vector.extract_strided_slice %9 {offsets = [2, 0, 0], sizes = [1, 72, 128], strides = [1, 1, 1]} : vector<4x72x128xf32> to vector<1x72x128xf32>
    %16 = vector.shape_cast %15 : vector<1x72x128xf32> to vector<72x128xf32>
    %17 = vector.extract_strided_slice %9 {offsets = [3, 0, 0], sizes = [1, 72, 128], strides = [1, 1, 1]} : vector<4x72x128xf32> to vector<1x72x128xf32>
    %18 = vector.shape_cast %17 : vector<1x72x128xf32> to vector<72x128xf32>
    %19 = arith.maximumf %16, %18 : vector<72x128xf32>
    %20 = arith.maximumf %14, %19 : vector<72x128xf32>
    %cst_7 = arith.constant 0.000000e+00 : f32
    %21 = vector.broadcast %cst_7 : f32 to vector<72x128xf32>
    %22 = arith.maximumf %20, %21 : vector<72x128xf32>
    %23 = arith.truncf %22 : vector<72x128xf32> to vector<72x128xbf16>
    %c0_8 = arith.constant 0 : index
    %c0_9 = arith.constant 0 : index
    %24 = vector.load %arg4[%c0_8, %c0_9] : memref<72x128xbf16, #tpu.memory_space<vmem>>, vector<72x128xbf16>
    tpu.vector_store %arg4[%c0_8, %c0_9], %23 {strides = array<i32>} : memref<72x128xbf16, #tpu.memory_space<vmem>>, vector<72x128xbf16>,
    return
  }
}

module attributes {stable_mosaic.version = 11 : i64} {
  func.func @_fc_head_kernel(%arg0: memref<2x2304xbf16, #tpu.memory_space<vmem>>, %arg1: memref<2304x512xbf16, #tpu.memory_space<vmem>>, %arg2: memref<1x512xf32, #tpu.memory_space<vmem>>, %arg3: memref<512x128xbf16, #tpu.memory_space<vmem>>, %arg4: memref<1x128xf32, #tpu.memory_space<vmem>>, %arg5: memref<1x128xf32, #tpu.memory_space<vmem>>, %arg6: memref<128x128xbf16, #tpu.memory_space<vmem>>, %arg7: memref<1x128xf32, #tpu.memory_space<vmem>>, %arg8: memref<2x128xf32, #tpu.memory_space<vmem>>) attributes {dimension_semantics = [], scalar_prefetch = 0 : i64, scratch_operands = 0 : i64, tpu.core_type = #tpu.core_type<tc>} {
    %c0 = arith.constant 0 : index
    %c0_0 = arith.constant 0 : index
    %0 = vector.load %arg0[%c0, %c0_0] : memref<2x2304xbf16, #tpu.memory_space<vmem>>, vector<2x2304xbf16>
    %c0_1 = arith.constant 0 : index
    %c0_2 = arith.constant 0 : index
    %1 = vector.load %arg1[%c0_1, %c0_2] : memref<2304x512xbf16, #tpu.memory_space<vmem>>, vector<2304x512xbf16>
    %cst = arith.constant dense<0.000000e+00> : vector<2x512xf32>
    %2 = tpu.matmul %0, %1, %cst {dimension_numbers = #tpu.dot_dimension_numbers<[1], [0], [0], [1], [0, 0, 1, 1], [], []>} : vector<2x2304xbf16>, vector<2304x512xbf16>, vector<2x512xf32> -> vector<2x512xf32>
    %c0_3 = arith.constant 0 : index
    %c0_4 = arith.constant 0 : index
    %3 = vector.load %arg2[%c0_3, %c0_4] : memref<1x512xf32, #tpu.memory_space<vmem>>, vector<1x512xf32>
    %4 = vector.broadcast %3 : vector<1x512xf32> to vector<2x512xf32>
    %5 = arith.addf %2, %4 : vector<2x512xf32>
    %6 = arith.truncf %5 : vector<2x512xf32> to vector<2x512xbf16>
    %c0_5 = arith.constant 0 : index
    %c0_6 = arith.constant 0 : index
    %7 = vector.load %arg3[%c0_5, %c0_6] : memref<512x128xbf16, #tpu.memory_space<vmem>>, vector<512x128xbf16>
    %cst_7 = arith.constant dense<0.000000e+00> : vector<2x128xf32>
    %8 = tpu.matmul %6, %7, %cst_7 {dimension_numbers = #tpu.dot_dimension_numbers<[1], [0], [0], [1], [0, 0, 1, 1], [], []>} : vector<2x512xbf16>, vector<512x128xbf16>, vector<2x128xf32> -> vector<2x128xf32>
    %c0_8 = arith.constant 0 : index
    %c0_9 = arith.constant 0 : index
    %9 = vector.load %arg4[%c0_8, %c0_9] : memref<1x128xf32, #tpu.memory_space<vmem>>, vector<1x128xf32>
    %10 = vector.broadcast %9 : vector<1x128xf32> to vector<2x128xf32>
    %11 = arith.mulf %8, %10 : vector<2x128xf32>
    %c0_10 = arith.constant 0 : index
    %c0_11 = arith.constant 0 : index
    %12 = vector.load %arg5[%c0_10, %c0_11] : memref<1x128xf32, #tpu.memory_space<vmem>>, vector<1x128xf32>
    %13 = vector.broadcast %12 : vector<1x128xf32> to vector<2x128xf32>
    %14 = arith.addf %11, %13 : vector<2x128xf32>
    %15 = arith.truncf %14 : vector<2x128xf32> to vector<2x128xbf16>
    %c0_12 = arith.constant 0 : index
    %c0_13 = arith.constant 0 : index
    %16 = vector.load %arg6[%c0_12, %c0_13] : memref<128x128xbf16, #tpu.memory_space<vmem>>, vector<128x128xbf16>
    %cst_14 = arith.constant dense<0.000000e+00> : vector<2x128xf32>
    %17 = tpu.matmul %15, %16, %cst_14 {dimension_numbers = #tpu.dot_dimension_numbers<[1], [0], [0], [1], [0, 0, 1, 1], [], []>} : vector<2x128xbf16>, vector<128x128xbf16>, vector<2x128xf32> -> vector<2x128xf32>
    %c0_15 = arith.constant 0 : index
    %c0_16 = arith.constant 0 : index
    %18 = vector.load %arg7[%c0_15, %c0_16] : memref<1x128xf32, #tpu.memory_space<vmem>>, vector<1x128xf32>
    %19 = vector.broadcast %18 : vector<1x128xf32> to vector<2x128xf32>
    %20 = arith.addf %17, %19 : vector<2x128xf32>
    %c0_17 = arith.constant 0 : index
    %c0_18 = arith.constant 0 : index
    %21 = vector.load %arg8[%c0_17, %c0_18] : memref<2x128xf32, #tpu.memory_space<vmem>>, vector<2x128xf32>
    tpu.vector_store %arg8[%c0_17, %c0_18], %20 {strides = array<i32>} : memref<2x128xf32, #tpu.memory_space<vmem>>, vector<2x128xf32>,
    return
  }
}

</mosaic_0001>

<bundles_post_ra>
// kernel: fashion_convnet_forward.3
= control target key start
LH: loop header
LB: loop body
LE: loop exit
PB: predicated region body
PF: predicated region fallthrough
CT: control target
= control target key end

     0   :  { %vm1006_vm0 = vcmask 1043456   ;;  %vm1007_vm1 = vcmask 1044480   ;;  %vm711_vm2 = vcmask 72704   ;;  %v3523_v1 = vmov 65535   ;;  %s5040_s1 = inlined_call_operand.vmem [shape: bf16[9,128], index: 1, kind: input, shape index: {}]   ;;  %s5041_s0 = inlined_call_operand.vmem [shape: bf16[1568,9], index: 0, kind: input, shape index: {}]   ;;  %s5042_s2 = inlined_call_operand.vmem [shape: f32[1,128], index: 2, kind: input, shape index: {}]   ;;  %s5043_s3 = inlined_call_operand.vmem [shape: f32[1,128], index: 3, kind: input, shape index: {}]   ;;  %s5044_s4 = inlined_call_operand.vmem [shape: bf16[392,128], index: 4, kind: output, shape index: {}]  }
   0x1   :  { %v3422_v0 = vld [vmem:[%s5040_s1] sm:$0x1f]   ;;  %v1008_v2 = vsel %vm1006_vm0, 4294967295, %v3523_v1  ;;  %v3424_v5 = vld [vmem:[%s5041_s0 + $0x190] sm:$0xff]   ;;  %v3425_v7 = vld [vmem:[%s5041_s0 + $0x8] sm:$0xff]  }
   0x2   :  { %v3423_v3 = vld [vmem:[%s5041_s0] sm:$0xff]   ;;  %v1009_v4 = vsel %vm1007_vm1, %v1008_v2, 0  ;;  %3323 = vmatprep.mubr.msk.bf16.mxu1 %vm711_vm2, %v3424_v5  ;;  %v3426_v8 = vld [vmem:[%s5041_s0 + $0x198] sm:$0xff]   ;;  %v3427_v9 = vld [vmem:[%s5041_s0 + $0x10] sm:$0xff]  }
   0x3   :  { %v1011_v6 = vand.u32 %v3422_v0, %v1009_v4  ;;  %3223 = vmatprep.mubr.msk.bf16.mxu0 %vm711_vm2, %v3423_v3  ;;  %v3428_v10 = vld [vmem:[%s5041_s0 + $0x1a0] sm:$0xff]   ;;  %v3429_v11 = vld [vmem:[%s5041_s0 + $0x18] sm:$0xff]   ;;  %v3430_v12 = vld [vmem:[%s5041_s0 + $0x1a8] sm:$0xff]  }
   0x4   :  { %v3431_v13 = vld [vmem:[%s5041_s0 + $0x20] sm:$0xff]   ;;  %v3432_v14 = vld [vmem:[%s5041_s0 + $0x1b0] sm:$0xff]   ;;  %v3433_v15 = vld [vmem:[%s5041_s0 + $0x28] sm:$0xff]  }
   0x5   :  { %3221 = vmatprep.subr.bf16.mxu0 %v1011_v6  ;;  %3419 = vmatprep.subr.bf16.mxu1 %v1011_v6  ;;  %v3434_v16 = vld [vmem:[%s5041_s0 + $0x1b8] sm:$0xff]   ;;  %v3435_v17 = vld [vmem:[%s5041_s0 + $0x30] sm:$0xff]   ;;  %v3436_v18 = vld [vmem:[%s5041_s0 + $0x1c0] sm:$0xff]  }
   0x6   :  { %3222 = vmatpush3.bf16.msra.mxu0 %v1011_v6  ;;  %3420 = vmatpush3.bf16.msra.mxu1 %v1011_v6  ;;  %v3437_v19 = vld [vmem:[%s5041_s0 + $0x38] sm:$0xff]   ;;  %v3438_v20 = vld [vmem:[%s5041_s0 + $0x1c8] sm:$0xff]   ;;  %v3439_v21 = vld [vmem:[%s5041_s0 + $0x40] sm:$0xff]  }
   0x7   :  { %v3440_v22 = vld [vmem:[%s5041_s0 + $0x1d0] sm:$0xff]   ;;  %v3441_v23 = vld [vmem:[%s5041_s0 + $0x48] sm:$0xff]   ;;  %v3442_v24 = vld [vmem:[%s5041_s0 + $0x1d8] sm:$0xff]  }
   0x8   :  { %v3443_v25 = vld [vmem:[%s5041_s0 + $0x50] sm:$0xff]   ;;  %v3444_v26 = vld [vmem:[%s5041_s0 + $0x1e0] sm:$0xff]   ;;  %v3445_v27 = vld [vmem:[%s5041_s0 + $0x58] sm:$0xff]  }
   0x9   :  { %3224 = vmatmul.mubr.msk.bf16.vlgmr.msra.gmra.mrb[0].mxu0 %vm711_vm2, %v3425_v7  ;;  %3324 = vmatmul.mubr.msk.bf16.vlgmr.msra.gmra.mrb[0].mxu1 %vm711_vm2, %v3426_v8  ;;  %v3446_v28 = vld [vmem:[%s5041_s0 + $0x1e8] sm:$0xff]   ;;  %v3447_v29 = vld [vmem:[%s5041_s0 + $0x60] sm:$0xff]   ;;  %v3448_v30 = vld [vmem:[%s5041_s0 + $0x1f0] sm:$0xff]  }
   0xa   :  { %3227 = vmatprep.mubr.msk.bf16.mxu0 %vm711_vm2, %v3427_v9  ;;  %3327 = vmatprep.mubr.msk.bf16.mxu1 %vm711_vm2, %v3428_v10  ;;  %v3449_v31 = vld [vmem:[%s5041_s0 + $0x68] sm:$0xff]   ;;  %v3450_v32 = vld [vmem:[%s5041_s0 + $0x1f8] sm:$0xff]   ;;  %v3451_v33 = vld [vmem:[%s5041_s0 + $0x70] sm:$0xff]  }
   0xb   :  { %v3452_v34 = vld [vmem:[%s5041_s0 + $0x200] sm:$0xff]   ;;  %v3453_v35 = vld [vmem:[%s5041_s0 + $0x78] sm:$0xff]   ;;  %v3454_v36 = vld [vmem:[%s5041_s0 + $0x208] sm:$0xff]  }
   0xc   :  { %v3455_v37 = vld [vmem:[%s5041_s0 + $0x80] sm:$0xff]   ;;  %v3456_v38 = vld [vmem:[%s5041_s0 + $0x210] sm:$0xff]   ;;  %v3457_v39 = vld [vmem:[%s5041_s0 + $0x88] sm:$0xff]  }
   0xd   :  { %v3458_v40 = vld [vmem:[%s5041_s0 + $0x218] sm:$0xff]   ;;  %v3459_v41 = vld [vmem:[%s5041_s0 + $0x90] sm:$0xff]   ;;  %v3460_v42 = vld [vmem:[%s5041_s0 + $0x220] sm:$0xff]  }
   0xe   :  { %v3461_v43 = vld [vmem:[%s5041_s0 + $0x98] sm:$0xff]   ;;  %v3462_v44 = vld [vmem:[%s5041_s0 + $0x228] sm:$0xff]   ;;  %v3463_v45 = vld [vmem:[%s5041_s0 + $0xa0] sm:$0xff]  }
   0xf   :  { %v3464_v46 = vld [vmem:[%s5041_s0 + $0x230] sm:$0xff]   ;;  %v3465_v47 = vld [vmem:[%s5041_s0 + $0xa8] sm:$0xff]   ;;  %v3466_v48 = vld [vmem:[%s5041_s0 + $0x238] sm:$0xff]  }
  0x10   :  { %v3467_v49 = vld [vmem:[%s5041_s0 + $0xb0] sm:$0xff]   ;;  %v3468_v50 = vld [vmem:[%s5041_s0 + $0x240] sm:$0xff]   ;;  %v3469_v51 = vld [vmem:[%s5041_s0 + $0xb8] sm:$0xff]  }
  0x11   :  { %3228 = vmatmul.mubr.msk.bf16.gmra.mrb[4].mxu0 %vm711_vm2, %v3429_v11  ;;  %3328 = vmatmul.mubr.msk.bf16.gmra.mrb[4].mxu1 %vm711_vm2, %v3430_v12  ;;  %v3470_v52 = vld [vmem:[%s5041_s0 + $0x248] sm:$0xff]   ;;  %v3471_v53 = vld [vmem:[%s5041_s0 + $0xc0] sm:$0xff]   ;;  %v3472_v54 = vld [vmem:[%s5041_s0 + $0x250] sm:$0xff]  }
  0x12   :  { %3231 = vmatprep.mubr.msk.bf16.mxu0 %vm711_vm2, %v3431_v13  ;;  %3331 = vmatprep.mubr.msk.bf16.mxu1 %vm711_vm2, %v3432_v14  ;;  %v3473_v55 = vld [vmem:[%s5041_s0 + $0xc8] sm:$0xff]   ;;  %v3474_v56 = vld [vmem:[%s5041_s0 + $0x258] sm:$0xff]   ;;  %v3475_v57 = vld [vmem:[%s5041_s0 + $0xd0] sm:$0xff]  }
  0x13   :  { %v3476_v58 = vld [vmem:[%s5041_s0 + $0x260] sm:$0xff]   ;;  %v3477_v59 = vld [vmem:[%s5041_s0 + $0xd8] sm:$0xff]   ;;  %v3478_v60 = vld [vmem:[%s5041_s0 + $0x268] sm:$0xff]  }
  0x14   :  { %v3479_v61 = vld [vmem:[%s5041_s0 + $0xe0] sm:$0xff]   ;;  %v3480_v62 = vld [vmem:[%s5041_s0 + $0x270] sm:$0xff]   ;;  %v3481_v63 = vld [vmem:[%s5041_s0 + $0xe8] sm:$0xff]  }
  0x15   :  { %v3482_v0 = vld [vmem:[%s5041_s0 + $0x278] sm:$0xff]   ;;  %v3483_v1 = vld [vmem:[%s5041_s0 + $0xf0] sm:$0xff]   ;;  %v3484_v2 = vld [vmem:[%s5041_s0 + $0x280] sm:$0xff]  }
  0x16   :  { %v3485_v3 = vld [vmem:[%s5041_s0 + $0xf8] sm:$0xff]   ;;  %v3486_v4 = vld [vmem:[%s5041_s0 + $0x288] sm:$0xff]   ;;  %v3487_v5 = vld [vmem:[%s5041_s0 + $0x100] sm:$0xff]  }
  0x17   :  { %v3488_v6 = vld [vmem:[%s5041_s0 + $0x290] sm:$0xff]   ;;  %v3489_v7 = vld [vmem:[%s5041_s0 + $0x108] sm:$0xff]   ;;  %v3490_v8 = vld [vmem:[%s5041_s0 + $0x298] sm:$0xff]  }
  0x18   :  { %v3491_v9 = vld [vmem:[%s5041_s0 + $0x110] sm:$0xff]   ;;  %v3492_v10 = vld [vmem:[%s5041_s0 + $0x2a0] sm:$0xff]   ;;  %v3493_v11 = vld [vmem:[%s5041_s0 + $0x118] sm:$0xff]  }
  0x19   :  { %3232 = vmatmul.mubr.msk.bf16.gmra.mrb[8].mxu0 %vm711_vm2, %v3433_v15  ;;  %3332 = vmatmul.mubr.msk.bf16.gmra.mrb[8].mxu1 %vm711_vm2, %v3434_v16  ;;  %v3494_v12 = vld [vmem:[%s5041_s0 + $0x2a8] sm:$0xff]   ;;  %v3495_v13 = vld [vmem:[%s5041_s0 + $0x120] sm:$0xff]   ;;  %v3496_v14 = vld [vmem:[%s5041_s0 + $0x2b0] sm:$0xff]  }
  0x1a   :  { %3235 = vmatprep.mubr.msk.bf16.mxu0 %vm711_vm2, %v3435_v17  ;;  %3335 = vmatprep.mubr.msk.bf16.mxu1 %vm711_vm2, %v3436_v18  ;;  %v3497_v15 = vld [vmem:[%s5041_s0 + $0x128] sm:$0xff]   ;;  %v3498_v16 = vld [vmem:[%s5041_s0 + $0x2b8] sm:$0xff]   ;;  %v3499_v17 = vld [vmem:[%s5041_s0 + $0x130] sm:$0xff]  }
  0x1b   :  { %v3500_v18 = vld [vmem:[%s5041_s0 + $0x2c0] sm:$0xff]  }
  0x21   :  { %3236 = vmatmul.mubr.msk.bf16.gmra.mrb[12].mxu0 %vm711_vm2, %v3437_v19  ;;  %3336 = vmatmul.mubr.msk.bf16.gmra.mrb[12].mxu1 %vm711_vm2, %v3438_v20  ;;  %v3501_v19 = vld [vmem:[%s5041_s0 + $0x138] sm:$0xff]   ;;  %v3502_v20 = vld [vmem:[%s5041_s0 + $0x2c8] sm:$0xff]  }
  0x22   :  { %3239 = vmatprep.mubr.msk.bf16.mxu0 %vm711_vm2, %v3439_v21  ;;  %3339 = vmatprep.mubr.msk.bf16.mxu1 %vm711_vm2, %v3440_v22  ;;  %v3503_v21 = vld [vmem:[%s5041_s0 + $0x140] sm:$0xff]   ;;  %v3504_v22 = vld [vmem:[%s5041_s0 + $0x2d0] sm:$0xff]  }
  0x29   :  { %3240 = vmatmul.mubr.msk.bf16.gmra.mrb[16].mxu0 %vm711_vm2, %v3441_v23  ;;  %3340 = vmatmul.mubr.msk.bf16.gmra.mrb[16].mxu1 %vm711_vm2, %v3442_v24  ;;  %v3505_v23 = vld [vmem:[%s5041_s0 + $0x148] sm:$0xff]   ;;  %v3506_v24 = vld [vmem:[%s5041_s0 + $0x2d8] sm:$0xff]  }
  0x2a   :  { %3243 = vmatprep.mubr.msk.bf16.mxu0 %vm711_vm2, %v3443_v25  ;;  %3343 = vmatprep.mubr.msk.bf16.mxu1 %vm711_vm2, %v3444_v26  ;;  %v3507_v25 = vld [vmem:[%s5041_s0 + $0x150] sm:$0xff]   ;;  %v3508_v26 = vld [vmem:[%s5041_s0 + $0x2e0] sm:$0xff]  }
  0x31   :  { %3244 = vmatmul.mubr.msk.bf16.gmra.mrb[20].mxu0 %vm711_vm2, %v3445_v27  ;;  %3344 = vmatmul.mubr.msk.bf16.gmra.mrb[20].mxu1 %vm711_vm2, %v3446_v28  ;;  %v3509_v27 = vld [vmem:[%s5041_s0 + $0x158] sm:$0xff]   ;;  %v3510_v28 = vld [vmem:[%s5041_s0 + $0x2e8] sm:$0xff]  }
  0x32   :  { %3247 = vmatprep.mubr.msk.bf16.mxu0 %vm711_vm2, %v3447_v29  ;;  %3347 = vmatprep.mubr.msk.bf16.mxu1 %vm711_vm2, %v3448_v30  ;;  %v3511_v29 = vld [vmem:[%s5041_s0 + $0x160] sm:$0xff]   ;;  %v3512_v30 = vld [vmem:[%s5041_s0 + $0x2f0] sm:$0xff]  }
  0x39   :  { %3248 = vmatmul.mubr.msk.bf16.gmra.mrb[24].mxu0 %vm711_vm2, %v3449_v31  ;;  %3348 = vmatmul.mubr.msk.bf16.gmra.mrb[24].mxu1 %vm711_vm2, %v3450_v32  ;;  %v3513_v31 = vld [vmem:[%s5041_s0 + $0x168] sm:$0xff]   ;;  %v3514_v32 = vld [vmem:[%s5041_s0 + $0x2f8] sm:$0xff]  }
  0x3a   :  { %3251 = vmatprep.mubr.msk.bf16.mxu0 %vm711_vm2, %v3451_v33  ;;  %3351 = vmatprep.mubr.msk.bf16.mxu1 %vm711_vm2, %v3452_v34  ;;  %v3515_v33 = vld [vmem:[%s5041_s0 + $0x170] sm:$0xff]   ;;  %v3516_v34 = vld [vmem:[%s5041_s0 + $0x300] sm:$0xff]  }
  0x41   :  { %3252 = vmatmul.mubr.msk.bf16.gmra.mrb[28].mxu0 %vm711_vm2, %v3453_v35  ;;  %3352 = vmatmul.mubr.msk.bf16.gmra.mrb[28].mxu1 %vm711_vm2, %v3454_v36  ;;  %v3517_v35 = vld [vmem:[%s5041_s0 + $0x178] sm:$0xff]   ;;  %v3518_v36 = vld [vmem:[%s5041_s0 + $0x308] sm:$0xff]  }
  0x42   :  { %3255 = vmatprep.mubr.msk.bf16.mxu0 %vm711_vm2, %v3455_v37  ;;  %3355 = vmatprep.mubr.msk.bf16.mxu1 %vm711_vm2, %v3456_v38  ;;  %v3519_v37 = vld [vmem:[%s5041_s0 + $0x180] sm:$0xff]   ;;  %v3520_v38 = vld [vmem:[%s5041_s0 + $0x188] sm:$0xff]  }
  0x49   :  { %3256 = vmatmul.mubr.msk.bf16.gmra.mrb[32].mxu0 %vm711_vm2, %v3457_v39  ;;  %3356 = vmatmul.mubr.msk.bf16.gmra.mrb[32].mxu1 %vm711_vm2, %v3458_v40 }
  0x4a   :  { %3259 = vmatprep.mubr.msk.bf16.mxu0 %vm711_vm2, %v3459_v41  ;;  %3359 = vmatprep.mubr.msk.bf16.mxu1 %vm711_vm2, %v3460_v42 }
  0x51   :  { %3260 = vmatmul.mubr.msk.bf16.gmra.mrb[36].mxu0 %vm711_vm2, %v3461_v43  ;;  %3360 = vmatmul.mubr.msk.bf16.gmra.mrb[36].mxu1 %vm711_vm2, %v3462_v44 }
  0x52   :  { %3263 = vmatprep.mubr.msk.bf16.mxu0 %vm711_vm2, %v3463_v45  ;;  %3363 = vmatprep.mubr.msk.bf16.mxu1 %vm711_vm2, %v3464_v46 }
  0x59   :  { %3264 = vmatmul.mubr.msk.bf16.gmra.mrb[40].mxu0 %vm711_vm2, %v3465_v47  ;;  %3364 = vmatmul.mubr.msk.bf16.gmra.mrb[40].mxu1 %vm711_vm2, %v3466_v48 }
  0x5a   :  { %3267 = vmatprep.mubr.msk.bf16.mxu0 %vm711_vm2, %v3467_v49  ;;  %3367 = vmatprep.mubr.msk.bf16.mxu1 %vm711_vm2, %v3468_v50 }
  0x61   :  { %3268 = vmatmul.mubr.msk.bf16.gmra.mrb[44].mxu0 %vm711_vm2, %v3469_v51  ;;  %3368 = vmatmul.mubr.msk.bf16.gmra.mrb[44].mxu1 %vm711_vm2, %v3470_v52 }
  0x62   :  { %3271 = vmatprep.mubr.msk.bf16.mxu0 %vm711_vm2, %v3471_v53  ;;  %3371 = vmatprep.mubr.msk.bf16.mxu1 %vm711_vm2, %v3472_v54 }
  0x69   :  { %3272 = vmatmul.mubr.msk.bf16.gmra.mrb[48].mxu0 %vm711_vm2, %v3473_v55  ;;  %3372 = vmatmul.mubr.msk.bf16.gmra.mrb[48].mxu1 %vm711_vm2, %v3474_v56 }
  0x6a   :  { %3275 = vmatprep.mubr.msk.bf16.mxu0 %vm711_vm2, %v3475_v57  ;;  %3375 = vmatprep.mubr.msk.bf16.mxu1 %vm711_vm2, %v3476_v58 }
  0x71   :  { %3276 = vmatmul.mubr.msk.bf16.gmra.mrb[52].mxu0 %vm711_vm2, %v3477_v59  ;;  %3376 = vmatmul.mubr.msk.bf16.gmra.mrb[52].mxu1 %vm711_vm2, %v3478_v60 }
  0x72   :  { %3279 = vmatprep.mubr.msk.bf16.mxu0 %vm711_vm2, %v3479_v61  ;;  %3379 = vmatprep.mubr.msk.bf16.mxu1 %vm711_vm2, %v3480_v62 }
  0x79   :  { %3280 = vmatmul.mubr.msk.bf16.gmra.mrb[56].mxu0 %vm711_vm2, %v3481_v63  ;;  %3380 = vmatmul.mubr.msk.bf16.gmra.mrb[56].mxu1 %vm711_vm2, %v3482_v0 }
  0x7a   :  { %3283 = vmatprep.mubr.msk.bf16.mxu0 %vm711_vm2, %v3483_v1  ;;  %3383 = vmatprep.mubr.msk.bf16.mxu1 %vm711_vm2, %v3484_v2 }
  0x81   :  { %3284 = vmatmul.mubr.msk.bf16.gmra.mrb[60].mxu0 %vm711_vm2, %v3485_v3  ;;  %3384 = vmatmul.mubr.msk.bf16.gmra.mrb[60].mxu1 %vm711_vm2, %v3486_v4 }
  0x82   :  { %3287 = vmatprep.mubr.msk.bf16.mxu0 %vm711_vm2, %v3487_v5  ;;  %3387 = vmatprep.mubr.msk.bf16.mxu1 %vm711_vm2, %v3488_v6 }
  0x89   :  { %3288 = vmatmul.mubr.msk.bf16.gmra.mrb[64].mxu0 %vm711_vm2, %v3489_v7  ;;  %3388 = vmatmul.mubr.msk.bf16.gmra.mrb[64].mxu1 %vm711_vm2, %v3490_v8 }
  0x8a   :  { %3291 = vmatprep.mubr.msk.bf16.mxu0 %vm711_vm2, %v3491_v9  ;;  %3391 = vmatprep.mubr.msk.bf16.mxu1 %vm711_vm2, %v3492_v10 }
  0x91   :  { %3292 = vmatmul.mubr.msk.bf16.gmra.mrb[68].mxu0 %vm711_vm2, %v3493_v11  ;;  %3392 = vmatmul.mubr.msk.bf16.gmra.mrb[68].mxu1 %vm711_vm2, %v3494_v12 }
  0x92   :  { %3295 = vmatprep.mubr.msk.bf16.mxu0 %vm711_vm2, %v3495_v13  ;;  %3395 = vmatprep.mubr.msk.bf16.mxu1 %vm711_vm2, %v3496_v14 }
  0x99   :  { %3296 = vmatmul.mubr.msk.bf16.gmra.mrb[72].mxu0 %vm711_vm2, %v3497_v15  ;;  %3396 = vmatmul.mubr.msk.bf16.gmra.mrb[72].mxu1 %vm711_vm2, %v3498_v16 }
  0x9a   :  { %3299 = vmatprep.mubr.msk.bf16.mxu0 %vm711_vm2, %v3499_v17  ;;  %3399 = vmatprep.mubr.msk.bf16.mxu1 %vm711_vm2, %v3500_v18 }
  0xa1   :  { %3300 = vmatmul.mubr.msk.bf16.gmra.mrb[76].mxu0 %vm711_vm2, %v3501_v19  ;;  %3400 = vmatmul.mubr.msk.bf16.gmra.mrb[76].mxu1 %vm711_vm2, %v3502_v20 }
  0xa2   :  { %3303 = vmatprep.mubr.msk.bf16.mxu0 %vm711_vm2, %v3503_v21  ;;  %3403 = vmatprep.mubr.msk.bf16.mxu1 %vm711_vm2, %v3504_v22 }
  0xa9   :  { %3304 = vmatmul.mubr.msk.bf16.gmra.mrb[80].mxu0 %vm711_vm2, %v3505_v23  ;;  %3404 = vmatmul.mubr.msk.bf16.gmra.mrb[80].mxu1 %vm711_vm2, %v3506_v24 }
  0xaa   :  { %3307 = vmatprep.mubr.msk.bf16.mxu0 %vm711_vm2, %v3507_v25  ;;  %3407 = vmatprep.mubr.msk.bf16.mxu1 %vm711_vm2, %v3508_v26  ;;  %v4033_v25 = vld [vmem:[%s5042_s2] ss:$0 sm:$0xff] }
  0xb1   :  { %3308 = vmatmul.mubr.msk.bf16.gmra.mrb[84].mxu0 %vm711_vm2, %v3509_v27  ;;  %3408 = vmatmul.mubr.msk.bf16.gmra.mrb[84].mxu1 %vm711_vm2, %v3510_v28 }
  0xb2   :  { %3311 = vmatprep.mubr.msk.bf16.mxu0 %vm711_vm2, %v3511_v29  ;;  %3411 = vmatprep.mubr.msk.bf16.mxu1 %vm711_vm2, %v3512_v30 }
  0xb9   :  { %3312 = vmatmul.mubr.msk.bf16.gmra.mrb[88].mxu0 %vm711_vm2, %v3513_v31  ;;  %3412 = vmatmul.mubr.msk.bf16.gmra.mrb[88].mxu1 %vm711_vm2, %v3514_v32 }
  0xba   :  { %3315 = vmatprep.mubr.msk.bf16.mxu0 %vm711_vm2, %v3515_v33  ;;  %3415 = vmatprep.mubr.msk.bf16.mxu1 %vm711_vm2, %v3516_v34 }
  0xc1   :  { %3316 = vmatmul.mubr.msk.bf16.gmra.mrb[92].mxu0 %vm711_vm2, %v3517_v35  ;;  %3416 = vmatmul.mubr.msk.bf16.gmra.mrb[92].mxu1 %vm711_vm2, %v3518_v36  ;;  %v4054_v36 = vld [vmem:[%s5043_s3] ss:$0 sm:$0xff] }
  0xc2   :  { %3319 = vmatprep.mubr.msk.bf16.mxu0 %vm711_vm2, %v3519_v37 }
  0xc9   :  { %3320 = vmatmul.mubr.msk.bf16.gmra.mrb[96].mxu0 %vm711_vm2, %v3520_v38 }
  0xdc   :  { %v3225_v39 = vpop.f32.mrb[0].mxu0  ;;  %v3325_v40 = vpop.f32.mrb[0].mxu1 }
  0xdd   :  { %v1047_v41 = vpop.f32.mrb[1].mxu0  ;;  %v1447_v42 = vpop.f32.mrb[1].mxu1  ;;  %v1839_v32 = vmul.f32 %v3225_v39, %v4033_v25  ;;  %v1939_v34 = vmul.f32 %v3325_v40, %v4033_v25 }
  0xde   :  { %v3226_v43 = vpop.f32.mrb[2].mxu0  ;;  %v3326_v44 = vpop.f32.mrb[2].mxu1  ;;  %v1837_v33 = vmul.f32 %v4033_v25, %v1047_v41  ;;  %v1937_v35 = vmul.f32 %v4033_v25, %v1447_v42 }
  0xdf   :  { %v1050_v45 = vpop.f32.mrb[3].mxu0  ;;  %v3944_v46 = vpop.f32.mrb[3].mxu1  ;;  %v1840_v37 = vmul.f32 %v3226_v43, %v4033_v25  ;;  %v4066_v40 = vadd.f32 %v4054_v36, %v1939_v34 }
  0xe0   :  { %v1838_v38 = vmul.f32 %v4033_v25, %v1050_v45  ;;  %v4063_v39 = vadd.f32 %v4054_v36, %v1837_v33  ;;  %v4069_v41 = vadd.f32 %v4054_v36, %v1937_v35  ;;  %v1938_v45 = vmul.f32 %v4033_v25, %v3944_v46 }
  0xe1   :  { %5055 = vst [vmem:[#allocation7_spill] sm:$0xff] %v4066_v40  ;;  %v4076_v43 = vadd.f32 %v4054_v36, %v1840_v37 }
  0xe2   :  { %5054 = vst [vmem:[#allocation6_spill] sm:$0xff] %v4063_v39  ;;  %5056 = vst [vmem:[#allocation8_spill] sm:$0xff] %v4069_v41  ;;  %v4089_v35 = vadd.f32 %v4054_v36, %v1838_v38 }
  0xe3   :  { %5057 = vst [vmem:[#allocation9_spill] sm:$0xff] %v4076_v43 }
  0xe4   :  { %v3946_v47 = vpop.f32.mrb[4].mxu0  ;;  %v3948_v48 = vpop.f32.mrb[4].mxu1  ;;  %5058 = vst [vmem:[#allocation10_spill] sm:$0xff] %v4089_v35 }
  0xe5   :  { %v3950_v49 = vpop.f32.mrb[5].mxu0  ;;  %v3952_v50 = vpop.f32.mrb[5].mxu1 }
  0xe6   :  { %v3954_v51 = vpop.f32.mrb[6].mxu0  ;;  %v3956_v52 = vpop.f32.mrb[6].mxu1  ;;  %v1841_v37 = vmul.f32 %v4033_v25, %v3950_v49 }
  0xe7   :  { %v3958_v53 = vpop.f32.mrb[7].mxu0  ;;  %v3960_v54 = vpop.f32.mrb[7].mxu1 }
  0xe8   :  { %v1842_v38 = vmul.f32 %v4033_v25, %v3958_v53 }
  0xec   :  { %v3962_v55 = vpop.f32.mrb[8].mxu0  ;;  %v3964_v56 = vpop.f32.mrb[8].mxu1 }
  0xed   :  { %v3966_v57 = vpop.f32.mrb[9].mxu0  ;;  %v3968_v58 = vpop.f32.mrb[9].mxu1 }
  0xee   :  { %v3970_v59 = vpop.f32.mrb[10].mxu0  ;;  %v3972_v60 = vpop.f32.mrb[10].mxu1  ;;  %v1845_v40 = vmul.f32 %v4033_v25, %v3966_v57  ;;  %v1945_v53 = vmul.f32 %v4033_v25, %v3968_v58  ;;  %v4134_v57 = vadd.f32 %v4054_v36, %v1841_v37 }
  0xef   :  { %v3974_v61 = vpop.f32.mrb[11].mxu0  ;;  %v3976_v62 = vpop.f32.mrb[11].mxu1 }
  0xf0   :  { %v1846_v58 = vmul.f32 %v4033_v25, %v3974_v61  ;;  %v4159_v61 = vadd.f32 %v4054_v36, %v1845_v40  ;;  %v1946_v40 = vmul.f32 %v4033_v25, %v3976_v62 }
  0xf2   :  { %5063 = vst [vmem:[#allocation15_spill] sm:$0xff] %v4159_v61 }
  0xf4   :  { %v3978_v63 = vpop.f32.mrb[12].mxu0  ;;  %v3980_v0 = vpop.f32.mrb[12].mxu1 }
  0xf5   :  { %v3982_v1 = vpop.f32.mrb[13].mxu0  ;;  %v3984_v2 = vpop.f32.mrb[13].mxu1 }
  0xf6   :  { %v3986_v3 = vpop.f32.mrb[14].mxu0  ;;  %v3988_v4 = vpop.f32.mrb[14].mxu1 }
  0xf7   :  { %v3990_v5 = vpop.f32.mrb[15].mxu0  ;;  %v3992_v6 = vpop.f32.mrb[15].mxu1 }
  0xfc   :  { %v3994_v7 = vpop.f32.mrb[16].mxu0  ;;  %v3996_v8 = vpop.f32.mrb[16].mxu1 }
  0xfd   :  { %v3998_v9 = vpop.f32.mrb[17].mxu0  ;;  %v4000_v10 = vpop.f32.mrb[17].mxu1 }
  0xfe   :  { %v4002_v11 = vpop.f32.mrb[18].mxu0  ;;  %v4004_v12 = vpop.f32.mrb[18].mxu1 }
  0xff   :  { %v4006_v13 = vpop.f32.mrb[19].mxu0  ;;  %v4008_v14 = vpop.f32.mrb[19].mxu1 }
 0x104   :  { %v4010_v15 = vpop.f32.mrb[20].mxu0  ;;  %v4012_v16 = vpop.f32.mrb[20].mxu1 }
 0x105   :  { %v4014_v17 = vpop.f32.mrb[21].mxu0  ;;  %v4016_v18 = vpop.f32.mrb[21].mxu1 }
 0x106   :  { %v4018_v19 = vpop.f32.mrb[22].mxu0  ;;  %v4020_v20 = vpop.f32.mrb[22].mxu1 }
 0x107   :  { %v4022_v21 = vpop.f32.mrb[23].mxu0  ;;  %v4024_v22 = vpop.f32.mrb[23].mxu1 }
 0x10c   :  { %v4026_v23 = vpop.f32.mrb[24].mxu0  ;;  %v4028_v24 = vpop.f32.mrb[24].mxu1 }
 0x10d   :  { %v4035_v26 = vpop.f32.mrb[25].mxu0  ;;  %v4037_v27 = vpop.f32.mrb[25].mxu1 }
 0x10e   :  { %v4039_v28 = vpop.f32.mrb[26].mxu0  ;;  %v4041_v29 = vpop.f32.mrb[26].mxu1 }
 0x10f   :  { %5050 = vst [vmem:[#allocation2_spill] sm:$0xff] %v4041_v29  ;;  %v4043_v30 = vpop.f32.mrb[27].mxu0  ;;  %v4045_v31 = vpop.f32.mrb[27].mxu1  ;;  %v1940_v29 = vmul.f32 %v3326_v44, %v4033_v25  ;;  %v1843_v44 = vmul.f32 %v3946_v47, %v4033_v25  ;;  %v1941_v47 = vmul.f32 %v4033_v25, %v3952_v50  ;;  %v1847_v50 = vmul.f32 %v3962_v55, %v4033_v25 }
 0x110   :  { %5051 = vst [vmem:[#allocation3_spill] sm:$0xff] %v4043_v30  ;;  %5052 = vst [vmem:[#allocation4_spill] sm:$0xff] %v4045_v31  ;;  %v4060_v31 = vadd.f32 %v4054_v36, %v1839_v32  ;;  %v1943_v32 = vmul.f32 %v3948_v48, %v4033_v25  ;;  %v1844_v48 = vmul.f32 %v3954_v51, %v4033_v25 }
 0x111   :  { %v4092_v41 = vadd.f32 %v4054_v36, %v1940_v29  ;;  %v1944_v29 = vmul.f32 %v3956_v52, %v4033_v25  ;;  %v1947_v51 = vmul.f32 %v3964_v56, %v4033_v25  ;;  %v4123_v52 = vadd.f32 %v4054_v36, %v1843_v44 }
 0x112   :  { %5053 = vst [vmem:[#allocation5_spill] sm:$0xff] %v4060_v31  ;;  %v4129_v31 = vadd.f32 %v4054_v36, %v1943_v32  ;;  %v1848_v55 = vmul.f32 %v3970_v59, %v4033_v25  ;;  %v4137_v56 = vadd.f32 %v4054_v36, %v1941_v47  ;;  %v1948_v44 = vmul.f32 %v3972_v60, %v4033_v25 }
 0x113   :  { %5059 = vst [vmem:[#allocation11_spill] sm:$0xff] %v4092_v41  ;;  %v1942_v41 = vmul.f32 %v4033_v25, %v3960_v54  ;;  %v4126_v54 = vadd.f32 %v4054_v36, %v1938_v45  ;;  %v4144_v45 = vadd.f32 %v4054_v36, %v1844_v48  ;;  %v4147_v32 = vadd.f32 %v4054_v36, %v1842_v38 }
 0x114   :  { %v4071_v42 = vpop.f32.mrb[28].mxu0  ;;  %v4073_v30 = vpop.f32.mrb[28].mxu1  ;;  %v4150_v59 = vadd.f32 %v4054_v36, %v1944_v29  ;;  %v4156_v47 = vadd.f32 %v4054_v36, %v1847_v50  ;;  %v4162_v60 = vadd.f32 %v4054_v36, %v1947_v51  ;;  %v4165_v48 = vadd.f32 %v4054_v36, %v1945_v53 }
 0x115   :  { %v4084_v33 = vpop.f32.mrb[29].mxu0  ;;  %v4086_v34 = vpop.f32.mrb[29].mxu1  ;;  %5060 = vst [vmem:[#allocation12_spill] sm:$0xff] %v4144_v45  ;;  %v4153_v37 = vadd.f32 %v4054_v36, %v1942_v41  ;;  %v4172_v29 = vadd.f32 %v4054_v36, %v1848_v55  ;;  %v1851_v41 = vmul.f32 %v3978_v63, %v4033_v25  ;;  %v1951_v50 = vmul.f32 %v3980_v0, %v4033_v25 }
 0x116   :  { %v4098_v46 = vpop.f32.mrb[30].mxu0  ;;  %v4100_v43 = vpop.f32.mrb[30].mxu1  ;;  %5061 = vst [vmem:[#allocation13_spill] sm:$0xff] %v4150_v59  ;;  %5062 = vst [vmem:[#allocation14_spill] sm:$0xff] %v4156_v47  ;;  %v4188_v61 = vadd.f32 %v4054_v36, %v1948_v44  ;;  %v1849_v55 = vmul.f32 %v4033_v25, %v3982_v1  ;;  %v1949_v63 = vmul.f32 %v4033_v25, %v3984_v2 }
 0x117   :  { %v4110_v49 = vpop.f32.mrb[31].mxu0  ;;  %v4112_v39 = vpop.f32.mrb[31].mxu1  ;;  %5064 = vst [vmem:[#allocation16_spill] sm:$0xff] %v4162_v60  ;;  %5065 = vst [vmem:[#allocation17_spill] sm:$0xff] %v4165_v48  ;;  %v4185_v48 = vadd.f32 %v4054_v36, %v1846_v58  ;;  %v1852_v0 = vmul.f32 %v3986_v3, %v4033_v25  ;;  %v1850_v58 = vmul.f32 %v4033_v25, %v3990_v5 }
 0x118   :  { %5066 = vst [vmem:[#allocation18_spill] sm:$0xff] %v4172_v29  ;;  %5067 = vst [vmem:[#allocation19_spill] sm:$0xff] %v4188_v61  ;;  %v1952_v44 = vmul.f32 %v3988_v4, %v4033_v25  ;;  %v1950_v61 = vmul.f32 %v4033_v25, %v3992_v6  ;;  %v1855_v2 = vmul.f32 %v3994_v7, %v4033_v25 }
 0x119   :  { %v1853_v47 = vmul.f32 %v4033_v25, %v3998_v9  ;;  %v1955_v3 = vmul.f32 %v3996_v8, %v4033_v25  ;;  %v1953_v5 = vmul.f32 %v4033_v25, %v4000_v10  ;;  %v4219_v4 = vadd.f32 %v4054_v36, %v1851_v41 }
 0x11a   :  { %v4222_v6 = vadd.f32 %v4054_v36, %v1946_v40  ;;  %v4225_v59 = vadd.f32 %v4054_v36, %v1951_v50  ;;  %v1856_v7 = vmul.f32 %v4002_v11, %v4033_v25  ;;  %v4230_v9 = vadd.f32 %v4054_v36, %v1849_v55 }
 0x11b   :  { %v4233_v8 = vadd.f32 %v4054_v36, %v1949_v63  ;;  %v1854_v10 = vmul.f32 %v4033_v25, %v4006_v13  ;;  %v1956_v41 = vmul.f32 %v4004_v12, %v4033_v25  ;;  %v4240_v40 = vadd.f32 %v4054_v36, %v1852_v0 }
 0x11c   :  { %v4167_v38 = vpop.f32.mrb[32].mxu0  ;;  %v4169_v45 = vpop.f32.mrb[32].mxu1  ;;  %v4243_v50 = vadd.f32 %v4054_v36, %v1850_v58  ;;  %v4246_v11 = vadd.f32 %v4054_v36, %v1952_v44  ;;  %v4249_v55 = vadd.f32 %v4054_v36, %v1950_v61  ;;  %v4252_v63 = vadd.f32 %v4054_v36, %v1855_v2 }
 0x11d   :  { %v4180_v51 = vpop.f32.mrb[33].mxu0  ;;  %v4182_v53 = vpop.f32.mrb[33].mxu1  ;;  %5068 = vst [vmem:[#allocation20_spill] sm:$0xff] %v4240_v40  ;;  %v4255_v13 = vadd.f32 %v4054_v36, %v1853_v47  ;;  %v4258_v12 = vadd.f32 %v4054_v36, %v1955_v3  ;;  %v4261_v0 = vadd.f32 %v4054_v36, %v1953_v5  ;;  %v4268_v44 = vadd.f32 %v4054_v36, %v1856_v7 }
 0x11e   :  { %v4194_v62 = vpop.f32.mrb[34].mxu0  ;;  %v4196_v29 = vpop.f32.mrb[34].mxu1  ;;  %5069 = vst [vmem:[#allocation21_spill] sm:$0xff] %v4246_v11  ;;  %5070 = vst [vmem:[#allocation22_spill] sm:$0xff] %v4252_v63  ;;  %v1859_v61 = vmul.f32 %v4010_v15, %v4033_v25  ;;  %v1954_v47 = vmul.f32 %v4033_v25, %v4008_v14  ;;  %v1959_v2 = vmul.f32 %v4012_v16, %v4033_v25 }
 0x11f   :  { %v4206_v1 = vpop.f32.mrb[35].mxu0  ;;  %v4208_v60 = vpop.f32.mrb[35].mxu1  ;;  %5071 = vst [vmem:[#allocation23_spill] sm:$0xff] %v4255_v13  ;;  %5072 = vst [vmem:[#allocation24_spill] sm:$0xff] %v4258_v12  ;;  %v4284_v13 = vadd.f32 %v4054_v36, %v1956_v41  ;;  %v1857_v7 = vmul.f32 %v4033_v25, %v4014_v17  ;;  %v1957_v15 = vmul.f32 %v4033_v25, %v4016_v18 }
 0x120   :  { %5073 = vst [vmem:[#allocation25_spill] sm:$0xff] %v4261_v0  ;;  %5074 = vst [vmem:[#allocation26_spill] sm:$0xff] %v4268_v44  ;;  %v4281_v0 = vadd.f32 %v4054_v36, %v1854_v10  ;;  %v1860_v16 = vmul.f32 %v4018_v19, %v4033_v25  ;;  %v1858_v10 = vmul.f32 %v4033_v25, %v4022_v21 }
 0x121   :  { %5076 = vst [vmem:[#allocation28_spill] sm:$0xff] %v4284_v13  ;;  %v1960_v41 = vmul.f32 %v4020_v20, %v4033_v25  ;;  %v1958_v13 = vmul.f32 %v4033_v25, %v4024_v22  ;;  %v1863_v18 = vmul.f32 %v4026_v23, %v4033_v25  ;;  %v1861_v63 = vmul.f32 %v4033_v25, %v4035_v26 }
 0x122   :  { %5075 = vst [vmem:[#allocation27_spill] sm:$0xff] %v4281_v0  ;;  %v1963_v19 = vmul.f32 %v4028_v24, %v4033_v25  ;;  %v1961_v21 = vmul.f32 %v4033_v25, %v4037_v27  ;;  %v4315_v20 = vadd.f32 %v4054_v36, %v1859_v61  ;;  %v4318_v22 = vadd.f32 %v4054_v36, %v1954_v47  ;;  %v5078_v0 = vld [vmem:[#allocation3_spill] sm:$0xff]  ;;  %v5079_v61 = vld [vmem:[#allocation2_spill] sm:$0xff] }
 0x123   :  { %v4321_v11 = vadd.f32 %v4054_v36, %v1959_v2  ;;  %v1864_v23 = vmul.f32 %v4039_v28, %v4033_v25  ;;  %v4326_v26 = vadd.f32 %v4054_v36, %v1857_v7  ;;  %v4329_v24 = vadd.f32 %v4054_v36, %v1957_v15 }
 0x124   :  { %v4263_v58 = vpop.f32.mrb[36].mxu0  ;;  %v4265_v40 = vpop.f32.mrb[36].mxu1  ;;  %5077 = vst [vmem:[#allocation29_spill] sm:$0xff] %v4315_v20  ;;  %v1862_v27 = vmul.f32 %v4033_v25, %v5078_v0  ;;  %v1964_v20 = vmul.f32 %v5079_v61, %v4033_v25  ;;  %v4336_v47 = vadd.f32 %v4054_v36, %v1860_v16  ;;  %v4339_v2 = vadd.f32 %v4054_v36, %v1858_v10 }
 0x125   :  { %v4276_v3 = vpop.f32.mrb[37].mxu0  ;;  %v4278_v5 = vpop.f32.mrb[37].mxu1  ;;  %v4342_v28 = vadd.f32 %v4054_v36, %v1960_v41  ;;  %v4345_v7 = vadd.f32 %v4054_v36, %v1958_v13  ;;  %v4348_v15 = vadd.f32 %v4054_v36, %v1863_v18  ;;  %v4351_v0 = vadd.f32 %v4054_v36, %v1861_v63 }
 0x126   :  { %v4290_v14 = vpop.f32.mrb[38].mxu0  ;;  %v4292_v44 = vpop.f32.mrb[38].mxu1  ;;  %5080 = vst [vmem:[#allocation3_spill] sm:$0xff] %v4336_v47  ;;  %v4354_v61 = vadd.f32 %v4054_v36, %v1963_v19  ;;  %v4357_v16 = vadd.f32 %v4054_v36, %v1961_v21  ;;  %v4360_v41 = vadd.f32 %v4054_v36, %v1864_v23  ;;  %v1867_v13 = vmul.f32 %v4071_v42, %v4033_v25 }
 0x127   :  { %v4302_v17 = vpop.f32.mrb[39].mxu0  ;;  %v4304_v12 = vpop.f32.mrb[39].mxu1  ;;  %5081 = vst [vmem:[#allocation2_spill] sm:$0xff] %v4342_v28  ;;  %5082 = vst [vmem:[#allocation30_spill] sm:$0xff] %v4348_v15  ;;  %v5087_v28 = vld [vmem:[#allocation4_spill] sm:$0xff]  ;;  %v1967_v63 = vmul.f32 %v4073_v30, %v4033_v25  ;;  %v4372_v21 = vadd.f32 %v4054_v36, %v1964_v20  ;;  %v1865_v23 = vmul.f32 %v4033_v25, %v4084_v33 }
 0x128   :  { %5083 = vst [vmem:[#allocation31_spill] sm:$0xff] %v4351_v0  ;;  %5084 = vst [vmem:[#allocation32_spill] sm:$0xff] %v4354_v61  ;;  %v1962_v18 = vmul.f32 %v4033_v25, %v5087_v28  ;;  %v4369_v61 = vadd.f32 %v4054_v36, %v1862_v27  ;;  %v1965_v42 = vmul.f32 %v4033_v25, %v4086_v34 }
 0x129   :  { %5085 = vst [vmem:[#allocation33_spill] sm:$0xff] %v4357_v16  ;;  %5086 = vst [vmem:[#allocation34_spill] sm:$0xff] %v4360_v41  ;;  %v1868_v28 = vmul.f32 %v4098_v46, %v4033_v25  ;;  %v1866_v30 = vmul.f32 %v4033_v25, %v4110_v49  ;;  %v1968_v27 = vmul.f32 %v4100_v43, %v4033_v25 }
 0x12a   :  { %5088 = vst [vmem:[#allocation4_spill] sm:$0xff] %v4369_v61  ;;  %5089 = vst [vmem:[#allocation35_spill] sm:$0xff] %v4372_v21  ;;  %v1966_v20 = vmul.f32 %v4033_v25, %v4112_v39  ;;  %v1871_v33 = vmul.f32 %v4167_v38, %v4033_v25  ;;  %v1869_v34 = vmul.f32 %v4033_v25, %v4180_v51 }
 0x12b   :  { %v1971_v46 = vmul.f32 %v4169_v45, %v4033_v25  ;;  %v1969_v49 = vmul.f32 %v4033_v25, %v4182_v53  ;;  %v4397_v43 = vadd.f32 %v4054_v36, %v1867_v13  ;;  %v4400_v39 = vadd.f32 %v4054_v36, %v1962_v18 }
 0x12c   :  { %v3265_v10 = vpop.f32.mrb[40].mxu0  ;;  %v3365_v47 = vpop.f32.mrb[40].mxu1  ;;  %v4403_v61 = vadd.f32 %v4054_v36, %v1967_v63  ;;  %v1872_v38 = vmul.f32 %v4194_v62, %v4033_v25  ;;  %v4408_v51 = vadd.f32 %v4054_v36, %v1865_v23  ;;  %v4411_v45 = vadd.f32 %v4054_v36, %v1965_v42 }
 0x12d   :  { %v1207_v0 = vpop.f32.mrb[41].mxu0  ;;  %v1607_v19 = vpop.f32.mrb[41].mxu1  ;;  %v1870_v53 = vmul.f32 %v4033_v25, %v4206_v1  ;;  %v1972_v13 = vmul.f32 %v4196_v29, %v4033_v25  ;;  %v4418_v18 = vadd.f32 %v4054_v36, %v1868_v28  ;;  %v4421_v63 = vadd.f32 %v4054_v36, %v1866_v30 }
 0x12e   :  { %v3266_v41 = vpop.f32.mrb[42].mxu0  ;;  %v3366_v16 = vpop.f32.mrb[42].mxu1  ;;  %5090 = vst [vmem:[#allocation36_spill] sm:$0xff] %v4411_v45  ;;  %v4424_v62 = vadd.f32 %v4054_v36, %v1968_v27  ;;  %v4427_v23 = vadd.f32 %v4054_v36, %v1966_v20  ;;  %v4430_v42 = vadd.f32 %v4054_v36, %v1871_v33  ;;  %v4433_v1 = vadd.f32 %v4054_v36, %v1869_v34 }
 0x12f   :  { %v1210_v21 = vpop.f32.mrb[43].mxu0  ;;  %v4386_v15 = vpop.f32.mrb[43].mxu1  ;;  %5091 = vst [vmem:[#allocation37_spill] sm:$0xff] %v4418_v18  ;;  %v4436_v29 = vadd.f32 %v4054_v36, %v1971_v46  ;;  %v4439_v28 = vadd.f32 %v4054_v36, %v1969_v49  ;;  %v4442_v27 = vadd.f32 %v4054_v36, %v1872_v38  ;;  %v1875_v20 = vmul.f32 %v4263_v58, %v4033_v25 }
 0x130   :  { %5092 = vst [vmem:[#allocation38_spill] sm:$0xff] %v4424_v62  ;;  %5093 = vst [vmem:[#allocation39_spill] sm:$0xff] %v4430_v42  ;;  %v1970_v33 = vmul.f32 %v4033_v25, %v4208_v60  ;;  %v1975_v34 = vmul.f32 %v4265_v40, %v4033_v25  ;;  %v4454_v49 = vadd.f32 %v4054_v36, %v1972_v13 }
 0x131   :  { %5094 = vst [vmem:[#allocation40_spill] sm:$0xff] %v4433_v1  ;;  %5095 = vst [vmem:[#allocation41_spill] sm:$0xff] %v4436_v29  ;;  %v4451_v29 = vadd.f32 %v4054_v36, %v1870_v53  ;;  %v1873_v38 = vmul.f32 %v4033_v25, %v4276_v3  ;;  %v1973_v58 = vmul.f32 %v4033_v25, %v4278_v5 }
 0x132   :  { %5096 = vst [vmem:[#allocation42_spill] sm:$0xff] %v4439_v28  ;;  %5097 = vst [vmem:[#allocation43_spill] sm:$0xff] %v4442_v27  ;;  %v1876_v60 = vmul.f32 %v4290_v14, %v4033_v25  ;;  %v1874_v40 = vmul.f32 %v4033_v25, %v4302_v17  ;;  %v1976_v53 = vmul.f32 %v4292_v44, %v4033_v25 }
 0x133   :  { %5098 = vst [vmem:[#allocation44_spill] sm:$0xff] %v4451_v29  ;;  %5099 = vst [vmem:[#allocation45_spill] sm:$0xff] %v4454_v49  ;;  %v1974_v13 = vmul.f32 %v4033_v25, %v4304_v12  ;;  %v1879_v5 = vmul.f32 %v3265_v10, %v4033_v25  ;;  %v1877_v42 = vmul.f32 %v4033_v25, %v1207_v0 }
 0x134   :  { %v3269_v30 = vpop.f32.mrb[44].mxu0  ;;  %v3369_v18 = vpop.f32.mrb[44].mxu1  ;;  %v1979_v62 = vmul.f32 %v3365_v47, %v4033_v25  ;;  %v1977_v14 = vmul.f32 %v4033_v25, %v1607_v19  ;;  %v4479_v17 = vadd.f32 %v4054_v36, %v1875_v20  ;;  %v4482_v44 = vadd.f32 %v4054_v36, %v1970_v33 }
 0x135   :  { %v1223_v1 = vpop.f32.mrb[45].mxu0  ;;  %v1623_v46 = vpop.f32.mrb[45].mxu1  ;;  %v4485_v12 = vadd.f32 %v4054_v36, %v1975_v34  ;;  %v1880_v29 = vmul.f32 %v3266_v41, %v4033_v25  ;;  %v4489_v45 = vadd.f32 %v4054_v36, %v1873_v38  ;;  %v4492_v0 = vadd.f32 %v4054_v36, %v1973_v58 }
 0x136   :  { %v3270_v27 = vpop.f32.mrb[46].mxu0  ;;  %v4460_v28 = vpop.f32.mrb[46].mxu1  ;;  %v1878_v47 = vmul.f32 %v4033_v25, %v1210_v21  ;;  %v1980_v10 = vmul.f32 %v3366_v16, %v4033_v25  ;;  %v4497_v19 = vadd.f32 %v4054_v36, %v1876_v60  ;;  %v4500_v20 = vadd.f32 %v4054_v36, %v1874_v40 }
 0x137   :  { %v4470_v49 = vpop.f32.mrb[47].mxu0  ;;  %v4472_v3 = vpop.f32.mrb[47].mxu1  ;;  %v4503_v33 = vadd.f32 %v4054_v36, %v1976_v53  ;;  %v4506_v41 = vadd.f32 %v4054_v36, %v1974_v13  ;;  %v4509_v34 = vadd.f32 %v4054_v36, %v1879_v5  ;;  %v4512_v38 = vadd.f32 %v4054_v36, %v1877_v42 }
 0x138   :  { %5100 = vst [vmem:[#allocation46_spill] sm:$0xff] %v4497_v19  ;;  %v4515_v16 = vadd.f32 %v4054_v36, %v1979_v62  ;;  %v4518_v21 = vadd.f32 %v4054_v36, %v1977_v14  ;;  %v4521_v40 = vadd.f32 %v4054_v36, %v1880_v29  ;;  %v1978_v53 = vmul.f32 %v4033_v25, %v4386_v15 }
 0x139   :  { %5101 = vst [vmem:[#allocation47_spill] sm:$0xff] %v4503_v33  ;;  %5102 = vst [vmem:[#allocation48_spill] sm:$0xff] %v4509_v34  ;;  %v4532_v62 = vadd.f32 %v4054_v36, %v1878_v47  ;;  %v4535_v14 = vadd.f32 %v4054_v36, %v1980_v10  ;;  %v1883_v29 = vmul.f32 %v3269_v30, %v4033_v25 }
 0x13a   :  { %5103 = vst [vmem:[#allocation49_spill] sm:$0xff] %v4512_v38  ;;  %5104 = vst [vmem:[#allocation50_spill] sm:$0xff] %v4515_v16  ;;  %v1881_v10 = vmul.f32 %v4033_v25, %v1223_v1  ;;  %v4560_v1 = vadd.f32 %v4054_v36, %v1978_v53  ;;  %v1984_v53 = vmul.f32 %v4460_v28, %v4033_v25 }
 0x13b   :  { %5105 = vst [vmem:[#allocation51_spill] sm:$0xff] %v4518_v21  ;;  %5106 = vst [vmem:[#allocation52_spill] sm:$0xff] %v4521_v40  ;;  %v1983_v40 = vmul.f32 %v3369_v18, %v4033_v25  ;;  %v1982_v28 = vmul.f32 %v4033_v25, %v4472_v3 }
 0x13c   :  { %v3273_v58 = vpop.f32.mrb[48].mxu0  ;;  %v3373_v60 = vpop.f32.mrb[48].mxu1  ;;  %5107 = vst [vmem:[#allocation53_spill] sm:$0xff] %v4535_v14  ;;  %v1981_v14 = vmul.f32 %v4033_v25, %v1623_v46 }
 0x13d   :  { %v1887_v13 = vmul.f32 %v3273_v58, %v4033_v25  ;;  %v1987_v5 = vmul.f32 %v3373_v60, %v4033_v25  ;;  %v4527_v42 = vpop.f32.mrb[49].mxu0  ;;  %v4529_v38 = vpop.f32.mrb[49].mxu1 }
 0x13e   :  { %v3274_v21 = vpop.f32.mrb[50].mxu0  ;;  %v3374_v15 = vpop.f32.mrb[50].mxu1 }
 0x13f   :  { %v4540_v58 = vadd.f32 %v4054_v36, %v1887_v13  ;;  %v2190_v60 = vadd.f32 %v4054_v36, %v1987_v5  ;;  %v1888_v16 = vmul.f32 %v3274_v21, %v4033_v25  ;;  %v1988_v34 = vmul.f32 %v3374_v15, %v4033_v25  ;;  %v1242_v47 = vpop.f32.mrb[51].mxu0  ;;  %v1642_v33 = vpop.f32.mrb[51].mxu1 }
 0x140   :  { %v1886_v30 = vmul.f32 %v4033_v25, %v1242_v47  ;;  %v1986_v18 = vmul.f32 %v4033_v25, %v1642_v33  ;;  %v4557_v15 = vadd.f32 %v4054_v36, %v1883_v29  ;;  %v1884_v47 = vmul.f32 %v3270_v27, %v4033_v25 }
 0x141   :  { %5108 = vst [vmem:[#allocation54_spill] sm:$0xff] %v4540_v58  ;;  %v2288_v19 = vmax.f32 %v4126_v54, %v2190_v60  ;;  %v2091_v5 = vadd.f32 %v4054_v36, %v1888_v16  ;;  %v4554_v21 = vadd.f32 %v4054_v36, %v1988_v34  ;;  %v4568_v54 = vadd.f32 %v4054_v36, %v1983_v40  ;;  %v5112_v16 = vld [vmem:[#allocation5_spill] sm:$0xff]  ;;  %v5113_v34 = vld [vmem:[#allocation7_spill] sm:$0xff] }
 0x142   :  { %5109 = vst [vmem:[#allocation55_spill] sm:$0xff] %v4557_v15  ;;  %v4563_v46 = vadd.f32 %v4054_v36, %v1886_v30  ;;  %v2189_v33 = vadd.f32 %v4054_v36, %v1986_v18  ;;  %v4574_v29 = vadd.f32 %v4054_v36, %v1881_v10  ;;  %v5116_v18 = vld [vmem:[#allocation8_spill] sm:$0xff]  ;;  %v1882_v40 = vmul.f32 %v4033_v25, %v4470_v49 }
 0x143   :  { %5111 = vst [vmem:[#allocation57_spill] sm:$0xff] %v4568_v54  ;;  %v2238_v60 = vmax.f32 %v5112_v16, %v2091_v5  ;;  %v2289_v13 = vmax.f32 %v5113_v34, %v4554_v21  ;;  %v4584_v5 = vadd.f32 %v4054_v36, %v1981_v14  ;;  %v4599_v3 = vadd.f32 %v4054_v36, %v1884_v47  ;;  %v5120_v47 = vld [vmem:[#allocation11_spill] sm:$0xff] }
 0x144   :  { %5110 = vst [vmem:[#allocation56_spill] sm:$0xff] %v4563_v46  ;;  %5114 = vst [vmem:[#allocation5_spill] sm:$0xff] %v4574_v29  ;;  %v2287_v35 = vmax.f32 %v5116_v18, %v2189_v33  ;;  %v3277_v27 = vpop.f32.mrb[52].mxu0  ;;  %v3377_v15 = vpop.f32.mrb[52].mxu1 }
 0x145   :  { %5117 = vst [vmem:[#allocation7_spill] sm:$0xff] %v4584_v5  ;;  %v1891_v21 = vmul.f32 %v3277_v27, %v4033_v25  ;;  %v1991_v10 = vmul.f32 %v3377_v15, %v4033_v25  ;;  %v1255_v16 = vpop.f32.mrb[53].mxu0  ;;  %v1655_v34 = vpop.f32.mrb[53].mxu1  ;;  %5118 = vst [vmem:[#allocation8_spill] sm:$0xff] %v4599_v3 }
 0x146   :  { %v2336_v58 = vmax.f32 %v2238_v60, %v2287_v35  ;;  %v1889_v33 = vmul.f32 %v4033_v25, %v1255_v16  ;;  %v1989_v18 = vmul.f32 %v4033_v25, %v1655_v34  ;;  %v3278_v46 = vpop.f32.mrb[54].mxu0  ;;  %v3378_v30 = vpop.f32.mrb[54].mxu1  ;;  %v5119_v34 = vld [vmem:[#allocation9_spill] sm:$0xff] }
 0x147   :  { %v2094_v49 = vadd.f32 %v4054_v36, %v1891_v21  ;;  %v4594_v14 = vadd.f32 %v4054_v36, %v1991_v10  ;;  %v1892_v27 = vmul.f32 %v3278_v46, %v4033_v25  ;;  %v1992_v15 = vmul.f32 %v3378_v30, %v4033_v25  ;;  %v1258_v5 = vpop.f32.mrb[55].mxu0  ;;  %v1658_v29 = vpop.f32.mrb[55].mxu1 }
 0x148   :  { %v2092_v35 = vadd.f32 %v4054_v36, %v1889_v33  ;;  %v2192_v60 = vadd.f32 %v4054_v36, %v1989_v18  ;;  %v1890_v16 = vmul.f32 %v4033_v25, %v1258_v5  ;;  %v1990_v18 = vmul.f32 %v4033_v25, %v1658_v29 }
 0x149   :  { %v2241_v21 = vmax.f32 %v4147_v32, %v2094_v49  ;;  %v2292_v10 = vmax.f32 %v4153_v37, %v4594_v14  ;;  %v2095_v46 = vadd.f32 %v4054_v36, %v1892_v27  ;;  %v4609_v30 = vadd.f32 %v4054_v36, %v1992_v15 }
 0x14a   :  { %v2239_v54 = vmax.f32 %v5119_v34, %v2092_v35  ;;  %v2290_v3 = vmax.f32 %v5120_v47, %v2192_v60  ;;  %v2093_v33 = vadd.f32 %v4054_v36, %v1890_v16  ;;  %v4616_v5 = vadd.f32 %v4054_v36, %v1882_v40 }
 0x14b   :  { %v4619_v32 = vadd.f32 %v4054_v36, %v1984_v53  ;;  %v2242_v37 = vmax.f32 %v4123_v52, %v2095_v46  ;;  %v2193_v35 = vadd.f32 %v4054_v36, %v1990_v18  ;;  %v4627_v29 = vadd.f32 %v4054_v36, %v1982_v28 }
 0x14c   :  { %v2337_v14 = vmax.f32 %v2239_v54, %v2288_v19  ;;  %v2339_v27 = vmax.f32 %v2241_v21, %v2290_v3  ;;  %v2240_v15 = vmax.f32 %v4134_v57, %v2093_v33  ;;  %v3281_v60 = vpop.f32.mrb[56].mxu0  ;;  %v3381_v16 = vpop.f32.mrb[56].mxu1  ;;  %v2385_v40 = vmax.f32 %v2336_v58, 0.0 }
 0x14d   :  { %5121 = vst [vmem:[#allocation9_spill] sm:$0xff] %v4619_v32  ;;  %v1895_v53 = vmul.f32 %v3281_v60, %v4033_v25  ;;  %v1995_v34 = vmul.f32 %v3381_v16, %v4033_v25  ;;  %v1271_v52 = vpop.f32.mrb[57].mxu0  ;;  %v1671_v46 = vpop.f32.mrb[57].mxu1  ;;  %v2291_v54 = vmax.f32 %v4137_v56, %v2193_v35 }
 0x14e   :  { %v2386_v47 = vmax.f32 %v2337_v14, 0.0  ;;  %v2388_v49 = vmax.f32 %v2339_v27, 0.0  ;;  %v2338_v19 = vmax.f32 %v2240_v15, %v2289_v13  ;;  %v3282_v57 = vpop.f32.mrb[58].mxu0  ;;  %v3382_v3 = vpop.f32.mrb[58].mxu1  ;;  %v1893_v58 = vmul.f32 %v4033_v25, %v1271_v52 }
 0x14f   :  { %v2098_v21 = vadd.f32 %v4054_v36, %v1895_v53  ;;  %v4634_v33 = vadd.f32 %v4054_v36, %v1995_v34  ;;  %v1993_v28 = vmul.f32 %v4033_v25, %v1671_v46  ;;  %v1274_v18 = vpop.f32.mrb[59].mxu0  ;;  %v1674_v60 = vpop.f32.mrb[59].mxu1  ;;  %v2340_v14 = vmax.f32 %v2242_v37, %v2291_v54  ;;  %v5122_v34 = vld [vmem:[#allocation12_spill] sm:$0xff] }
 0x150   :  { %v2987_v16 = vpack.c.bf16 %v2386_v47, %v2385_v40  ;;  %v2387_v32 = vmax.f32 %v2338_v19, 0.0  ;;  %v1896_v13 = vmul.f32 %v3282_v57, %v4033_v25  ;;  %v2096_v15 = vadd.f32 %v4054_v36, %v1893_v58 }
 0x151   :  { %v2245_v56 = vmax.f32 %v4185_v48, %v2098_v21  ;;  %v2296_v27 = vmax.f32 %v4222_v6, %v4634_v33  ;;  %v2196_v35 = vadd.f32 %v4054_v36, %v1993_v28  ;;  %v4646_v53 = vmul.f32 %v4033_v25, %v4527_v42  ;;  %v5123_v6 = vld [vmem:[#allocation13_spill] sm:$0xff] }
 0x152   :  { %3099 = vst [vmem:[%s5044_s4 + $0x8] sm:$0xff] %v2987_v16   ;;  %v2992_v37 = vpack.c.bf16 %v2388_v49, %v2387_v32  ;;  %v2099_v40 = vadd.f32 %v4054_v36, %v1896_v13  ;;  %v1996_v48 = vmul.f32 %v3382_v3, %v4033_v25  ;;  %v2243_v52 = vmax.f32 %v5122_v34, %v2096_v15  ;;  %v5124_v49 = vld [vmem:[#allocation14_spill] sm:$0xff]  ;;  %v5125_v16 = vld [vmem:[#allocation16_spill] sm:$0xff] }
 0x153   :  { %v2294_v46 = vmax.f32 %v5123_v6, %v2196_v35  ;;  %v1894_v47 = vmul.f32 %v4033_v25, %v1274_v18  ;;  %v1994_v19 = vmul.f32 %v4033_v25, %v1674_v60  ;;  %v4659_v42 = vmul.f32 %v4033_v25, %v4529_v38 }
 0x154   :  { %3100 = vst [vmem:[%s5044_s4 + $0x10] sm:$0xff] %v2992_v37   ;;  %v2389_v32 = vmax.f32 %v2340_v14, 0.0  ;;  %v2246_v54 = vmax.f32 %v5124_v49, %v2099_v40  ;;  %v4666_v57 = vadd.f32 %v4054_v36, %v1996_v48  ;;  %v3285_v3 = vpop.f32.mrb[60].mxu0  ;;  %v3385_v21 = vpop.f32.mrb[60].mxu1  ;;  %v2341_v33 = vmax.f32 %v2243_v52, %v2292_v10  ;;  %v5127_v52 = vld [vmem:[#allocation17_spill] sm:$0xff] }
 0x155   :  { %v2343_v58 = vmax.f32 %v2245_v56, %v2294_v46  ;;  %v2097_v28 = vadd.f32 %v4054_v36, %v1894_v47  ;;  %v2197_v18 = vadd.f32 %v4054_v36, %v1994_v19  ;;  %v1287_v38 = vpop.f32.mrb[61].mxu0  ;;  %v1687_v60 = vpop.f32.mrb[61].mxu1  ;;  %v1899_v14 = vmul.f32 %v3285_v3, %v4033_v25  ;;  %v5126_v56 = vld [vmem:[#allocation15_spill] sm:$0xff] }
 0x156   :  { %v1999_v15 = vmul.f32 %v3385_v21, %v4033_v25  ;;  %v1897_v35 = vmul.f32 %v4033_v25, %v1287_v38  ;;  %v3286_v37 = vpop.f32.mrb[62].mxu0  ;;  %v3386_v40 = vpop.f32.mrb[62].mxu1  ;;  %v2390_v48 = vmax.f32 %v2341_v33, 0.0  ;;  %v1997_v21 = vmul.f32 %v4033_v25, %v1687_v60 }
 0x157   :  { %v2392_v10 = vmax.f32 %v2343_v58, 0.0  ;;  %v2244_v34 = vmax.f32 %v5126_v56, %v2097_v28  ;;  %v2295_v6 = vmax.f32 %v5127_v52, %v2197_v18  ;;  %v1290_v46 = vpop.f32.mrb[63].mxu0  ;;  %v1690_v47 = vpop.f32.mrb[63].mxu1  ;;  %v2102_v19 = vadd.f32 %v4054_v36, %v1899_v14  ;;  %v5129_v56 = vld [vmem:[#allocation18_spill] sm:$0xff] }
 0x158   :  { %v4679_v49 = vadd.f32 %v4054_v36, %v1999_v15  ;;  %v2100_v3 = vadd.f32 %v4054_v36, %v1897_v35  ;;  %v2997_v38 = vpack.c.bf16 %v2390_v48, %v2389_v32  ;;  %v5128_v33 = vmax.f32 %v4129_v31, %v4609_v30  ;;  %v5130_v35 = vld [vmem:[#allocation19_spill] sm:$0xff] }
 0x159   :  { %v2344_v13 = vmax.f32 %v2246_v54, %v2295_v6  ;;  %v1900_v28 = vmul.f32 %v3286_v37, %v4033_v25  ;;  %v2249_v18 = vmax.f32 %v4243_v50, %v2102_v19  ;;  %v2200_v52 = vadd.f32 %v4054_v36, %v1997_v21 }
 0x15a   :  { %v2342_v58 = vmax.f32 %v2244_v34, %v5128_v33  ;;  %v2300_v14 = vmax.f32 %v4249_v55, %v4679_v49  ;;  %v2247_v15 = vmax.f32 %v5129_v56, %v2100_v3  ;;  %3101 = vst [vmem:[%s5044_s4 + $0x18] sm:$0xff] %v2997_v38   ;;  %v2000_v30 = vmul.f32 %v3386_v40, %v4033_v25 }
 0x15b   :  { %v2393_v60 = vmax.f32 %v2344_v13, 0.0  ;;  %v2103_v31 = vadd.f32 %v4054_v36, %v1900_v28  ;;  %v2298_v50 = vmax.f32 %v5130_v35, %v2200_v52  ;;  %v1898_v37 = vmul.f32 %v4033_v25, %v1290_v46 }
 0x15c   :  { %v2391_v32 = vmax.f32 %v2342_v58, 0.0  ;;  %v2345_v54 = vmax.f32 %v2247_v15, %v2296_v27  ;;  %v1998_v55 = vmul.f32 %v4033_v25, %v1690_v47  ;;  %v3289_v48 = vpop.f32.mrb[64].mxu0  ;;  %v3389_v34 = vpop.f32.mrb[64].mxu1  ;;  %v4702_v49 = vadd.f32 %v4054_v36, %v2000_v30  ;;  %v5131_v30 = vld [vmem:[#allocation27_spill] sm:$0xff] }
 0x15d   :  { %v2250_v19 = vmax.f32 %v4219_v4, %v2103_v31  ;;  %v1903_v13 = vmul.f32 %v3289_v48, %v4033_v25  ;;  %v1303_v3 = vpop.f32.mrb[65].mxu0  ;;  %v1703_v21 = vpop.f32.mrb[65].mxu1  ;;  %v2347_v27 = vmax.f32 %v2249_v18, %v2298_v50  ;;  %v2101_v38 = vadd.f32 %v4054_v36, %v1898_v37 }
 0x15e   :  { %v3002_v6 = vpack.c.bf16 %v2392_v10, %v2391_v32  ;;  %v2394_v40 = vmax.f32 %v2345_v54, 0.0  ;;  %v2201_v46 = vadd.f32 %v4054_v36, %v1998_v55  ;;  %v3290_v33 = vpop.f32.mrb[66].mxu0  ;;  %v3390_v47 = vpop.f32.mrb[66].mxu1  ;;  %v2301_v4 = vmax.f32 %v4225_v59, %v4702_v49 }
 0x15f   :  { %v2106_v10 = vadd.f32 %v4054_v36, %v1903_v13  ;;  %v2003_v58 = vmul.f32 %v3389_v34, %v4033_v25  ;;  %v1901_v28 = vmul.f32 %v4033_v25, %v1303_v3  ;;  %v1306_v18 = vpop.f32.mrb[67].mxu0  ;;  %v1706_v56 = vpop.f32.mrb[67].mxu1  ;;  %v2396_v52 = vmax.f32 %v2347_v27, 0.0  ;;  %v5133_v34 = vld [vmem:[#allocation20_spill] sm:$0xff] }
 0x160   :  { %3102 = vst [vmem:[%s5044_s4 + $0x20] sm:$0xff] %v3002_v6   ;;  %v3007_v15 = vpack.c.bf16 %v2394_v40, %v2393_v60  ;;  %v2248_v32 = vmax.f32 %v4230_v9, %v2101_v38  ;;  %v2299_v31 = vmax.f32 %v4233_v8, %v2201_v46  ;;  %v2001_v50 = vmul.f32 %v4033_v25, %v1703_v21  ;;  %v5134_v38 = vld [vmem:[#allocation21_spill] sm:$0xff] }
 0x161   :  { %v2253_v54 = vmax.f32 %v5131_v30, %v2106_v10  ;;  %v4719_v35 = vadd.f32 %v4054_v36, %v2003_v58  ;;  %v2104_v59 = vadd.f32 %v4054_v36, %v1901_v28  ;;  %v5132_v60 = vmax.f32 %v5125_v16, %v4666_v57  ;;  %v5135_v28 = vld [vmem:[#allocation22_spill] sm:$0xff] }
 0x162   :  { %3103 = vst [vmem:[%s5044_s4 + $0x28] sm:$0xff] %v3007_v15   ;;  %v2348_v9 = vmax.f32 %v2250_v19, %v2299_v31  ;;  %v1904_v8 = vmul.f32 %v3290_v33, %v4033_v25  ;;  %v2004_v55 = vmul.f32 %v3390_v47, %v4033_v25  ;;  %v2204_v49 = vadd.f32 %v4054_v36, %v2001_v50  ;;  %v5136_v15 = vld [vmem:[#allocation24_spill] sm:$0xff]  ;;  %v5137_v50 = vld [vmem:[#allocation23_spill] sm:$0xff] }
 0x163   :  { %v2346_v37 = vmax.f32 %v2248_v32, %v5132_v60  ;;  %v2304_v48 = vmax.f32 %v4318_v22, %v4719_v35  ;;  %v2251_v6 = vmax.f32 %v5133_v34, %v2104_v59  ;;  %v1902_v13 = vmul.f32 %v4033_v25, %v1306_v18 }
 0x164   :  { %v2397_v21 = vmax.f32 %v2348_v9, 0.0  ;;  %v2107_v40 = vadd.f32 %v4054_v36, %v1904_v8  ;;  %v4738_v57 = vadd.f32 %v4054_v36, %v2004_v55  ;;  %v3293_v16 = vpop.f32.mrb[68].mxu0  ;;  %v3393_v19 = vpop.f32.mrb[68].mxu1  ;;  %v2302_v46 = vmax.f32 %v5134_v38, %v2204_v49 }
 0x165   :  { %v2395_v3 = vmax.f32 %v2346_v37, 0.0  ;;  %v2349_v27 = vmax.f32 %v2251_v6, %v2300_v14  ;;  %v2105_v22 = vadd.f32 %v4054_v36, %v1902_v13  ;;  %v2002_v33 = vmul.f32 %v4033_v25, %v1706_v56  ;;  %v1319_v47 = vpop.f32.mrb[69].mxu0  ;;  %v1719_v10 = vpop.f32.mrb[69].mxu1  ;;  %v5138_v13 = vld [vmem:[#allocation25_spill] sm:$0xff] }
 0x166   :  { %v2254_v18 = vmax.f32 %v5135_v28, %v2107_v40  ;;  %v2305_v32 = vmax.f32 %v5136_v15, %v4738_v57  ;;  %v1907_v31 = vmul.f32 %v3293_v16, %v4033_v25  ;;  %v3294_v30 = vpop.f32.mrb[70].mxu0  ;;  %v3394_v35 = vpop.f32.mrb[70].mxu1  ;;  %v2351_v14 = vmax.f32 %v2253_v54, %v2302_v46  ;;  %v5139_v46 = vld [vmem:[#allocation26_spill] sm:$0xff] }
 0x167   :  { %v3012_v58 = vpack.c.bf16 %v2396_v52, %v2395_v3  ;;  %v2398_v59 = vmax.f32 %v2349_v27, 0.0  ;;  %v2252_v60 = vmax.f32 %v5137_v50, %v2105_v22  ;;  %v2205_v37 = vadd.f32 %v4054_v36, %v2002_v33  ;;  %v1322_v9 = vpop.f32.mrb[71].mxu0  ;;  %v1722_v56 = vpop.f32.mrb[71].mxu1  ;;  %v5140_v33 = vld [vmem:[#allocation28_spill] sm:$0xff] }
 0x168   :  { %v2110_v52 = vadd.f32 %v4054_v36, %v1907_v31  ;;  %v2007_v8 = vmul.f32 %v3393_v19, %v4033_v25  ;;  %v1905_v55 = vmul.f32 %v4033_v25, %v1319_v47  ;;  %v2005_v34 = vmul.f32 %v4033_v25, %v1719_v10 }
 0x169   :  { %3104 = vst [vmem:[%s5044_s4 + $0x30] sm:$0xff] %v3012_v58   ;;  %v3017_v6 = vpack.c.bf16 %v2398_v59, %v2397_v21  ;;  %v2400_v54 = vmax.f32 %v2351_v14, 0.0  ;;  %v2350_v49 = vmax.f32 %v2252_v60, %v2301_v4  ;;  %v2303_v3 = vmax.f32 %v5138_v13, %v2205_v37 }
 0x16a   :  { %v2257_v40 = vmax.f32 %v4339_v2, %v2110_v52  ;;  %v4759_v57 = vadd.f32 %v4054_v36, %v2007_v8  ;;  %v2108_v16 = vadd.f32 %v4054_v36, %v1905_v55  ;;  %v2208_v27 = vadd.f32 %v4054_v36, %v2005_v34 }
 0x16b   :  { %3105 = vst [vmem:[%s5044_s4 + $0x38] sm:$0xff] %v3017_v6   ;;  %v2399_v19 = vmax.f32 %v2350_v49, 0.0  ;;  %v2352_v38 = vmax.f32 %v2254_v18, %v2303_v3  ;;  %v1908_v21 = vmul.f32 %v3294_v30, %v4033_v25  ;;  %v2008_v4 = vmul.f32 %v3394_v35, %v4033_v25 }
 0x16c   :  { %v2308_v2 = vmax.f32 %v4345_v7, %v4759_v57  ;;  %v2255_v22 = vmax.f32 %v5139_v46, %v2108_v16  ;;  %v2306_v47 = vmax.f32 %v5140_v33, %v2208_v27  ;;  %v1906_v10 = vmul.f32 %v4033_v25, %v1322_v9  ;;  %v3297_v58 = vpop.f32.mrb[72].mxu0  ;;  %v3397_v28 = vpop.f32.mrb[72].mxu1  ;;  %v5141_v9 = vld [vmem:[#allocation29_spill] sm:$0xff] }
 0x16d   :  { %v3022_v15 = vpack.c.bf16 %v2400_v54, %v2399_v19  ;;  %v2401_v31 = vmax.f32 %v2352_v38, 0.0  ;;  %v2111_v59 = vadd.f32 %v4054_v36, %v1908_v21  ;;  %v4775_v18 = vadd.f32 %v4054_v36, %v2008_v4  ;;  %v1335_v30 = vpop.f32.mrb[73].mxu0  ;;  %v1735_v35 = vpop.f32.mrb[73].mxu1  ;;  %v5142_v4 = vld [vmem:[#allocation4_spill] sm:$0xff] }
 0x16e   :  { %v2353_v14 = vmax.f32 %v2255_v22, %v2304_v48  ;;  %v2355_v50 = vmax.f32 %v2257_v40, %v2306_v47  ;;  %v2109_v7 = vadd.f32 %v4054_v36, %v1906_v10  ;;  %v2006_v60 = vmul.f32 %v4033_v25, %v1722_v56  ;;  %v3298_v37 = vpop.f32.mrb[74].mxu0  ;;  %v3398_v52 = vpop.f32.mrb[74].mxu1 }
 0x16f   :  { %3106 = vst [vmem:[%s5044_s4 + $0x40] sm:$0xff] %v3022_v15   ;;  %v2258_v8 = vmax.f32 %v5141_v9, %v2111_v59  ;;  %v2309_v55 = vmax.f32 %v4321_v11, %v4775_v18  ;;  %v1911_v34 = vmul.f32 %v3297_v58, %v4033_v25  ;;  %v2011_v48 = vmul.f32 %v3397_v28, %v4033_v25  ;;  %v1338_v6 = vpop.f32.mrb[75].mxu0  ;;  %v1738_v54 = vpop.f32.mrb[75].mxu1  ;;  %v5143_v15 = vld [vmem:[#allocation3_spill] sm:$0xff]  ;;  %v5144_v59 = vld [vmem:[#allocation2_spill] sm:$0xff] }
 0x170   :  { %v2402_v49 = vmax.f32 %v2353_v14, 0.0  ;;  %v2404_v13 = vmax.f32 %v2355_v50, 0.0  ;;  %v2256_v56 = vmax.f32 %v4326_v26, %v2109_v7  ;;  %v2209_v3 = vadd.f32 %v4054_v36, %v2006_v60  ;;  %v4812_v18 = vld [vmem:[%s5042_s2] ss:$0 sm:$0xff] }
 0x171   :  { %v2114_v40 = vadd.f32 %v4054_v36, %v1911_v34  ;;  %v4791_v57 = vadd.f32 %v4054_v36, %v2011_v48  ;;  %v1909_v16 = vmul.f32 %v4033_v25, %v1335_v30  ;;  %v2009_v11 = vmul.f32 %v4033_v25, %v1735_v35 }
 0x172   :  { %v3027_v27 = vpack.c.bf16 %v2402_v49, %v2401_v31  ;;  %v2354_v19 = vmax.f32 %v2256_v56, %v2305_v32  ;;  %v2307_v38 = vmax.f32 %v4329_v24, %v2209_v3  ;;  %v1912_v21 = vmul.f32 %v3298_v37, %v4033_v25  ;;  %v4823_v49 = vld [vmem:[%s5043_s3] ss:$0 sm:$0xff] }
 0x173   :  { %v2261_v46 = vmax.f32 %v5142_v4, %v2114_v40  ;;  %v2312_v26 = vmax.f32 %v4400_v39, %v4791_v57  ;;  %v2112_v22 = vadd.f32 %v4054_v36, %v1909_v16  ;;  %v2212_v33 = vadd.f32 %v4054_v36, %v2009_v11 }
 0x174   :  { %3107 = vst [vmem:[%s5044_s4 + $0x48] sm:$0xff] %v3027_v27   ;;  %v2403_v47 = vmax.f32 %v2354_v19, 0.0  ;;  %v2356_v10 = vmax.f32 %v2258_v8, %v2307_v38  ;;  %v2115_v32 = vadd.f32 %v4054_v36, %v1912_v21  ;;  %v2012_v24 = vmul.f32 %v3398_v52, %v4033_v25  ;;  %v3301_v58 = vpop.f32.mrb[76].mxu0  ;;  %v3401_v28 = vpop.f32.mrb[76].mxu1  ;;  %v5145_v25 = vld [vmem:[#allocation30_spill] sm:$0xff]  ;;  %v5147_v27 = vld [vmem:[#allocation31_spill] sm:$0xff] }
 0x175   :  { %v2259_v31 = vmax.f32 %v5143_v15, %v2112_v22  ;;  %v2310_v39 = vmax.f32 %v5144_v59, %v2212_v33  ;;  %v1910_v30 = vmul.f32 %v4812_v18, %v1338_v6  ;;  %v2010_v35 = vmul.f32 %v4812_v18, %v1738_v54  ;;  %v1351_v14 = vpop.f32.mrb[77].mxu0  ;;  %v1751_v50 = vpop.f32.mrb[77].mxu1  ;;  %v5148_v38 = vld [vmem:[#allocation33_spill] sm:$0xff]  ;;  %v5149_v15 = vld [vmem:[#allocation34_spill] sm:$0xff] }
 0x176   :  { %v3032_v7 = vpack.c.bf16 %v2404_v13, %v2403_v47  ;;  %v2405_v60 = vmax.f32 %v2356_v10, 0.0  ;;  %v2262_v37 = vmax.f32 %v5145_v25, %v2115_v32  ;;  %v4818_v52 = vadd.f32 %v4054_v36, %v2012_v24  ;;  %v3302_v9 = vpop.f32.mrb[78].mxu0  ;;  %v3402_v8 = vpop.f32.mrb[78].mxu1  ;;  %v5146_v36 = vld [vmem:[#allocation32_spill] sm:$0xff] }
 0x177   :  { %v2357_v34 = vmax.f32 %v2259_v31, %v2308_v2  ;;  %v2359_v48 = vmax.f32 %v2261_v46, %v2310_v39  ;;  %v2113_v6 = vadd.f32 %v4823_v49, %v1910_v30  ;;  %v2213_v54 = vadd.f32 %v4823_v49, %v2010_v35  ;;  %v1354_v13 = vpop.f32.mrb[79].mxu0  ;;  %v1754_v56 = vpop.f32.mrb[79].mxu1 }
 0x178   :  { %3108 = vst [vmem:[%s5044_s4 + $0x50] sm:$0xff] %v3032_v7   ;;  %v2313_v3 = vmax.f32 %v5146_v36, %v4818_v52  ;;  %v1915_v2 = vmul.f32 %v4812_v18, %v3301_v58  ;;  %v2015_v40 = vmul.f32 %v4812_v18, %v3401_v28  ;;  %v1913_v57 = vmul.f32 %v4812_v18, %v1351_v14 }
 0x179   :  { %v2406_v16 = vmax.f32 %v2357_v34, 0.0  ;;  %v2408_v11 = vmax.f32 %v2359_v48, 0.0  ;;  %v2260_v19 = vmax.f32 %v5147_v27, %v2113_v6  ;;  %v2311_v21 = vmax.f32 %v5148_v38, %v2213_v54 }
 0x17a   :  { %v2118_v4 = vadd.f32 %v4823_v49, %v1915_v2  ;;  %v4839_v46 = vadd.f32 %v4823_v49, %v2015_v40  ;;  %v2116_v22 = vadd.f32 %v4823_v49, %v1913_v57  ;;  %v2013_v33 = vmul.f32 %v4812_v18, %v1751_v50 }
 0x17b   :  { %v3037_v47 = vpack.c.bf16 %v2406_v16, %v2405_v60  ;;  %v2358_v10 = vmax.f32 %v2260_v19, %v2309_v55  ;;  %v2360_v32 = vmax.f32 %v2262_v37, %v2311_v21  ;;  %v1916_v24 = vmul.f32 %v4812_v18, %v3302_v9  ;;  %v5151_v21 = vld [vmem:[#allocation36_spill] sm:$0xff] }
 0x17c   :  { %v2265_v58 = vmax.f32 %v4421_v63, %v2118_v4  ;;  %v2316_v28 = vmax.f32 %v4427_v23, %v4839_v46  ;;  %v2263_v31 = vmax.f32 %v5149_v15, %v2116_v22  ;;  %v2216_v59 = vadd.f32 %v4823_v49, %v2013_v33  ;;  %v3305_v39 = vpop.f32.mrb[80].mxu0  ;;  %v3405_v30 = vpop.f32.mrb[80].mxu1  ;;  %v5150_v23 = vld [vmem:[#allocation35_spill] sm:$0xff]  ;;  %v5152_v46 = vld [vmem:[#allocation44_spill] sm:$0xff] }
 0x17d   :  { %3109 = vst [vmem:[%s5044_s4 + $0x58] sm:$0xff] %v3037_v47   ;;  %v2407_v35 = vmax.f32 %v2358_v10, 0.0  ;;  %v2409_v55 = vmax.f32 %v2360_v32, 0.0  ;;  %v2119_v14 = vadd.f32 %v4823_v49, %v1916_v24  ;;  %v2016_v50 = vmul.f32 %v4812_v18, %v3402_v8  ;;  %v1367_v63 = vpop.f32.mrb[81].mxu0  ;;  %v1767_v7 = vpop.f32.mrb[81].mxu1 }
 0x17e   :  { %v2361_v60 = vmax.f32 %v2263_v31, %v2312_v26  ;;  %v2314_v25 = vmax.f32 %v5150_v23, %v2216_v59  ;;  %v1914_v37 = vmul.f32 %v4812_v18, %v1354_v13  ;;  %v2014_v52 = vmul.f32 %v4812_v18, %v1754_v56  ;;  %v3306_v9 = vpop.f32.mrb[82].mxu0  ;;  %v3406_v34 = vpop.f32.mrb[82].mxu1  ;;  %v5153_v59 = vld [vmem:[#allocation37_spill] sm:$0xff] }
 0x17f   :  { %v3042_v48 = vpack.c.bf16 %v2408_v11, %v2407_v35  ;;  %v2266_v6 = vmax.f32 %v4397_v43, %v2119_v14  ;;  %v2219_v54 = vadd.f32 %v4823_v49, %v2016_v50  ;;  %v1919_v36 = vmul.f32 %v4812_v18, %v3305_v39  ;;  %v1370_v2 = vpop.f32.mrb[83].mxu0  ;;  %v1770_v8 = vpop.f32.mrb[83].mxu1 }
 0x180   :  { %v2410_v40 = vmax.f32 %v2361_v60, 0.0  ;;  %v2363_v57 = vmax.f32 %v2265_v58, %v2314_v25  ;;  %v2117_v26 = vadd.f32 %v4823_v49, %v1914_v37  ;;  %v2217_v16 = vadd.f32 %v4823_v49, %v2014_v52  ;;  %v5154_v37 = vld [vmem:[#allocation38_spill] sm:$0xff] }
 0x181   :  { %3110 = vst [vmem:[%s5044_s4 + $0x60] sm:$0xff] %v3042_v48   ;;  %v2317_v13 = vmax.f32 %v4403_v61, %v2219_v54  ;;  %v2122_v43 = vadd.f32 %v4823_v49, %v1919_v36  ;;  %v2019_v56 = vmul.f32 %v4812_v18, %v3405_v30  ;;  %v1917_v11 = vmul.f32 %v4812_v18, %v1367_v63  ;;  %v5155_v54 = vld [vmem:[#allocation39_spill] sm:$0xff] }
 0x182   :  { %v3047_v27 = vpack.c.bf16 %v2410_v40, %v2409_v55  ;;  %v2412_v19 = vmax.f32 %v2363_v57, 0.0  ;;  %v2264_v38 = vmax.f32 %v4408_v51, %v2117_v26  ;;  %v2315_v4 = vmax.f32 %v5151_v21, %v2217_v16 }
 0x183   :  { %v2269_v22 = vmax.f32 %v5152_v46, %v2122_v43  ;;  %v4873_v33 = vadd.f32 %v4823_v49, %v2019_v56  ;;  %v2120_v47 = vadd.f32 %v4823_v49, %v1917_v11  ;;  %v2017_v61 = vmul.f32 %v4812_v18, %v1767_v7  ;;  %v5157_v43 = vld [vmem:[#allocation40_spill] sm:$0xff]  ;;  %v5158_v46 = vld [vmem:[#allocation42_spill] sm:$0xff] }
 0x184   :  { %3111 = vst [vmem:[%s5044_s4 + $0x68] sm:$0xff] %v3047_v27   ;;  %v2362_v10 = vmax.f32 %v2264_v38, %v2313_v3  ;;  %v2364_v32 = vmax.f32 %v2266_v6, %v2315_v4  ;;  %v1920_v24 = vmul.f32 %v4812_v18, %v3306_v9  ;;  %v2020_v51 = vmul.f32 %v4812_v18, %v3406_v34  ;;  %v3309_v58 = vpop.f32.mrb[84].mxu0  ;;  %v3409_v15 = vpop.f32.mrb[84].mxu1 }
 0x185   :  { %v2320_v31 = vmax.f32 %v4482_v44, %v4873_v33  ;;  %v2267_v39 = vmax.f32 %v5153_v59, %v2120_v47  ;;  %v2220_v30 = vadd.f32 %v4823_v49, %v2017_v61  ;;  %v1918_v35 = vmul.f32 %v4812_v18, %v1370_v2  ;;  %v1383_v55 = vpop.f32.mrb[85].mxu0  ;;  %v1783_v14 = vpop.f32.mrb[85].mxu1  ;;  %v5156_v2 = vld [vmem:[#allocation41_spill] sm:$0xff] }
 0x186   :  { %v2411_v50 = vmax.f32 %v2362_v10, 0.0  ;;  %v2413_v3 = vmax.f32 %v2364_v32, 0.0  ;;  %v2123_v63 = vadd.f32 %v4823_v49, %v1920_v24  ;;  %v4889_v7 = vadd.f32 %v4823_v49, %v2020_v51  ;;  %v3310_v60 = vpop.f32.mrb[86].mxu0  ;;  %v3410_v23 = vpop.f32.mrb[86].mxu1 }
 0x187   :  { %v2365_v25 = vmax.f32 %v2267_v39, %v2316_v28  ;;  %v2318_v44 = vmax.f32 %v5154_v37, %v2220_v30  ;;  %v2121_v52 = vadd.f32 %v4823_v49, %v1918_v35  ;;  %v2018_v9 = vmul.f32 %v4812_v18, %v1770_v8  ;;  %v1386_v34 = vpop.f32.mrb[87].mxu0  ;;  %v1786_v48 = vpop.f32.mrb[87].mxu1  ;;  %v5159_v30 = vld [vmem:[#allocation43_spill] sm:$0xff] }
 0x188   :  { %v3052_v6 = vpack.c.bf16 %v2412_v19, %v2411_v50  ;;  %v2270_v36 = vmax.f32 %v5155_v54, %v2123_v63  ;;  %v2321_v40 = vmax.f32 %v5156_v2, %v4889_v7  ;;  %v1923_v57 = vmul.f32 %v4812_v18, %v3309_v58 }
 0x189   :  { %v2414_v26 = vmax.f32 %v2365_v25, 0.0  ;;  %v2367_v16 = vmax.f32 %v2269_v22, %v2318_v44  ;;  %v2268_v28 = vmax.f32 %v5157_v43, %v2121_v52  ;;  %v2221_v56 = vadd.f32 %v4823_v49, %v2018_v9 }
 0x18a   :  { %3112 = vst [vmem:[%s5044_s4 + $0x70] sm:$0xff] %v3052_v6   ;;  %v2126_v8 = vadd.f32 %v4823_v49, %v1923_v57  ;;  %v2023_v11 = vmul.f32 %v4812_v18, %v3409_v15  ;;  %v1921_v27 = vmul.f32 %v4812_v18, %v1383_v55  ;;  %v2021_v19 = vmul.f32 %v4812_v18, %v1783_v14  ;;  %v5160_v55 = vld [vmem:[#allocation45_spill] sm:$0xff] }
 0x18b   :  { %v3057_v38 = vpack.c.bf16 %v2414_v26, %v2413_v3  ;;  %v2416_v21 = vmax.f32 %v2367_v16, 0.0  ;;  %v2366_v4 = vmax.f32 %v2268_v28, %v2317_v13  ;;  %v2319_v22 = vmax.f32 %v5158_v46, %v2221_v56 }
 0x18c   :  { %v2273_v33 = vmax.f32 %v4500_v20, %v2126_v8  ;;  %v4910_v47 = vadd.f32 %v4823_v49, %v2023_v11  ;;  %v2124_v61 = vadd.f32 %v4823_v49, %v1921_v27  ;;  %v2224_v10 = vadd.f32 %v4823_v49, %v2021_v19  ;;  %v3313_v32 = vpop.f32.mrb[88].mxu0  ;;  %v3413_v24 = vpop.f32.mrb[88].mxu1 }
 0x18d   :  { %3113 = vst [vmem:[%s5044_s4 + $0x78] sm:$0xff] %v3057_v38   ;;  %v2415_v51 = vmax.f32 %v2366_v4, 0.0  ;;  %v2368_v58 = vmax.f32 %v2270_v36, %v2319_v22  ;;  %v1924_v13 = vmul.f32 %v4812_v18, %v3310_v60  ;;  %v2024_v15 = vmul.f32 %v4812_v18, %v3410_v23  ;;  %v1399_v20 = vpop.f32.mrb[89].mxu0  ;;  %v1799_v59 = vpop.f32.mrb[89].mxu1 }
 0x18e   :  { %v2324_v39 = vmax.f32 %v4506_v41, %v4910_v47  ;;  %v2271_v35 = vmax.f32 %v5159_v30, %v2124_v61  ;;  %v2322_v14 = vmax.f32 %v5160_v55, %v2224_v10  ;;  %v1922_v50 = vmul.f32 %v4812_v18, %v1386_v34  ;;  %v3314_v3 = vpop.f32.mrb[90].mxu0  ;;  %v3414_v63 = vpop.f32.mrb[90].mxu1  ;;  %v5161_v10 = vld [vmem:[#allocation46_spill] sm:$0xff]  ;;  %v5163_v30 = vld [vmem:[#allocation48_spill] sm:$0xff] }
 0x18f   :  { %v3062_v7 = vpack.c.bf16 %v2416_v21, %v2415_v51  ;;  %v2417_v25 = vmax.f32 %v2368_v58, 0.0  ;;  %v2127_v37 = vadd.f32 %v4823_v49, %v1924_v13  ;;  %v4926_v60 = vadd.f32 %v4823_v49, %v2024_v15  ;;  %v1402_v23 = vpop.f32.mrb[91].mxu0  ;;  %v1802_v44 = vpop.f32.mrb[91].mxu1 }
 0x190   :  { %v2369_v52 = vmax.f32 %v2271_v35, %v2320_v31  ;;  %v2371_v9 = vmax.f32 %v2273_v33, %v2322_v14  ;;  %v2125_v41 = vadd.f32 %v4823_v49, %v1922_v50  ;;  %v2022_v6 = vmul.f32 %v4812_v18, %v1786_v48 }
 0x191   :  { %3114 = vst [vmem:[%s5044_s4 + $0x80] sm:$0xff] %v3062_v7   ;;  %v2274_v34 = vmax.f32 %v4479_v17, %v2127_v37  ;;  %v2325_v54 = vmax.f32 %v4485_v12, %v4926_v60  ;;  %v1927_v36 = vmul.f32 %v4812_v18, %v3313_v32  ;;  %v2027_v2 = vmul.f32 %v4812_v18, %v3413_v24  ;;  %v5162_v32 = vld [vmem:[#allocation47_spill] sm:$0xff]  ;;  %v5164_v7 = vld [vmem:[#allocation50_spill] sm:$0xff] }
 0x192   :  { %v2418_v57 = vmax.f32 %v2369_v52, 0.0  ;;  %v2420_v31 = vmax.f32 %v2371_v9, 0.0  ;;  %v2272_v26 = vmax.f32 %v4489_v45, %v2125_v41  ;;  %v2225_v16 = vadd.f32 %v4823_v49, %v2022_v6  ;;  %v5165_v52 = vld [vmem:[#allocation49_spill] sm:$0xff]  ;;  %v5166_v41 = vld [vmem:[#allocation51_spill] sm:$0xff] }
 0x193   :  { %v2130_v48 = vadd.f32 %v4823_v49, %v1927_v36  ;;  %v4942_v43 = vadd.f32 %v4823_v49, %v2027_v2  ;;  %v1925_v17 = vmul.f32 %v4812_v18, %v1399_v20  ;;  %v2025_v28 = vmul.f32 %v4812_v18, %v1799_v59 }
 0x194   :  { %v3067_v12 = vpack.c.bf16 %v2418_v57, %v2417_v25  ;;  %v2370_v56 = vmax.f32 %v2272_v26, %v2321_v40  ;;  %v2323_v8 = vmax.f32 %v4492_v0, %v2225_v16  ;;  %v1928_v11 = vmul.f32 %v4812_v18, %v3314_v3  ;;  %v3317_v27 = vpop.f32.mrb[92].mxu0  ;;  %v3417_v19 = vpop.f32.mrb[92].mxu1 }
 0x195   :  { %v2277_v45 = vmax.f32 %v4532_v62, %v2130_v48  ;;  %v2328_v38 = vmax.f32 %v4560_v1, %v4942_v43  ;;  %v2128_v21 = vadd.f32 %v4823_v49, %v1925_v17  ;;  %v2228_v4 = vadd.f32 %v4823_v49, %v2025_v28  ;;  %v1415_v46 = vpop.f32.mrb[93].mxu0  ;;  %v1815_v22 = vpop.f32.mrb[93].mxu1 }
 0x196   :  { %3115 = vst [vmem:[%s5044_s4 + $0x88] sm:$0xff] %v3067_v12   ;;  %v2419_v0 = vmax.f32 %v2370_v56, 0.0  ;;  %v2372_v40 = vmax.f32 %v2274_v34, %v2323_v8  ;;  %v2131_v33 = vadd.f32 %v4823_v49, %v1928_v11  ;;  %v2028_v47 = vmul.f32 %v4812_v18, %v3414_v63  ;;  %v3318_v62 = vpop.f32.mrb[94].mxu0  ;;  %v3418_v61 = vpop.f32.mrb[94].mxu1  ;;  %v5167_v56 = vld [vmem:[#allocation52_spill] sm:$0xff] }
 0x197   :  { %v2275_v1 = vmax.f32 %v5161_v10, %v2128_v21  ;;  %v2326_v24 = vmax.f32 %v5162_v32, %v2228_v4  ;;  %v1926_v51 = vmul.f32 %v4812_v18, %v1402_v23  ;;  %v2026_v58 = vmul.f32 %v4812_v18, %v1802_v44  ;;  %v1418_v13 = vpop.f32.mrb[95].mxu0  ;;  %v1818_v15 = vpop.f32.mrb[95].mxu1 }
 0x198   :  { %v3072_v20 = vpack.c.bf16 %v2420_v31, %v2419_v0  ;;  %v2421_v59 = vmax.f32 %v2372_v40, 0.0  ;;  %v2278_v35 = vmax.f32 %v5163_v30, %v2131_v33  ;;  %v4964_v55 = vadd.f32 %v4823_v49, %v2028_v47  ;;  %v5169_v33 = vld [vmem:[#allocation55_spill] sm:$0xff]  ;;  %v5171_v30 = vld [vmem:[#allocation5_spill] sm:$0xff] }
 0x199   :  { %v2373_v14 = vmax.f32 %v2275_v1, %v2324_v39  ;;  %v2375_v50 = vmax.f32 %v2277_v45, %v2326_v24  ;;  %v2129_v3 = vadd.f32 %v4823_v49, %v1926_v51  ;;  %v2229_v63 = vadd.f32 %v4823_v49, %v2026_v58 }
 0x19a   :  { %3116 = vst [vmem:[%s5044_s4 + $0x90] sm:$0xff] %v3072_v20   ;;  %v2329_v25 = vmax.f32 %v5164_v7, %v4964_v55  ;;  %v1931_v37 = vmul.f32 %v4812_v18, %v3317_v27  ;;  %v2031_v60 = vmul.f32 %v4812_v18, %v3417_v19  ;;  %v1929_v23 = vmul.f32 %v4812_v18, %v1415_v46  ;;  %v5172_v55 = vld [vmem:[#allocation7_spill] sm:$0xff] }
 0x19b   :  { %v2422_v44 = vmax.f32 %v2373_v14, 0.0  ;;  %v2424_v39 = vmax.f32 %v2375_v50, 0.0  ;;  %v2276_v9 = vmax.f32 %v5165_v52, %v2129_v3  ;;  %v2327_v6 = vmax.f32 %v5166_v41, %v2229_v63  ;;  %v5173_v50 = vld [vmem:[#allocation9_spill] sm:$0xff]  ;;  %v5177_v41 = vld [vmem:[#allocation8_spill] sm:$0xff] }
 0x19c   :  { %v2134_v34 = vadd.f32 %v4823_v49, %v1931_v37  ;;  %v2234_v36 = vadd.f32 %v4823_v49, %v2031_v60  ;;  %v2132_v2 = vadd.f32 %v4823_v49, %v1929_v23  ;;  %v2029_v57 = vmul.f32 %v4812_v18, %v1815_v22  ;;  %v3321_v31 = vpop.f32.mrb[96].mxu0 }
 0x19d   :  { %v3077_v26 = vpack.c.bf16 %v2422_v44, %v2421_v59  ;;  %v2374_v16 = vmax.f32 %v2276_v9, %v2325_v54  ;;  %v2376_v48 = vmax.f32 %v2278_v35, %v2327_v6  ;;  %v1932_v43 = vmul.f32 %v4812_v18, %v3318_v62  ;;  %v1431_v17 = vpop.f32.mrb[97].mxu0  ;;  %v5174_v44 = vld [vmem:[#allocation6_spill] sm:$0xff] }
 0x19e   :  { %v2281_v28 = vmax.f32 %v4616_v5, %v2134_v34  ;;  %v2332_v12 = vmax.f32 %v4627_v29, %v2234_v36  ;;  %v2279_v8 = vmax.f32 %v5167_v56, %v2132_v2  ;;  %v2232_v11 = vadd.f32 %v4823_v49, %v2029_v57  ;;  %v3322_v27 = vpop.f32.mrb[98].mxu0  ;;  %v5168_v5 = vld [vmem:[#allocation53_spill] sm:$0xff] }
 0x19f   :  { %3117 = vst [vmem:[%s5044_s4 + $0x98] sm:$0xff] %v3077_v26   ;;  %v2423_v19 = vmax.f32 %v2374_v16, 0.0  ;;  %v2425_v45 = vmax.f32 %v2376_v48, 0.0  ;;  %v2135_v54 = vadd.f32 %v4823_v49, %v1932_v43  ;;  %v2032_v21 = vmul.f32 %v4812_v18, %v3418_v61  ;;  %v1434_v4 = vpop.f32.mrb[99].mxu0 }
 0x1a0   :  { %v2377_v46 = vmax.f32 %v2279_v8, %v2328_v38  ;;  %v2330_v22 = vmax.f32 %v5168_v5, %v2232_v11  ;;  %v1930_v29 = vmul.f32 %v4812_v18, %v1418_v13  ;;  %v2030_v0 = vmul.f32 %v4812_v18, %v1818_v15  ;;  %v5170_v38 = vld [vmem:[#allocation57_spill] sm:$0xff] }
 0x1a1   :  { %v3082_v40 = vpack.c.bf16 %v2424_v39, %v2423_v19  ;;  %v2282_v47 = vmax.f32 %v5169_v33, %v2135_v54  ;;  %v2235_v62 = vadd.f32 %v4823_v49, %v2032_v21  ;;  %v1935_v10 = vmul.f32 %v4812_v18, %v3321_v31  ;;  %v5175_v39 = vld [vmem:[#allocation56_spill] sm:$0xff]  ;;  %v5178_v31 = vld [vmem:[#allocation10_spill] sm:$0xff] }
 0x1a2   :  { %v2426_v1 = vmax.f32 %v2377_v46, 0.0  ;;  %v2379_v32 = vmax.f32 %v2281_v28, %v2330_v22  ;;  %v2133_v24 = vadd.f32 %v4823_v49, %v1930_v29  ;;  %v2233_v61 = vadd.f32 %v4823_v49, %v2030_v0 }
 0x1a3   :  { %3118 = vst [vmem:[%s5044_s4 + $0xa0] sm:$0xff] %v3082_v40   ;;  %v2333_v51 = vmax.f32 %v5170_v38, %v2235_v62  ;;  %v2138_v58 = vadd.f32 %v4823_v49, %v1935_v10  ;;  %v1933_v13 = vmul.f32 %v4812_v18, %v1431_v17  ;;  %v1936_v15 = vmul.f32 %v4812_v18, %v3322_v27 }
 0x1a4   :  { %v2188_v20 = vadd.f32 %v4823_v49, %v4659_v42  ;;  %v3087_v59 = vpack.c.bf16 %v2426_v1, %v2425_v45  ;;  %v2280_v35 = vmax.f32 %v5171_v30, %v2133_v24  ;;  %v2331_v14 = vmax.f32 %v5172_v55, %v2233_v61 }
 0x1a5   :  { %v2285_v3 = vmax.f32 %v2138_v58, %v5173_v50  ;;  %v2136_v63 = vadd.f32 %v4823_v49, %v1933_v13  ;;  %v2139_v7 = vadd.f32 %v4823_v49, %v1936_v15  ;;  %v1934_v37 = vmul.f32 %v4812_v18, %v1434_v4 }
 0x1a6   :  { %v2088_v60 = vadd.f32 %v4823_v49, %v4646_v53  ;;  %3119 = vst [vmem:[%s5044_s4 + $0xa8] sm:$0xff] %v3087_v59   ;;  %v2378_v42 = vmax.f32 %v2280_v35, %v2329_v25  ;;  %v2380_v23 = vmax.f32 %v2282_v47, %v2331_v14  ;;  %v5176_v52 = vmax.f32 %v5174_v44, %v5175_v39  ;;  %v5179_v53 = vld [vmem:[#allocation54_spill] sm:$0xff] }
 0x1a7   :  { %v2283_v6 = vmax.f32 %v5177_v41, %v2136_v63  ;;  %v2286_v34 = vmax.f32 %v2139_v7, %v2188_v20  ;;  %v2137_v36 = vadd.f32 %v4823_v49, %v1934_v37  ;;  %v2428_v2 = vmax.f32 %v2379_v32, 0.0 }
 0x1a8   :  { %v2334_v9 = vmax.f32 %v5176_v52, %v2285_v3  ;;  %v2427_v18 = vmax.f32 %v2378_v42, 0.0  ;;  %v5180_v26 = vmax.f32 %v5178_v31, %v5179_v53  ;;  %v2429_v25 = vmax.f32 %v2380_v23, 0.0 }
 0x1a9   :  { %v2381_v57 = vmax.f32 %v2283_v6, %v2332_v12  ;;  %v2284_v48 = vmax.f32 %v2088_v60, %v2137_v36 }
 0x1aa   :  { %v2335_v16 = vmax.f32 %v5180_v26, %v2286_v34  ;;  %v3092_v43 = vpack.c.bf16 %v2428_v2, %v2427_v18  ;;  %v2383_v17 = vmax.f32 %v2334_v9, 0.0 }
 0x1ab   :  { %v2430_v28 = vmax.f32 %v2381_v57, 0.0  ;;  %v2382_v8 = vmax.f32 %v2284_v48, %v2333_v51 }
 0x1ac   :  { %v2384_v56 = vmax.f32 %v2335_v16, 0.0  ;;  %3120 = vst [vmem:[%s5044_s4 + $0xb0] sm:$0xff] %v3092_v43  }
 0x1ad   :  { %v3097_v11 = vpack.c.bf16 %v2430_v28, %v2429_v25  ;;  %v2431_v27 = vmax.f32 %v2382_v8, 0.0 }
 0x1ae   :  { %v2982_v49 = vpack.c.bf16 %v2384_v56, %v2383_v17 }
 0x1af   :  { %3121 = vst [vmem:[%s5044_s4 + $0xb8] sm:$0xff] %v3097_v11   ;;  %v2978_v12 = vpack.c.bf16 %v2431_v27, %v2431_v27 }
 0x1b0   :  { %2983 = vst [vmem:[%s5044_s4] sm:$0xff] %v2982_v49  }
 0x1b1   :  { %2677 = vst [vmem:[%s5044_s4 + $0xc0] sm:$0xf] %v2978_v12 }

// kernel: fashion_convnet_forward.4
= control target key start
LH: loop header
LB: loop body
LE: loop exit
PB: predicated region body
PF: predicated region fallthrough
CT: control target
= control target key end

     0   :  { %v2795_v0 = vmov 0   ;;  %vm1192_vm0 = vcmask 261120   ;;  %s3860_s1 = inlined_call_operand.vmem [shape: bf16[800,128], index: 1, kind: input, shape index: {}]   ;;  %s3861_s0 = inlined_call_operand.vmem [shape: bf16[288,800], index: 0, kind: input, shape index: {}]   ;;  %s3862_s2 = inlined_call_operand.vmem [shape: f32[1,128], index: 2, kind: input, shape index: {}]   ;;  %s3863_s3 = inlined_call_operand.vmem [shape: f32[1,128], index: 3, kind: input, shape index: {}]   ;;  %s3864_s4 = inlined_call_operand.vmem [shape: bf16[72,128], index: 4, kind: output, shape index: {}]  }
   0x1   :  { %1247 = vmatprep.subr.bf16.mxu1 %v2795_v0  ;;  %1424 = vmatprep.subr.bf16.mxu0 %v2795_v0  ;;  %v2565_v1 = vld [vmem:[%s3860_s1] sm:$0xff]   ;;  %v2567_v3 = vld [vmem:[%s3860_s1 + $0x8] sm:$0xff]   ;;  %v2569_v5 = vld [vmem:[%s3860_s1 + $0x10] sm:$0xff]  }
   0x2   :  { %v2829_v2 = vld [vmem:[%s3860_s1 + $0x80] sm:$0xff]   ;;  %1248 = vmatpush1.bf16.msra.mxu1 %v2565_v1  ;;  %v2839_v4 = vld [vmem:[%s3860_s1 + $0x88] sm:$0xff]   ;;  %v2850_v6 = vld [vmem:[%s3860_s1 + $0x90] sm:$0xff]  }
   0x3   :  { %1425 = vmatpush1.bf16.msra.mxu0 %v2829_v2  ;;  %1249 = vmatprep.subr.bf16.mxu1 %v2795_v0  ;;  %v2571_v7 = vld [vmem:[%s3860_s1 + $0x18] sm:$0xff]   ;;  %v2573_v9 = vld [vmem:[%s3860_s1 + $0x20] sm:$0xff]   ;;  %v2575_v11 = vld [vmem:[%s3860_s1 + $0x28] sm:$0xff]  }
   0x4   :  { %1426 = vmatprep.subr.bf16.mxu0 %v2795_v0  ;;  %v2861_v8 = vld [vmem:[%s3860_s1 + $0x98] sm:$0xff]   ;;  %v2872_v10 = vld [vmem:[%s3860_s1 + $0xa0] sm:$0xff]   ;;  %v2883_v12 = vld [vmem:[%s3860_s1 + $0xa8] sm:$0xff]  }
   0x5   :  { %v2577_v13 = vld [vmem:[%s3860_s1 + $0x30] sm:$0xff]   ;;  %v2579_v15 = vld [vmem:[%s3860_s1 + $0x38] sm:$0xff]   ;;  %v2581_v17 = vld [vmem:[%s3860_s1 + $0x40] sm:$0xff]  }
   0x6   :  { %1250 = vmatpush1.bf16.msra.mxu1 %v2567_v3  ;;  %v2894_v14 = vld [vmem:[%s3860_s1 + $0xb0] sm:$0xff]   ;;  %v2905_v16 = vld [vmem:[%s3860_s1 + $0xb8] sm:$0xff]   ;;  %v2916_v18 = vld [vmem:[%s3860_s1 + $0xc0] sm:$0xff]  }
   0x7   :  { %1427 = vmatpush1.bf16.msra.mxu0 %v2839_v4  ;;  %1251 = vmatprep.subr.bf16.mxu1 %v2795_v0  ;;  %v2599_v19 = vld [vmem:[%s3861_s0 + $0x4] ss:$28 sps:$4 sm:$0xff]   ;;  %v2583_v20 = vld [vmem:[%s3860_s1 + $0x48] sm:$0xff]   ;;  %v2585_v23 = vld [vmem:[%s3860_s1 + $0x50] sm:$0xff]  }
   0x8   :  { %1428 = vmatprep.subr.bf16.mxu0 %v2795_v0  ;;  %v2602_v21 = vld [vmem:[%s3861_s0 + $0xc] ss:$28 sps:$4 sm:$0xff]   ;;  %1279 = vmatprep.mubr.bf16.mxu1 %v2599_v19  ;;  %v2944_v24 = vld [vmem:[%s3860_s1 + $0xd0] sm:$0xff]   ;;  %v2587_v25 = vld [vmem:[%s3860_s1 + $0x58] sm:$0xff]  }
   0x9   :  { %v2933_v22 = vld [vmem:[%s3860_s1 + $0xc8] sm:$0xff]   ;;  %1456 = vmatprep.mubr.bf16.mxu0 %v2602_v21  ;;  %v2955_v26 = vld [vmem:[%s3860_s1 + $0xd8] sm:$0xff]   ;;  %v2589_v27 = vld [vmem:[%s3860_s1 + $0x60] sm:$0xff]  }
   0xa   :  { %1252 = vmatpush1.bf16.msra.mxu1 %v2569_v5  ;;  %v2966_v28 = vld [vmem:[%s3860_s1 + $0xe0] sm:$0xff]   ;;  %v2591_v29 = vld [vmem:[%s3860_s1 + $0x68] sm:$0xff]   ;;  %v2593_v31 = vld [vmem:[%s3860_s1 + $0x70] sm:$0xff]  }
   0xb   :  { %1429 = vmatpush1.bf16.msra.mxu0 %v2850_v6  ;;  %1253 = vmatprep.subr.bf16.mxu1 %v2795_v0  ;;  %v2977_v30 = vld [vmem:[%s3860_s1 + $0xe8] sm:$0xff]   ;;  %v2988_v32 = vld [vmem:[%s3860_s1 + $0xf0] sm:$0xff]   ;;  %v2595_v33 = vld [vmem:[%s3860_s1 + $0x78] sm:$0xff]  }
   0xc   :  { %1430 = vmatprep.subr.bf16.mxu0 %v2795_v0  ;;  %v2999_v34 = vld [vmem:[%s3860_s1 + $0xf8] sm:$0xff]   ;;  %v2600_v36 = vld [vmem:[%s3861_s0 + $0x8] ss:$28 sps:$4 sm:$0xff]   ;;  %v2611_v43 = vld [vmem:[%s3861_s0 + $0x74] ss:$28 sps:$4 sm:$0xff]  }
   0xd   :  { %v2597_v35 = vld [vmem:[%s3861_s0] ss:$28 sps:$4 sm:$0xff]   ;;  %v2610_v40 = vld [vmem:[%s3860_s1 + $0x108] sm:$0xff]   ;;  %v2608_v41 = vld [vmem:[%s3861_s0 + $0x38] ss:$28 sps:$4 sm:$0xff]  }
   0xe   :  { %1254 = vmatpush1.bf16.msra.mxu1 %v2571_v7  ;;  %v2603_v37 = vld [vmem:[%s3860_s1 + $0x100] sm:$0xff]   ;;  %v2604_v38 = vld [vmem:[%s3861_s0 + $0x3c] ss:$28 sps:$4 sm:$0xff]   ;;  %v2615_v45 = vld [vmem:[%s3860_s1 + $0x110] sm:$0xff]  }
   0xf   :  { %1431 = vmatpush1.bf16.msra.mxu0 %v2861_v8  ;;  %1255 = vmatprep.subr.bf16.mxu1 %v2795_v0  ;;  %v2606_v39 = vld [vmem:[%s3861_s0 + $0x44] ss:$28 sps:$4 sm:$0xff]   ;;  %v2613_v44 = vld [vmem:[%s3861_s0 + $0x7c] ss:$28 sps:$4 sm:$0xff]   ;;  %v2616_v47 = vld [vmem:[%s3861_s0 + $0x70] ss:$28 sps:$4 sm:$0xff]  }
  0x10   :  { %1432 = vmatprep.subr.bf16.mxu0 %v2795_v0  ;;  %v2609_v42 = vld [vmem:[%s3861_s0 + $0x40] ss:$28 sps:$4 sm:$0xff]   ;;  %v2617_v48 = vld [vmem:[%s3861_s0 + $0x78] ss:$28 sps:$4 sm:$0xff]   ;;  %v2619_v49 = vld [vmem:[%s3861_s0 + $0xac] ss:$28 sps:$4 sm:$0xff]  }
  0x11   :  { %v2618_v46 = vld [vmem:[%s3860_s1 + $0x118] sm:$0xff]   ;;  %v2621_v50 = vld [vmem:[%s3861_s0 + $0xb4] ss:$28 sps:$4 sm:$0xff]   ;;  %v2625_v51 = vld [vmem:[%s3860_s1 + $0x120] sm:$0xff]  }
  0x12   :  { %1256 = vmatpush1.bf16.msra.mxu1 %v2573_v9  ;;  %v2632_v52 = vld [vmem:[%s3860_s1 + $0x128] sm:$0xff]   ;;  %v2626_v55 = vld [vmem:[%s3861_s0 + $0xe4] ss:$28 sps:$4 sm:$0xff]   ;;  %v2639_v57 = vld [vmem:[%s3860_s1 + $0x130] sm:$0xff]  }
  0x13   :  { %1433 = vmatpush1.bf16.msra.mxu0 %v2872_v10  ;;  %1257 = vmatprep.subr.bf16.mxu1 %v2795_v0  ;;  %v2623_v53 = vld [vmem:[%s3861_s0 + $0xa8] ss:$28 sps:$4 sm:$0xff]   ;;  %v2624_v54 = vld [vmem:[%s3861_s0 + $0xb0] ss:$28 sps:$4 sm:$0xff]   ;;  %v2646_v58 = vld [vmem:[%s3860_s1 + $0x138] sm:$0xff]  }
  0x14   :  { %1434 = vmatprep.subr.bf16.mxu0 %v2795_v0  ;;  %v2628_v56 = vld [vmem:[%s3861_s0 + $0xec] ss:$28 sps:$4 sm:$0xff]   ;;  %v2630_v59 = vld [vmem:[%s3861_s0 + $0xe0] ss:$28 sps:$4 sm:$0xff]   ;;  %v2645_v9 = vld [vmem:[%s3861_s0 + $0x158] ss:$28 sps:$4 sm:$0xff]  }
  0x15   :  { %v2631_v60 = vld [vmem:[%s3861_s0 + $0xe8] ss:$28 sps:$4 sm:$0xff]   ;;  %v2633_v61 = vld [vmem:[%s3861_s0 + $0x11c] ss:$28 sps:$4 sm:$0xff]   ;;  %v2644_v7 = vld [vmem:[%s3861_s0 + $0x150] ss:$28 sps:$4 sm:$0xff]  }
  0x16   :  { %1258 = vmatpush1.bf16.msra.mxu1 %v2575_v11  ;;  %v2635_v62 = vld [vmem:[%s3861_s0 + $0x124] ss:$28 sps:$4 sm:$0xff]   ;;  %v2660_v1 = vld [vmem:[%s3860_s1 + $0x148] sm:$0xff]   ;;  %v2642_v5 = vld [vmem:[%s3861_s0 + $0x15c] ss:$28 sps:$4 sm:$0xff]  }
  0x17   :  { %1435 = vmatpush1.bf16.msra.mxu0 %v2883_v12  ;;  %1259 = vmatprep.subr.bf16.mxu1 %v2795_v0  ;;  %v2653_v63 = vld [vmem:[%s3860_s1 + $0x140] sm:$0xff]   ;;  %v2649_v11 = vld [vmem:[%s3861_s0 + $0x194] ss:$28 sps:$4 sm:$0xff]  }
  0x18   :  { %1436 = vmatprep.subr.bf16.mxu0 %v2795_v0  ;;  %v2638_v3 = vld [vmem:[%s3861_s0 + $0x120] ss:$28 sps:$4 sm:$0xff]  }
  0x19   :  { %v2658_v19 = vld [vmem:[%s3861_s0 + $0x1c0] ss:$28 sps:$4 sm:$0xff]  }
  0x1a   :  { %1260 = vmatpush1.bf16.msra.mxu1 %v2577_v13  ;;  %v2651_v13 = vld [vmem:[%s3861_s0 + $0x188] ss:$28 sps:$4 sm:$0xff]  }
  0x1b   :  { %1437 = vmatpush1.bf16.msra.mxu0 %v2894_v14  ;;  %1261 = vmatprep.subr.bf16.mxu1 %v2795_v0  ;;  %v3197_v21 = vld [vmem:[%s3860_s1 + $0x180] sm:$0xff]  }
  0x1c   :  { %1438 = vmatprep.subr.bf16.mxu0 %v2795_v0 }
  0x1e   :  { %1262 = vmatpush1.bf16.msra.mxu1 %v2579_v15  ;;  %v2652_v15 = vld [vmem:[%s3861_s0 + $0x190] ss:$28 sps:$4 sm:$0xff]  }
  0x1f   :  { %1439 = vmatpush1.bf16.msra.mxu0 %v2905_v16  ;;  %1263 = vmatprep.subr.bf16.mxu1 %v2795_v0 }
  0x20   :  { %1440 = vmatprep.subr.bf16.mxu0 %v2795_v0 }
  0x22   :  { %1264 = vmatpush1.bf16.msra.mxu1 %v2581_v17  ;;  %v2656_v17 = vld [vmem:[%s3861_s0 + $0x1cc] ss:$28 sps:$4 sm:$0xff]  }
  0x23   :  { %1441 = vmatpush1.bf16.msra.mxu0 %v2916_v18  ;;  %1265 = vmatprep.subr.bf16.mxu1 %v2795_v0 }
  0x24   :  { %1442 = vmatprep.subr.bf16.mxu0 %v2795_v0 }
  0x26   :  { %1266 = vmatpush1.bf16.msra.mxu1 %v2583_v20  ;;  %v2696_v20 = vld [vmem:[%s3860_s1 + $0x178] sm:$0xff]  }
  0x27   :  { %1443 = vmatpush1.bf16.msra.mxu0 %v2933_v22  ;;  %1267 = vmatprep.subr.bf16.mxu1 %v2795_v0 }
  0x28   :  { %1444 = vmatprep.subr.bf16.mxu0 %v2795_v0 }
  0x2a   :  { %1268 = vmatpush1.bf16.msra.mxu1 %v2585_v23  ;;  %v2661_v23 = vld [vmem:[%s3861_s0 + $0x1fc] ss:$28 sps:$4 sm:$0xff]  }
  0x2b   :  { %1445 = vmatpush1.bf16.msra.mxu0 %v2944_v24  ;;  %1269 = vmatprep.subr.bf16.mxu1 %v2795_v0 }
  0x2c   :  { %1446 = vmatprep.subr.bf16.mxu0 %v2795_v0 }
  0x2e   :  { %1270 = vmatpush1.bf16.msra.mxu1 %v2587_v25  ;;  %v2666_v25 = vld [vmem:[%s3861_s0 + $0x1f8] ss:$28 sps:$4 sm:$0xff]  }
  0x2f   :  { %1447 = vmatpush1.bf16.msra.mxu0 %v2955_v26  ;;  %1271 = vmatprep.subr.bf16.mxu1 %v2795_v0 }
  0x30   :  { %1448 = vmatprep.subr.bf16.mxu0 %v2795_v0 }
  0x32   :  { %1272 = vmatpush1.bf16.msra.mxu1 %v2589_v27  ;;  %v2671_v27 = vld [vmem:[%s3861_s0 + $0x23c] ss:$28 sps:$4 sm:$0xff]  }
  0x33   :  { %1449 = vmatpush1.bf16.msra.mxu0 %v2966_v28  ;;  %1273 = vmatprep.subr.bf16.mxu1 %v2795_v0 }
  0x34   :  { %1450 = vmatprep.subr.bf16.mxu0 %v2795_v0 }
  0x36   :  { %1274 = vmatpush1.bf16.msra.mxu1 %v2591_v29  ;;  %v2674_v29 = vld [vmem:[%s3861_s0 + $0x238] ss:$28 sps:$4 sm:$0xff]  }
  0x37   :  { %1451 = vmatpush1.bf16.msra.mxu0 %v2977_v30  ;;  %1275 = vmatprep.subr.bf16.mxu1 %v2795_v0 }
  0x38   :  { %1452 = vmatprep.subr.bf16.mxu0 %v2795_v0 }
  0x3a   :  { %1276 = vmatpush1.bf16.msra.mxu1 %v2593_v31  ;;  %v2678_v31 = vld [vmem:[%s3861_s0 + $0x274] ss:$28 sps:$4 sm:$0xff]  }
  0x3b   :  { %1453 = vmatpush1.bf16.msra.mxu0 %v2988_v32  ;;  %1277 = vmatprep.subr.bf16.mxu1 %v2795_v0 }
  0x3c   :  { %1454 = vmatprep.subr.bf16.mxu0 %v2795_v0 }
  0x3e   :  { %1278 = vmatpush1.bf16.msra.mxu1 %v2595_v33  ;;  %v2681_v33 = vld [vmem:[%s3861_s0 + $0x270] ss:$28 sps:$4 sm:$0xff]  }
  0x3f   :  { %1455 = vmatpush1.bf16.msra.mxu0 %v2999_v34  ;;  %2424 = vmatprep.subr.bf16.mxu1 %v2795_v0 }
  0x40   :  { %1601 = vmatprep.subr.bf16.mxu0 %v2795_v0 }
  0x41   :  { %1280 = vmatmul.mubr.bf16.vlgmr.msra.gmra.mrb[0].mxu1 %v2597_v35  ;;  %v2685_v35 = vld [vmem:[%s3861_s0 + $0x2ac] ss:$28 sps:$4 sm:$0xff]  }
  0x42   :  { %1457 = vmatmul.mubr.bf16.vlgmr.msra.gmra.mrb[0].mxu0 %v2600_v36  ;;  %1287 = vmatprep.mubr.bf16.mxu1 %v2604_v38  ;;  %v2687_v36 = vld [vmem:[%s3861_s0 + $0x2a0] ss:$28 sps:$4 sm:$0xff]  }
  0x43   :  { %1602 = vmatpush1.bf16.msra.mxu0 %v2603_v37  ;;  %1464 = vmatprep.mubr.bf16.mxu0 %v2606_v39  ;;  %v2688_v37 = vld [vmem:[%s3861_s0 + $0x2a8] ss:$28 sps:$4 sm:$0xff]   ;;  %v2690_v38 = vld [vmem:[%s3861_s0 + $0x2dc] ss:$28 sps:$4 sm:$0xff]  }
  0x44   :  { %1603 = vmatprep.subr.bf16.mxu0 %v2795_v0  ;;  %2440 = vmatpush1.bf16.msra.mxu1 %v2829_v2  ;;  %v2637_v2 = vld [vmem:[%s3861_s0 + $0x118] ss:$28 sps:$4 sm:$0xff]   ;;  %v2692_v39 = vld [vmem:[%s3861_s0 + $0x2e4] ss:$28 sps:$4 sm:$0xff]  }
  0x45   :  { %2425 = vmatprep.subr.bf16.mxu1 %v2795_v0 }
  0x47   :  { %1604 = vmatpush1.bf16.msra.mxu0 %v2610_v40  ;;  %v2694_v40 = vld [vmem:[%s3861_s0 + $0x2d8] ss:$28 sps:$4 sm:$0xff]  }
  0x48   :  { %1605 = vmatprep.subr.bf16.mxu0 %v2795_v0  ;;  %2441 = vmatpush1.bf16.msra.mxu1 %v2839_v4  ;;  %v2640_v4 = vld [vmem:[%s3861_s0 + $0x154] ss:$28 sps:$4 sm:$0xff]  }
  0x49   :  { %1288 = vmatmul.mubr.bf16.gmra.mrb[4].mxu1 %v2608_v41  ;;  %2426 = vmatprep.subr.bf16.mxu1 %v2795_v0  ;;  %v2695_v41 = vld [vmem:[%s3861_s0 + $0x2e0] ss:$28 sps:$4 sm:$0xff]  }
  0x4a   :  { %1465 = vmatmul.mubr.bf16.gmra.mrb[4].mxu0 %v2609_v42  ;;  %1295 = vmatprep.mubr.bf16.mxu1 %v2611_v43  ;;  %v2697_v42 = vld [vmem:[%s3861_s0 + $0x314] ss:$28 sps:$4 sm:$0xff]  }
  0x4b   :  { %1472 = vmatprep.mubr.bf16.mxu0 %v2613_v44  ;;  %1606 = vmatpush1.bf16.msra.mxu0 %v2615_v45  ;;  %v2701_v43 = vld [vmem:[%s3861_s0 + $0x14] ss:$28 sps:$4 sm:$0xff]  }
  0x4c   :  { %1607 = vmatprep.subr.bf16.mxu0 %v2795_v0  ;;  %2442 = vmatpush1.bf16.msra.mxu1 %v2850_v6  ;;  %v2665_v6 = vld [vmem:[%s3860_s1 + $0x150] sm:$0xff]  }
  0x4d   :  { %2427 = vmatprep.subr.bf16.mxu1 %v2795_v0  ;;  %v2702_v44 = vld [vmem:[%s3861_s0 + $0x310] ss:$28 sps:$4 sm:$0xff]  }
  0x4e   :  { %v2699_v45 = vld [vmem:[%s3861_s0 + $0x10] ss:$28 sps:$4 sm:$0xff]  }
  0x4f   :  { %1608 = vmatpush1.bf16.msra.mxu0 %v2618_v46  ;;  %v2703_v46 = vld [vmem:[%s3861_s0 + $0x34c] ss:$28 sps:$4 sm:$0xff]  }
  0x50   :  { %1609 = vmatprep.subr.bf16.mxu0 %v2795_v0  ;;  %2443 = vmatpush1.bf16.msra.mxu1 %v2861_v8  ;;  %v2668_v8 = vld [vmem:[%s3860_s1 + $0x158] sm:$0xff]  }
  0x51   :  { %1296 = vmatmul.mubr.bf16.gmra.mrb[8].mxu1 %v2616_v47  ;;  %2428 = vmatprep.subr.bf16.mxu1 %v2795_v0  ;;  %v2705_v47 = vld [vmem:[%s3861_s0 + $0x4c] ss:$28 sps:$4 sm:$0xff]  }
  0x52   :  { %1473 = vmatmul.mubr.bf16.gmra.mrb[8].mxu0 %v2617_v48  ;;  %1303 = vmatprep.mubr.bf16.mxu1 %v2619_v49  ;;  %v2707_v48 = vld [vmem:[%s3861_s0 + $0x348] ss:$28 sps:$4 sm:$0xff]  }
  0x53   :  { %1480 = vmatprep.mubr.bf16.mxu0 %v2621_v50  ;;  %1610 = vmatpush1.bf16.msra.mxu0 %v2625_v51  ;;  %v2708_v49 = vld [vmem:[%s3861_s0 + $0x48] ss:$28 sps:$4 sm:$0xff]  }
  0x54   :  { %1611 = vmatprep.subr.bf16.mxu0 %v2795_v0  ;;  %2444 = vmatpush1.bf16.msra.mxu1 %v2872_v10  ;;  %v2647_v10 = vld [vmem:[%s3861_s0 + $0x18c] ss:$28 sps:$4 sm:$0xff]   ;;  %v2709_v50 = vld [vmem:[%s3861_s0 + $0x384] ss:$28 sps:$4 sm:$0xff]  }
  0x55   :  { %2429 = vmatprep.subr.bf16.mxu1 %v2795_v0  ;;  %v2711_v51 = vld [vmem:[%s3861_s0 + $0x84] ss:$28 sps:$4 sm:$0xff]  }
  0x57   :  { %1612 = vmatpush1.bf16.msra.mxu0 %v2632_v52  ;;  %v2713_v52 = vld [vmem:[%s3861_s0 + $0x380] ss:$28 sps:$4 sm:$0xff]  }
  0x58   :  { %1613 = vmatprep.subr.bf16.mxu0 %v2795_v0  ;;  %2445 = vmatpush1.bf16.msra.mxu1 %v2883_v12  ;;  %v2675_v12 = vld [vmem:[%s3860_s1 + $0x160] sm:$0xff]  }
  0x59   :  { %1304 = vmatmul.mubr.bf16.gmra.mrb[12].mxu1 %v2623_v53  ;;  %2430 = vmatprep.subr.bf16.mxu1 %v2795_v0  ;;  %v2714_v53 = vld [vmem:[%s3861_s0 + $0x80] ss:$28 sps:$4 sm:$0xff]  }
  0x5a   :  { %1481 = vmatmul.mubr.bf16.gmra.mrb[12].mxu0 %v2624_v54  ;;  %1311 = vmatprep.mubr.bf16.mxu1 %v2626_v55  ;;  %v2715_v54 = vld [vmem:[%s3861_s0 + $0x3bc] ss:$28 sps:$4 sm:$0xff]  }
  0x5b   :  { %1488 = vmatprep.mubr.bf16.mxu0 %v2628_v56  ;;  %1614 = vmatpush1.bf16.msra.mxu0 %v2639_v57  ;;  %v2717_v55 = vld [vmem:[%s3861_s0 + $0xbc] ss:$28 sps:$4 sm:$0xff]  }
  0x5c   :  { %1615 = vmatprep.subr.bf16.mxu0 %v2795_v0  ;;  %2446 = vmatpush1.bf16.msra.mxu1 %v2894_v14  ;;  %v2682_v14 = vld [vmem:[%s3860_s1 + $0x168] sm:$0xff]   ;;  %v2719_v56 = vld [vmem:[%s3861_s0 + $0x3b8] ss:$28 sps:$4 sm:$0xff]  }
  0x5d   :  { %2431 = vmatprep.subr.bf16.mxu1 %v2795_v0  ;;  %v2720_v57 = vld [vmem:[%s3861_s0 + $0xb8] ss:$28 sps:$4 sm:$0xff]  }
  0x5f   :  { %1616 = vmatpush1.bf16.msra.mxu0 %v2646_v58  ;;  %v2723_v58 = vld [vmem:[%s3861_s0 + $0x31c] ss:$28 sps:$4 sm:$0xff]  }
  0x60   :  { %1617 = vmatprep.subr.bf16.mxu0 %v2795_v0  ;;  %2447 = vmatpush1.bf16.msra.mxu1 %v2905_v16  ;;  %v2654_v16 = vld [vmem:[%s3861_s0 + $0x1c4] ss:$28 sps:$4 sm:$0xff]  }
  0x61   :  { %1312 = vmatmul.mubr.bf16.gmra.mrb[16].mxu1 %v2630_v59  ;;  %2432 = vmatprep.subr.bf16.mxu1 %v2795_v0  ;;  %v2724_v59 = vld [vmem:[%s3861_s0 + $0xf4] ss:$28 sps:$4 sm:$0xff]  }
  0x62   :  { %1489 = vmatmul.mubr.bf16.gmra.mrb[16].mxu0 %v2631_v60  ;;  %1319 = vmatprep.mubr.bf16.mxu1 %v2633_v61  ;;  %v2721_v60 = vld [vmem:[%s3861_s0 + $0x318] ss:$28 sps:$4 sm:$0xff]   ;;  %v2726_v61 = vld [vmem:[%s3861_s0 + $0xf0] ss:$28 sps:$4 sm:$0xff]  }
  0x63   :  { %1496 = vmatprep.mubr.bf16.mxu0 %v2635_v62  ;;  %1618 = vmatpush1.bf16.msra.mxu0 %v2653_v63  ;;  %v2727_v62 = vld [vmem:[%s3861_s0 + $0x354] ss:$28 sps:$4 sm:$0xff]   ;;  %v2729_v63 = vld [vmem:[%s3861_s0 + $0x12c] ss:$28 sps:$4 sm:$0xff]  }
  0x64   :  { %1619 = vmatprep.subr.bf16.mxu0 %v2795_v0  ;;  %2448 = vmatpush1.bf16.msra.mxu1 %v2916_v18  ;;  %v2689_v18 = vld [vmem:[%s3860_s1 + $0x170] sm:$0xff]  }
  0x65   :  { %2433 = vmatprep.subr.bf16.mxu1 %v2795_v0 }
  0x67   :  { %1620 = vmatpush1.bf16.msra.mxu0 %v2660_v1  ;;  %v2746_v1 = vld [vmem:[%s3860_s1 + $0x188] sm:$0xff]  }
  0x68   :  { %1621 = vmatprep.subr.bf16.mxu0 %v2795_v0  ;;  %2449 = vmatpush1.bf16.msra.mxu1 %v2933_v22  ;;  %v2659_v22 = vld [vmem:[%s3861_s0 + $0x1c8] ss:$28 sps:$4 sm:$0xff]  }
  0x69   :  { %1320 = vmatmul.mubr.bf16.gmra.mrb[20].mxu1 %v2637_v2  ;;  %2434 = vmatprep.subr.bf16.mxu1 %v2795_v0  ;;  %v2731_v2 = vld [vmem:[%s3861_s0 + $0x350] ss:$28 sps:$4 sm:$0xff]  }
  0x6a   :  { %1497 = vmatmul.mubr.bf16.gmra.mrb[20].mxu0 %v2638_v3  ;;  %1327 = vmatprep.mubr.bf16.mxu1 %v2640_v4  ;;  %v2732_v3 = vld [vmem:[%s3861_s0 + $0x128] ss:$28 sps:$4 sm:$0xff]  }
  0x6b   :  { %1504 = vmatprep.mubr.bf16.mxu0 %v2642_v5  ;;  %1622 = vmatpush1.bf16.msra.mxu0 %v2665_v6  ;;  %v2734_v4 = vld [vmem:[%s3861_s0 + $0x38c] ss:$28 sps:$4 sm:$0xff]   ;;  %v2736_v5 = vld [vmem:[%s3861_s0 + $0x164] ss:$28 sps:$4 sm:$0xff]  }
  0x6c   :  { %1623 = vmatprep.subr.bf16.mxu0 %v2795_v0  ;;  %2450 = vmatpush1.bf16.msra.mxu1 %v2944_v24  ;;  %v2663_v24 = vld [vmem:[%s3861_s0 + $0x204] ss:$28 sps:$4 sm:$0xff]  }
  0x6d   :  { %2435 = vmatprep.subr.bf16.mxu1 %v2795_v0  ;;  %v2738_v6 = vld [vmem:[%s3861_s0 + $0x388] ss:$28 sps:$4 sm:$0xff]  }
  0x6f   :  { %1624 = vmatpush1.bf16.msra.mxu0 %v2668_v8  ;;  %v2740_v8 = vld [vmem:[%s3861_s0 + $0x3c4] ss:$28 sps:$4 sm:$0xff]  }
  0x70   :  { %1625 = vmatprep.subr.bf16.mxu0 %v2795_v0  ;;  %2451 = vmatpush1.bf16.msra.mxu1 %v2955_v26  ;;  %v2667_v26 = vld [vmem:[%s3861_s0 + $0x200] ss:$28 sps:$4 sm:$0xff]  }
  0x71   :  { %1328 = vmatmul.mubr.bf16.gmra.mrb[24].mxu1 %v2644_v7  ;;  %2436 = vmatprep.subr.bf16.mxu1 %v2795_v0  ;;  %v2739_v7 = vld [vmem:[%s3861_s0 + $0x160] ss:$28 sps:$4 sm:$0xff]  }
  0x72   :  { %1505 = vmatmul.mubr.bf16.gmra.mrb[24].mxu0 %v2645_v9  ;;  %1335 = vmatprep.mubr.bf16.mxu1 %v2647_v10  ;;  %v2742_v9 = vld [vmem:[%s3861_s0 + $0x19c] ss:$28 sps:$4 sm:$0xff]  }
  0x73   :  { %1512 = vmatprep.mubr.bf16.mxu0 %v2649_v11  ;;  %1626 = vmatpush1.bf16.msra.mxu0 %v2675_v12  ;;  %v2744_v10 = vld [vmem:[%s3861_s0 + $0x3c0] ss:$28 sps:$4 sm:$0xff]   ;;  %v2745_v11 = vld [vmem:[%s3861_s0 + $0x198] ss:$28 sps:$4 sm:$0xff]  }
  0x74   :  { %1627 = vmatprep.subr.bf16.mxu0 %v2795_v0  ;;  %2452 = vmatpush1.bf16.msra.mxu1 %v2966_v28  ;;  %v2673_v28 = vld [vmem:[%s3861_s0 + $0x230] ss:$28 sps:$4 sm:$0xff]   ;;  %v2749_v12 = vld [vmem:[%s3861_s0 + $0x18] ss:$28 sps:$4 sm:$0xff]  }
  0x75   :  { %2437 = vmatprep.subr.bf16.mxu1 %v2795_v0 }
  0x77   :  { %1628 = vmatpush1.bf16.msra.mxu0 %v2682_v14  ;;  %v2751_v14 = vld [vmem:[%s3861_s0 + $0x50] ss:$28 sps:$4 sm:$0xff]  }
  0x78   :  { %1629 = vmatprep.subr.bf16.mxu0 %v2795_v0  ;;  %2453 = vmatpush1.bf16.msra.mxu1 %v2977_v30  ;;  %v2676_v30 = vld [vmem:[%s3861_s0 + $0x26c] ss:$28 sps:$4 sm:$0xff]  }
  0x79   :  { %1336 = vmatmul.mubr.bf16.gmra.mrb[28].mxu1 %v2651_v13  ;;  %2438 = vmatprep.subr.bf16.mxu1 %v2795_v0  ;;  %v2747_v13 = vld [vmem:[%s3861_s0 + $0x1d4] ss:$28 sps:$4 sm:$0xff]  }
  0x7a   :  { %1513 = vmatmul.mubr.bf16.gmra.mrb[28].mxu0 %v2652_v15  ;;  %1343 = vmatprep.mubr.bf16.mxu1 %v2654_v16  ;;  %v2750_v15 = vld [vmem:[%s3861_s0 + $0x1d0] ss:$28 sps:$4 sm:$0xff]   ;;  %v2754_v16 = vld [vmem:[%s3861_s0 + $0x88] ss:$28 sps:$4 sm:$0xff]  }
  0x7b   :  { %1520 = vmatprep.mubr.bf16.mxu0 %v2656_v17  ;;  %1630 = vmatpush1.bf16.msra.mxu0 %v2689_v18  ;;  %v2752_v17 = vld [vmem:[%s3861_s0 + $0x20c] ss:$28 sps:$4 sm:$0xff]   ;;  %v2756_v18 = vld [vmem:[%s3861_s0 + $0xc0] ss:$28 sps:$4 sm:$0xff]  }
  0x7c   :  { %1631 = vmatprep.subr.bf16.mxu0 %v2795_v0  ;;  %2454 = vmatpush1.bf16.msra.mxu1 %v2988_v32  ;;  %v2680_v32 = vld [vmem:[%s3861_s0 + $0x268] ss:$28 sps:$4 sm:$0xff]  }
  0x7d   :  { %2439 = vmatprep.subr.bf16.mxu1 %v2795_v0  ;;  %v2669_v0 = vld [vmem:[%s3861_s0 + $0x234] ss:$28 sps:$4 sm:$0xff]  }
  0x7f   :  { %1632 = vmatpush1.bf16.msra.mxu0 %v2696_v20  ;;  %v2759_v20 = vld [vmem:[%s3861_s0 + $0xf8] ss:$28 sps:$4 sm:$0xff]  }
  0x80   :  { %2455 = vmatpush1.bf16.msra.mxu1 %v2999_v34  ;;  %v2683_v34 = vld [vmem:[%s3861_s0 + $0x2a4] ss:$28 sps:$4 sm:$0xff]  }
  0x81   :  { %1344 = vmatmul.mubr.bf16.gmra.mrb[32].mxu1 %v2658_v19  ;;  %2384 = vmatprep.subr.bf16.mxu1 %v3197_v21  ;;  %v2755_v19 = vld [vmem:[%s3861_s0 + $0x208] ss:$28 sps:$4 sm:$0xff]  }
  0x82   :  { %1521 = vmatmul.mubr.bf16.gmra.mrb[32].mxu0 %v2659_v22  ;;  %1351 = vmatprep.mubr.bf16.mxu1 %v2661_v23  ;;  %v2761_v22 = vld [vmem:[%s3861_s0 + $0x130] ss:$28 sps:$4 sm:$0xff]   ;;  %v2760_v23 = vld [vmem:[%s3861_s0 + $0x240] ss:$28 sps:$4 sm:$0xff]  }
  0x83   :  { %1528 = vmatprep.mubr.bf16.mxu0 %v2663_v24  ;;  %v2764_v24 = vld [vmem:[%s3861_s0 + $0x168] ss:$28 sps:$4 sm:$0xff]  }
  0x89   :  { %1352 = vmatmul.mubr.bf16.gmra.mrb[36].mxu1 %v2666_v25  ;;  %v2762_v25 = vld [vmem:[%s3861_s0 + $0x27c] ss:$28 sps:$4 sm:$0xff]  }
  0x8a   :  { %1529 = vmatmul.mubr.bf16.gmra.mrb[36].mxu0 %v2667_v26  ;;  %1359 = vmatprep.mubr.bf16.mxu1 %v2669_v0  ;;  %v2766_v26 = vld [vmem:[%s3861_s0 + $0x1a0] ss:$28 sps:$4 sm:$0xff]   ;;  %v2765_v0 = vld [vmem:[%s3861_s0 + $0x278] ss:$28 sps:$4 sm:$0xff]  }
  0x8b   :  { %1536 = vmatprep.mubr.bf16.mxu0 %v2671_v27  ;;  %v2769_v27 = vld [vmem:[%s3861_s0 + $0x1d8] ss:$28 sps:$4 sm:$0xff]  }
  0x91   :  { %1360 = vmatmul.mubr.bf16.gmra.mrb[40].mxu1 %v2673_v28  ;;  %v2767_v28 = vld [vmem:[%s3861_s0 + $0x2b4] ss:$28 sps:$4 sm:$0xff]  }
  0x92   :  { %1537 = vmatmul.mubr.bf16.gmra.mrb[40].mxu0 %v2674_v29  ;;  %1367 = vmatprep.mubr.bf16.mxu1 %v2676_v30  ;;  %v2771_v29 = vld [vmem:[%s3861_s0 + $0x210] ss:$28 sps:$4 sm:$0xff]  }
  0x93   :  { %1544 = vmatprep.mubr.bf16.mxu0 %v2678_v31  ;;  %v2770_v30 = vld [vmem:[%s3861_s0 + $0x2b0] ss:$28 sps:$4 sm:$0xff]   ;;  %v2774_v31 = vld [vmem:[%s3861_s0 + $0x248] ss:$28 sps:$4 sm:$0xff]  }
  0x99   :  { %1368 = vmatmul.mubr.bf16.gmra.mrb[44].mxu1 %v2680_v32  ;;  %v2772_v32 = vld [vmem:[%s3861_s0 + $0x2ec] ss:$28 sps:$4 sm:$0xff]  }
  0x9a   :  { %1545 = vmatmul.mubr.bf16.gmra.mrb[44].mxu0 %v2681_v33  ;;  %1375 = vmatprep.mubr.bf16.mxu1 %v2683_v34  ;;  %v2776_v34 = vld [vmem:[%s3861_s0 + $0x280] ss:$28 sps:$4 sm:$0xff]  }
  0x9b   :  { %1552 = vmatprep.mubr.bf16.mxu0 %v2685_v35 }
  0xa1   :  { %1376 = vmatmul.mubr.bf16.gmra.mrb[48].mxu1 %v2687_v36  ;;  %v2775_v36 = vld [vmem:[%s3861_s0 + $0x2e8] ss:$28 sps:$4 sm:$0xff]  }
  0xa2   :  { %1553 = vmatmul.mubr.bf16.gmra.mrb[48].mxu0 %v2688_v37  ;;  %1383 = vmatprep.mubr.bf16.mxu1 %v2690_v38  ;;  %v2779_v38 = vld [vmem:[%s3861_s0 + $0x2b8] ss:$28 sps:$4 sm:$0xff]  }
  0xa3   :  { %1560 = vmatprep.mubr.bf16.mxu0 %v2692_v39 }
  0xa9   :  { %1384 = vmatmul.mubr.bf16.gmra.mrb[52].mxu1 %v2694_v40  ;;  %v2777_v40 = vld [vmem:[%s3861_s0 + $0x324] ss:$28 sps:$4 sm:$0xff]  }
  0xaa   :  { %1561 = vmatmul.mubr.bf16.gmra.mrb[52].mxu0 %v2695_v41  ;;  %1391 = vmatprep.mubr.bf16.mxu1 %v2697_v42  ;;  %v2781_v42 = vld [vmem:[%s3861_s0 + $0x2f0] ss:$28 sps:$4 sm:$0xff]  }
  0xab   :  { %1633 = vmatprep.mubr.bf16.mxu0 %v2701_v43 }
  0xb1   :  { %1392 = vmatmul.mubr.bf16.gmra.mrb[56].mxu1 %v2702_v44  ;;  %v2780_v44 = vld [vmem:[%s3861_s0 + $0x320] ss:$28 sps:$4 sm:$0xff]  }
  0xb2   :  { %1634 = vmatmul.mubr.bf16.vlgmr.msra.gmra.mrb[0].mxu0 %v2699_v45  ;;  %1399 = vmatprep.mubr.bf16.mxu1 %v2703_v46  ;;  %v2784_v46 = vld [vmem:[%s3861_s0 + $0x328] ss:$28 sps:$4 sm:$0xff]  }
  0xb3   :  { %1641 = vmatprep.mubr.bf16.mxu0 %v2705_v47 }
  0xb9   :  { %1400 = vmatmul.mubr.bf16.gmra.mrb[60].mxu1 %v2707_v48  ;;  %v2782_v48 = vld [vmem:[%s3861_s0 + $0x35c] ss:$28 sps:$4 sm:$0xff]  }
  0xba   :  { %1642 = vmatmul.mubr.bf16.gmra.mrb[4].mxu0 %v2708_v49  ;;  %1407 = vmatprep.mubr.bf16.mxu1 %v2709_v50  ;;  %v2786_v50 = vld [vmem:[%s3861_s0 + $0x360] ss:$28 sps:$4 sm:$0xff]  }
  0xbb   :  { %1649 = vmatprep.mubr.bf16.mxu0 %v2711_v51 }
  0xc1   :  { %1408 = vmatmul.mubr.bf16.gmra.mrb[64].mxu1 %v2713_v52  ;;  %v2785_v52 = vld [vmem:[%s3861_s0 + $0x358] ss:$28 sps:$4 sm:$0xff]  }
  0xc2   :  { %1650 = vmatmul.mubr.bf16.gmra.mrb[8].mxu0 %v2714_v53  ;;  %1415 = vmatprep.mubr.bf16.mxu1 %v2715_v54  ;;  %v2790_v54 = vld [vmem:[%s3861_s0 + $0x398] ss:$28 sps:$4 sm:$0xff]  }
  0xc3   :  { %1657 = vmatprep.mubr.bf16.mxu0 %v2717_v55 }
  0xc9   :  { %1416 = vmatmul.mubr.bf16.gmra.mrb[68].mxu1 %v2719_v56  ;;  %v2787_v56 = vld [vmem:[%s3861_s0 + $0x394] ss:$28 sps:$4 sm:$0xff]  }
  0xca   :  { %1658 = vmatmul.mubr.bf16.gmra.mrb[12].mxu0 %v2720_v57  ;;  %1568 = vmatprep.mubr.bf16.mxu1 %v2723_v58  ;;  %v2791_v58 = vld [vmem:[%s3861_s0 + $0x3d0] ss:$28 sps:$4 sm:$0xff]  }
  0xcb   :  { %1665 = vmatprep.mubr.bf16.mxu0 %v2724_v59 }
  0xd1   :  { %1569 = vmatmul.mubr.bf16.vlgmr.msra.gmra.mrb[56].mxu1 %v2721_v60  ;;  %v2789_v60 = vld [vmem:[%s3861_s0 + $0x390] ss:$28 sps:$4 sm:$0xff]  }
  0xd2   :  { %1666 = vmatmul.mubr.bf16.gmra.mrb[16].mxu0 %v2726_v61  ;;  %1576 = vmatprep.mubr.bf16.mxu1 %v2727_v62 }
  0xd3   :  { %1673 = vmatprep.mubr.bf16.mxu0 %v2729_v63  ;;  %2385 = vmatpush3.bf16.msra.mxu1 %v3197_v21  ;;  %v2757_v21 = vld [vmem:[%s3861_s0 + $0x244] ss:$28 sps:$4 sm:$0xff]   ;;  %v2792_v63 = vld [vmem:[%s3861_s0 + $0x3cc] ss:$28 sps:$4 sm:$0xff]  }
  0xd4   :  { %2386 = vmatprep.subr.bf16.mxu1 %v2746_v1 }
  0xd7   :  { %2387 = vmatpush3.bf16.msra.mxu1 %v2746_v1 }
  0xd9   :  { %1577 = vmatmul.mubr.bf16.gmra.mrb[60].mxu1 %v2731_v2 }
  0xda   :  { %1674 = vmatmul.mubr.bf16.gmra.mrb[20].mxu0 %v2732_v3  ;;  %1584 = vmatprep.mubr.bf16.mxu1 %v2734_v4  ;;  %v2794_v3 = vld [vmem:[%s3861_s0 + $0x3c8] ss:$28 sps:$4 sm:$0xff]  }
  0xdb   :  { %1681 = vmatprep.mubr.bf16.mxu0 %v2736_v5 }
  0xe1   :  { %1585 = vmatmul.mubr.bf16.gmra.mrb[64].mxu1 %v2738_v6 }
  0xe2   :  { %1682 = vmatmul.mubr.bf16.gmra.mrb[24].mxu0 %v2739_v7  ;;  %1592 = vmatprep.mubr.bf16.mxu1 %v2740_v8 }
  0xe3   :  { %1689 = vmatprep.mubr.bf16.mxu0 %v2742_v9 }
  0xe9   :  { %1593 = vmatmul.mubr.bf16.gmra.mrb[68].mxu1 %v2744_v10 }
  0xea   :  { %1690 = vmatmul.mubr.bf16.gmra.mrb[28].mxu0 %v2745_v11  ;;  %2388 = vmatprep.mubr.msk.bf16.mxu1 %vm1192_vm0, %v2749_v12 }
  0xeb   :  { %1697 = vmatprep.mubr.bf16.mxu0 %v2747_v13 }
  0xf1   :  { %2389 = vmatmul.mubr.msk.bf16.vlgmr.msra.gmra.mrb[72].mxu1 %vm1192_vm0, %v2751_v14 }
  0xf2   :  { %1698 = vmatmul.mubr.bf16.gmra.mrb[32].mxu0 %v2750_v15  ;;  %2392 = vmatprep.mubr.msk.bf16.mxu1 %vm1192_vm0, %v2754_v16 }
  0xf3   :  { %1705 = vmatprep.mubr.bf16.mxu0 %v2752_v17 }
  0xf9   :  { %2393 = vmatmul.mubr.msk.bf16.gmra.mrb[76].mxu1 %vm1192_vm0, %v2756_v18 }
  0xfa   :  { %1706 = vmatmul.mubr.bf16.gmra.mrb[36].mxu0 %v2755_v19  ;;  %2396 = vmatprep.mubr.msk.bf16.mxu1 %vm1192_vm0, %v2759_v20 }
  0xfb   :  { %1713 = vmatprep.mubr.bf16.mxu0 %v2757_v21 }
 0x101   :  { %2397 = vmatmul.mubr.msk.bf16.gmra.mrb[80].mxu1 %vm1192_vm0, %v2761_v22 }
 0x102   :  { %1714 = vmatmul.mubr.bf16.gmra.mrb[40].mxu0 %v2760_v23  ;;  %2400 = vmatprep.mubr.msk.bf16.mxu1 %vm1192_vm0, %v2764_v24 }
 0x103   :  { %1721 = vmatprep.mubr.bf16.mxu0 %v2762_v25 }
 0x109   :  { %2401 = vmatmul.mubr.msk.bf16.gmra.mrb[84].mxu1 %vm1192_vm0, %v2766_v26 }
 0x10a   :  { %1722 = vmatmul.mubr.bf16.gmra.mrb[44].mxu0 %v2765_v0  ;;  %2404 = vmatprep.mubr.msk.bf16.mxu1 %vm1192_vm0, %v2769_v27 }
 0x10b   :  { %1729 = vmatprep.mubr.bf16.mxu0 %v2767_v28 }
 0x111   :  { %2405 = vmatmul.mubr.msk.bf16.gmra.mrb[88].mxu1 %vm1192_vm0, %v2771_v29 }
 0x112   :  { %1730 = vmatmul.mubr.bf16.gmra.mrb[48].mxu0 %v2770_v30  ;;  %2408 = vmatprep.mubr.msk.bf16.mxu1 %vm1192_vm0, %v2774_v31 }
 0x113   :  { %1737 = vmatprep.mubr.bf16.mxu0 %v2772_v32 }
 0x114   :  { %v3444_v33 = vpop.f32.mrb[0].mxu1 }
 0x115   :  { %v1283_v35 = vpop.f32.mrb[1].mxu1 }
 0x116   :  { %v3452_v37 = vpop.f32.mrb[2].mxu1 }
 0x117   :  { %v1286_v39 = vpop.f32.mrb[3].mxu1 }
 0x119   :  { %2409 = vmatmul.mubr.msk.bf16.gmra.mrb[92].mxu1 %vm1192_vm0, %v2776_v34 }
 0x11a   :  { %1738 = vmatmul.mubr.bf16.gmra.mrb[52].mxu0 %v2775_v36  ;;  %2412 = vmatprep.mubr.msk.bf16.mxu1 %vm1192_vm0, %v2779_v38 }
 0x11b   :  { %1745 = vmatprep.mubr.bf16.mxu0 %v2777_v40 }
 0x11c   :  { %v3462_v41 = vpop.f32.mrb[4].mxu1 }
 0x11d   :  { %v1291_v43 = vpop.f32.mrb[5].mxu1 }
 0x11e   :  { %v3470_v45 = vpop.f32.mrb[6].mxu1 }
 0x11f   :  { %v1294_v47 = vpop.f32.mrb[7].mxu1 }
 0x121   :  { %2413 = vmatmul.mubr.msk.bf16.gmra.mrb[96].mxu1 %vm1192_vm0, %v2781_v42 }
 0x122   :  { %1746 = vmatmul.mubr.bf16.gmra.mrb[56].mxu0 %v2780_v44  ;;  %2416 = vmatprep.mubr.msk.bf16.mxu1 %vm1192_vm0, %v2784_v46 }
 0x123   :  { %1753 = vmatprep.mubr.bf16.mxu0 %v2782_v48 }
 0x124   :  { %v3480_v49 = vpop.f32.mrb[8].mxu1 }
 0x125   :  { %v1299_v51 = vpop.f32.mrb[9].mxu1 }
 0x126   :  { %v3488_v53 = vpop.f32.mrb[10].mxu1 }
 0x127   :  { %v1302_v55 = vpop.f32.mrb[11].mxu1 }
 0x129   :  { %2417 = vmatmul.mubr.msk.bf16.gmra.mrb[100].mxu1 %vm1192_vm0, %v2786_v50 }
 0x12a   :  { %1754 = vmatmul.mubr.bf16.gmra.mrb[60].mxu0 %v2785_v52  ;;  %2420 = vmatprep.mubr.msk.bf16.mxu1 %vm1192_vm0, %v2790_v54 }
 0x12b   :  { %1761 = vmatprep.mubr.bf16.mxu0 %v2787_v56 }
 0x12c   :  { %v3498_v57 = vpop.f32.mrb[12].mxu1 }
 0x12d   :  { %v1307_v59 = vpop.f32.mrb[13].mxu1 }
 0x12e   :  { %v3506_v61 = vpop.f32.mrb[14].mxu1 }
 0x12f   :  { %v1310_v62 = vpop.f32.mrb[15].mxu1 }
 0x131   :  { %2421 = vmatmul.mubr.msk.bf16.gmra.mrb[104].mxu1 %vm1192_vm0, %v2791_v58 }
 0x132   :  { %1762 = vmatmul.mubr.bf16.gmra.mrb[64].mxu0 %v2789_v60 }
 0x133   :  { %1769 = vmatprep.mubr.bf16.mxu0 %v2792_v63 }
 0x134   :  { %v3512_v1 = vpop.f32.mrb[16].mxu1 }
 0x135   :  { %v1315_v2 = vpop.f32.mrb[17].mxu1 }
 0x136   :  { %v3517_v4 = vpop.f32.mrb[18].mxu1 }
 0x137   :  { %v1318_v5 = vpop.f32.mrb[19].mxu1 }
 0x13a   :  { %1770 = vmatmul.mubr.bf16.gmra.mrb[68].mxu0 %v2794_v3 }
 0x13c   :  { %v3519_v6 = vpop.f32.mrb[20].mxu1 }
 0x13d   :  { %v1323_v7 = vpop.f32.mrb[21].mxu1 }
 0x13e   :  { %v3521_v8 = vpop.f32.mrb[22].mxu1 }
 0x13f   :  { %v1326_v9 = vpop.f32.mrb[23].mxu1 }
 0x144   :  { %v3523_v10 = vpop.f32.mrb[24].mxu1 }
 0x145   :  { %v1331_v11 = vpop.f32.mrb[25].mxu1 }
 0x146   :  { %v3525_v12 = vpop.f32.mrb[26].mxu1 }
 0x147   :  { %v1334_v13 = vpop.f32.mrb[27].mxu1 }
 0x14c   :  { %v3527_v14 = vpop.f32.mrb[28].mxu1 }
 0x14d   :  { %v1339_v15 = vpop.f32.mrb[29].mxu1 }
 0x14e   :  { %v3529_v16 = vpop.f32.mrb[30].mxu1 }
 0x14f   :  { %v1342_v17 = vpop.f32.mrb[31].mxu1 }
 0x154   :  { %v3531_v18 = vpop.f32.mrb[32].mxu1 }
 0x155   :  { %v1347_v19 = vpop.f32.mrb[33].mxu1 }
 0x156   :  { %v3533_v20 = vpop.f32.mrb[34].mxu1 }
 0x157   :  { %v1350_v21 = vpop.f32.mrb[35].mxu1 }
 0x15c   :  { %v3535_v22 = vpop.f32.mrb[36].mxu1 }
 0x15d   :  { %v1355_v23 = vpop.f32.mrb[37].mxu1 }
 0x15e   :  { %v3537_v24 = vpop.f32.mrb[38].mxu1 }
 0x15f   :  { %v1358_v25 = vpop.f32.mrb[39].mxu1 }
 0x164   :  { %v3539_v26 = vpop.f32.mrb[40].mxu1 }
 0x165   :  { %v1363_v0 = vpop.f32.mrb[41].mxu1 }
 0x166   :  { %v3541_v27 = vpop.f32.mrb[42].mxu1 }
 0x167   :  { %v1366_v28 = vpop.f32.mrb[43].mxu1 }
 0x16c   :  { %v3543_v29 = vpop.f32.mrb[44].mxu1 }
 0x16d   :  { %v1371_v30 = vpop.f32.mrb[45].mxu1 }
 0x16e   :  { %v3545_v31 = vpop.f32.mrb[46].mxu1 }
 0x16f   :  { %v1374_v32 = vpop.f32.mrb[47].mxu1 }
 0x174   :  { %v3547_v34 = vpop.f32.mrb[48].mxu1 }
 0x175   :  { %v1379_v35 = vpop.f32.mrb[49].mxu1 }
 0x176   :  { %v3549_v36 = vpop.f32.mrb[50].mxu1 }
 0x177   :  { %v1382_v38 = vpop.f32.mrb[51].mxu1 }
 0x17c   :  { %v3551_v39 = vpop.f32.mrb[52].mxu1 }
 0x17d   :  { %v1387_v40 = vpop.f32.mrb[53].mxu1 }
 0x17e   :  { %v3553_v42 = vpop.f32.mrb[54].mxu1 }
 0x17f   :  { %v1390_v43 = vpop.f32.mrb[55].mxu1 }
 0x185   :  { %v1635_v44 = vpop.f32.mrb[0].mxu0 }
 0x186   :  { %v3556_v46 = vadd.f32 %v1635_v44, %v3444_v33  ;;  %v1637_v47 = vpop.f32.mrb[1].mxu0 }
 0x187   :  { %v1638_v48 = vpop.f32.mrb[2].mxu0 }
 0x188   :  { %v3559_v50 = vadd.f32 %v1638_v48, %v3452_v37  ;;  %v1640_v51 = vpop.f32.mrb[3].mxu0 }
 0x18d   :  { %v1643_v52 = vpop.f32.mrb[4].mxu0 }
 0x18e   :  { %v2458_v54 = vadd.f32 %v1643_v52, %v3462_v41  ;;  %v1645_v55 = vpop.f32.mrb[5].mxu0 }
 0x18f   :  { %v1646_v56 = vpop.f32.mrb[6].mxu0 }
 0x190   :  { %v3563_v58 = vadd.f32 %v1646_v56, %v3470_v45  ;;  %v1648_v59 = vpop.f32.mrb[7].mxu0 }
 0x195   :  { %v1651_v60 = vpop.f32.mrb[8].mxu0 }
 0x196   :  { %v3566_v62 = vadd.f32 %v1651_v60, %v3480_v49  ;;  %v1653_v33 = vpop.f32.mrb[9].mxu0 }
 0x197   :  { %v1654_v63 = vpop.f32.mrb[10].mxu0 }
 0x198   :  { %v3569_v2 = vadd.f32 %v1654_v63, %v3488_v53  ;;  %v1656_v37 = vpop.f32.mrb[11].mxu0 }
 0x19d   :  { %v1659_v3 = vpop.f32.mrb[12].mxu0 }
 0x19e   :  { %v2462_v5 = vadd.f32 %v1659_v3, %v3498_v57  ;;  %v1661_v41 = vpop.f32.mrb[13].mxu0 }
 0x19f   :  { %v1662_v7 = vpop.f32.mrb[14].mxu0 }
 0x1a0   :  { %v3573_v9 = vadd.f32 %v1662_v7, %v3506_v61  ;;  %v1664_v45 = vpop.f32.mrb[15].mxu0 }
 0x1a4   :  { %v3575_v11 = vpop.f32.mrb[56].mxu1 }
 0x1a5   :  { %v1667_v13 = vpop.f32.mrb[16].mxu0  ;;  %v1572_v49 = vpop.f32.mrb[57].mxu1 }
 0x1a6   :  { %v3578_v15 = vadd.f32 %v1667_v13, %v3512_v1  ;;  %v1669_v17 = vpop.f32.mrb[17].mxu0  ;;  %v3580_v53 = vpop.f32.mrb[58].mxu1 }
 0x1a7   :  { %v1670_v19 = vpop.f32.mrb[18].mxu0  ;;  %v1575_v21 = vpop.f32.mrb[59].mxu1 }
 0x1a8   :  { %v3583_v57 = vadd.f32 %v1670_v19, %v3517_v4  ;;  %v1672_v23 = vpop.f32.mrb[19].mxu0 }
 0x1ac   :  { %v3585_v25 = vpop.f32.mrb[60].mxu1 }
 0x1ad   :  { %v1675_v61 = vpop.f32.mrb[20].mxu0  ;;  %v1580_v0 = vpop.f32.mrb[61].mxu1 }
 0x1ae   :  { %v2466_v28 = vadd.f32 %v1675_v61, %v3519_v6  ;;  %v1677_v30 = vpop.f32.mrb[21].mxu0  ;;  %v3588_v32 = vpop.f32.mrb[62].mxu1 }
 0x1af   :  { %v1678_v1 = vpop.f32.mrb[22].mxu0  ;;  %v1583_v35 = vpop.f32.mrb[63].mxu1 }
 0x1b0   :  { %v3591_v38 = vadd.f32 %v1678_v1, %v3521_v8  ;;  %v1680_v40 = vpop.f32.mrb[23].mxu0 }
 0x1b4   :  { %v3593_v43 = vpop.f32.mrb[64].mxu1 }
 0x1b5   :  { %v1683_v4 = vpop.f32.mrb[24].mxu0  ;;  %v1588_v44 = vpop.f32.mrb[65].mxu1 }
 0x1b6   :  { %v3596_v47 = vadd.f32 %v1683_v4, %v3523_v10  ;;  %v1685_v48 = vpop.f32.mrb[25].mxu0  ;;  %v3598_v51 = vpop.f32.mrb[66].mxu1 }
 0x1b7   :  { %v1686_v6 = vpop.f32.mrb[26].mxu0  ;;  %v1591_v52 = vpop.f32.mrb[67].mxu1 }
 0x1b8   :  { %v3601_v55 = vadd.f32 %v1686_v6, %v3525_v12  ;;  %v1688_v56 = vpop.f32.mrb[27].mxu0 }
 0x1bc   :  { %v3603_v59 = vpop.f32.mrb[68].mxu1 }
 0x1bd   :  { %v1691_v8 = vpop.f32.mrb[28].mxu0  ;;  %v1596_v60 = vpop.f32.mrb[69].mxu1 }
 0x1be   :  { %v3606_v33 = vadd.f32 %v1691_v8, %v3527_v14  ;;  %v1693_v63 = vpop.f32.mrb[29].mxu0  ;;  %v3608_v37 = vpop.f32.mrb[70].mxu1 }
 0x1bf   :  { %v1694_v10 = vpop.f32.mrb[30].mxu0  ;;  %v1599_v3 = vpop.f32.mrb[71].mxu1 }
 0x1c0   :  { %v3611_v41 = vadd.f32 %v1694_v10, %v3529_v16  ;;  %v1696_v7 = vpop.f32.mrb[31].mxu0 }
 0x1c4   :  { %v2390_v45 = vpop.f32.mrb[72].mxu1 }
 0x1c5   :  { %v1699_v12 = vpop.f32.mrb[32].mxu0  ;;  %v1821_v13 = vadd.f32 %v2458_v54, %v2390_v45  ;;  %v1812_v49 = vpop.f32.mrb[73].mxu1 }
 0x1c6   :  { %v3614_v17 = vadd.f32 %v1699_v12, %v3531_v18  ;;  %v1701_v19 = vpop.f32.mrb[33].mxu0  ;;  %v1813_v14 = vadd.f32 %v3556_v46, %v1812_v49  ;;  %v2391_v21 = vpop.f32.mrb[74].mxu1 }
 0x1c7   :  { %v1702_v23 = vpop.f32.mrb[34].mxu0  ;;  %v1824_v61 = vadd.f32 %v3563_v58, %v2391_v21  ;;  %v1815_v0 = vpop.f32.mrb[75].mxu1 }
 0x1c8   :  { %v3619_v30 = vadd.f32 %v1702_v23, %v3533_v20  ;;  %v1704_v16 = vpop.f32.mrb[35].mxu0  ;;  %v1816_v1 = vadd.f32 %v3559_v50, %v1815_v0 }
 0x1cc   :  { %v2394_v35 = vpop.f32.mrb[76].mxu1 }
 0x1cd   :  { %v1707_v54 = vpop.f32.mrb[36].mxu0  ;;  %v1837_v40 = vadd.f32 %v2462_v5, %v2394_v35  ;;  %v1828_v4 = vpop.f32.mrb[77].mxu1 }
 0x1ce   :  { %v3623_v18 = vadd.f32 %v1707_v54, %v3535_v22  ;;  %v1709_v44 = vpop.f32.mrb[37].mxu0  ;;  %v1829_v46 = vadd.f32 %v3566_v62, %v1828_v4  ;;  %v2395_v48 = vpop.f32.mrb[78].mxu1  ;;  %v3636_v22 = vld [vmem:[%s3862_s2] ss:$0 sm:$0xff] }
 0x1cf   :  { %v1710_v6 = vpop.f32.mrb[38].mxu0  ;;  %v3627_v58 = vadd.f32 %v3573_v9, %v2395_v48  ;;  %v1831_v20 = vpop.f32.mrb[79].mxu1  ;;  %v1963_v62 = vmul.f32 %v3636_v22, %v1816_v1 }
 0x1d0   :  { %v3630_v52 = vadd.f32 %v1710_v6, %v3537_v24  ;;  %v1712_v50 = vpop.f32.mrb[39].mxu0  ;;  %v1832_v56 = vadd.f32 %v3569_v2, %v1831_v20  ;;  %v1964_v2 = vmul.f32 %v3636_v22, %v1821_v13  ;;  %v1965_v20 = vmul.f32 %v3636_v22, %v1824_v61 }
 0x1d2   :  { %v1967_v54 = vmul.f32 %v3636_v22, %v1832_v56  ;;  %v1968_v56 = vmul.f32 %v3636_v22, %v1837_v40 }
 0x1d4   :  { %v2398_v5 = vpop.f32.mrb[80].mxu1 }
 0x1d5   :  { %v1715_v8 = vpop.f32.mrb[40].mxu0  ;;  %v1853_v60 = vadd.f32 %v2466_v28, %v2398_v5  ;;  %v1844_v63 = vpop.f32.mrb[81].mxu1  ;;  %v3651_v28 = vld [vmem:[%s3863_s3] ss:$0 sm:$0xff] }
 0x1d6   :  { %v3640_v9 = vadd.f32 %v1715_v8, %v3539_v26  ;;  %v1717_v10 = vpop.f32.mrb[41].mxu0  ;;  %v3643_v24 = vadd.f32 %v3578_v15, %v1844_v63  ;;  %v2399_v3 = vpop.f32.mrb[82].mxu1  ;;  %v1962_v26 = vmul.f32 %v3636_v22, %v1813_v14  ;;  %v3659_v13 = vadd.f32 %v3651_v28, %v1963_v62 }
 0x1d7   :  { %v1972_v7 = vmul.f32 %v3636_v22, %v1853_v60  ;;  %v1718_v45 = vpop.f32.mrb[42].mxu0  ;;  %v1856_v12 = vadd.f32 %v3591_v38, %v2399_v3  ;;  %v1847_v49 = vpop.f32.mrb[83].mxu1  ;;  %v3667_v16 = vadd.f32 %v3651_v28, %v1964_v2  ;;  %v1966_v2 = vmul.f32 %v3636_v22, %v1829_v46 }
 0x1d8   :  { %v3655_v19 = vadd.f32 %v1718_v45, %v3541_v27  ;;  %v1720_v15 = vpop.f32.mrb[43].mxu0  ;;  %v1848_v21 = vadd.f32 %v3583_v57, %v1847_v49  ;;  %v3675_v57 = vadd.f32 %v3651_v28, %v1962_v26 }
 0x1d9   :  { %v3662_v23 = vadd.f32 %v3651_v28, %v1972_v7  ;;  %v1973_v38 = vmul.f32 %v3636_v22, %v1856_v12  ;;  %v3719_v15 = vadd.f32 %v3651_v28, %v1966_v2 }
 0x1da   :  { %v1971_v0 = vmul.f32 %v3636_v22, %v1848_v21 }
 0x1db   :  { %v2042_v27 = vmax.f32 %v3659_v13, %v3662_v23  ;;  %v3672_v14 = vadd.f32 %v3651_v28, %v1973_v38 }
 0x1dc   :  { %v3678_v1 = vadd.f32 %v3651_v28, %v1971_v0  ;;  %v2402_v35 = vpop.f32.mrb[84].mxu1 }
 0x1dd   :  { %v2043_v4 = vmax.f32 %v3667_v16, %v3672_v14  ;;  %v1723_v44 = vpop.f32.mrb[44].mxu0  ;;  %v1869_v48 = vadd.f32 %v3606_v33, %v2402_v35  ;;  %v1860_v6 = vpop.f32.mrb[85].mxu1 }
 0x1de   :  { %v2041_v50 = vmax.f32 %v3675_v57, %v3678_v1  ;;  %v2478_v5 = vadd.f32 %v1723_v44, %v3543_v29  ;;  %v1725_v62 = vpop.f32.mrb[45].mxu0  ;;  %v1861_v8 = vadd.f32 %v3596_v47, %v1860_v6  ;;  %v2403_v60 = vpop.f32.mrb[86].mxu1  ;;  %v3697_v47 = vadd.f32 %v3651_v28, %v1967_v54 }
 0x1df   :  { %v1976_v63 = vmul.f32 %v3636_v22, %v1869_v48  ;;  %v1726_v10 = vpop.f32.mrb[46].mxu0  ;;  %v1872_v3 = vadd.f32 %v3611_v41, %v2403_v60  ;;  %v1863_v33 = vpop.f32.mrb[87].mxu1  ;;  %v3704_v41 = vadd.f32 %v3651_v28, %v1965_v20  ;;  %v1969_v6 = vmul.f32 %v3636_v22, %v3627_v58 }
 0x1e0   :  { %v1974_v61 = vmul.f32 %v3636_v22, %v1861_v8  ;;  %v2479_v7 = vadd.f32 %v1726_v10, %v3545_v31  ;;  %v1728_v45 = vpop.f32.mrb[47].mxu0  ;;  %v1864_v29 = vadd.f32 %v3601_v55, %v1863_v33  ;;  %v3711_v31 = vadd.f32 %v3651_v28, %v1968_v56 }
 0x1e1   :  { %v3700_v40 = vadd.f32 %v3651_v28, %v1976_v63  ;;  %v1977_v12 = vmul.f32 %v3636_v22, %v1872_v3 }
 0x1e2   :  { %v3707_v46 = vadd.f32 %v3651_v28, %v1974_v61  ;;  %v1975_v49 = vmul.f32 %v3636_v22, %v1864_v29 }
 0x1e3   :  { %v2046_v55 = vmax.f32 %v3697_v47, %v3700_v40  ;;  %v3716_v26 = vadd.f32 %v3651_v28, %v1977_v12 }
 0x1e4   :  { %v2044_v21 = vmax.f32 %v3704_v41, %v3707_v46  ;;  %v3724_v38 = vadd.f32 %v3651_v28, %v1975_v49  ;;  %v2406_v0 = vpop.f32.mrb[88].mxu1 }
 0x1e5   :  { %v2047_v35 = vmax.f32 %v3711_v31, %v3716_v26  ;;  %v1731_v54 = vpop.f32.mrb[48].mxu0  ;;  %v1885_v44 = vadd.f32 %v3623_v18, %v2406_v0  ;;  %v1876_v48 = vpop.f32.mrb[89].mxu1  ;;  %v1970_v18 = vmul.f32 %v3636_v22, %v3643_v24 }
 0x1e6   :  { %v2045_v20 = vmax.f32 %v3719_v15, %v3724_v38  ;;  %v2480_v62 = vadd.f32 %v1731_v54, %v3547_v34  ;;  %v1733_v8 = vpop.f32.mrb[49].mxu0  ;;  %v1877_v60 = vadd.f32 %v3614_v17, %v1876_v48  ;;  %v2407_v56 = vpop.f32.mrb[90].mxu1  ;;  %v3742_v34 = vadd.f32 %v3651_v28, %v1969_v6 }
 0x1e7   :  { %v1734_v63 = vpop.f32.mrb[50].mxu0  ;;  %v1888_v10 = vadd.f32 %v3630_v52, %v2407_v56  ;;  %v1879_v3 = vpop.f32.mrb[91].mxu1  ;;  %v3749_v52 = vadd.f32 %v3651_v28, %v1970_v18 }
 0x1e8   :  { %v1978_v33 = vmul.f32 %v3636_v22, %v1877_v60  ;;  %v2481_v58 = vadd.f32 %v1734_v63, %v3549_v36  ;;  %v1736_v2 = vpop.f32.mrb[51].mxu0  ;;  %v1880_v61 = vadd.f32 %v3619_v30, %v1879_v3 }
 0x1ea   :  { %v3745_v17 = vadd.f32 %v3651_v28, %v1978_v33  ;;  %v1979_v45 = vmul.f32 %v3636_v22, %v1880_v61 }
 0x1ec   :  { %v2048_v24 = vmax.f32 %v3742_v34, %v3745_v17  ;;  %v3754_v29 = vadd.f32 %v3651_v28, %v1979_v45  ;;  %v2410_v36 = vpop.f32.mrb[92].mxu1 }
 0x1ed   :  { %v1739_v12 = vpop.f32.mrb[52].mxu0  ;;  %v1901_v30 = vadd.f32 %v2478_v5, %v2410_v36  ;;  %v1892_v49 = vpop.f32.mrb[93].mxu1 }
 0x1ee   :  { %v2049_v0 = vmax.f32 %v3749_v52, %v3754_v29  ;;  %v2482_v54 = vadd.f32 %v1739_v12, %v3551_v39  ;;  %v1741_v48 = vpop.f32.mrb[53].mxu0  ;;  %v1893_v6 = vadd.f32 %v3640_v9, %v1892_v49  ;;  %v2411_v8 = vpop.f32.mrb[94].mxu1 }
 0x1ef   :  { %v1742_v60 = vpop.f32.mrb[54].mxu0  ;;  %v3760_v56 = vadd.f32 %v2479_v7, %v2411_v8  ;;  %v1895_v63 = vpop.f32.mrb[95].mxu1  ;;  %v1980_v7 = vmul.f32 %v3636_v22, %v1885_v44 }
 0x1f0   :  { %v2483_v3 = vadd.f32 %v1742_v60, %v3553_v42  ;;  %v1744_v18 = vpop.f32.mrb[55].mxu0  ;;  %v1896_v33 = vadd.f32 %v3655_v19, %v1895_v63 }
 0x1f1   :  { %v2023_v63 = vadd.f32 %v3651_v28, %v1980_v7 }
 0x1f4   :  { %v2414_v5 = vpop.f32.mrb[96].mxu1 }
 0x1f5   :  { %v1747_v2 = vpop.f32.mrb[56].mxu0  ;;  %v3764_v61 = vadd.f32 %v2482_v54, %v2414_v5  ;;  %v1908_v45 = vpop.f32.mrb[97].mxu1 }
 0x1f6   :  { %v2484_v39 = vadd.f32 %v1747_v2, %v3575_v11  ;;  %v1749_v36 = vpop.f32.mrb[57].mxu0  ;;  %v3767_v12 = vadd.f32 %v2480_v62, %v1908_v45  ;;  %v2415_v9 = vpop.f32.mrb[98].mxu1  ;;  %v1981_v62 = vmul.f32 %v3636_v22, %v1888_v10 }
 0x1f7   :  { %v1750_v49 = vpop.f32.mrb[58].mxu0  ;;  %v1920_v48 = vadd.f32 %v2483_v3, %v2415_v9  ;;  %v1911_v8 = vpop.f32.mrb[99].mxu1  ;;  %v1983_v9 = vmul.f32 %v3636_v22, %v1896_v33 }
 0x1f8   :  { %v2485_v42 = vadd.f32 %v1750_v49, %v3580_v53  ;;  %v1752_v60 = vpop.f32.mrb[59].mxu0  ;;  %v3771_v19 = vadd.f32 %v2481_v58, %v1911_v8  ;;  %v1982_v58 = vmul.f32 %v3636_v22, %v1893_v6 }
 0x1f9   :  { %v1989_v54 = vmul.f32 %v3636_v22, %v1920_v48 }
 0x1fa   :  { %v2025_v1 = vadd.f32 %v3651_v28, %v1982_v58 }
 0x1fb   :  { %v2032_v11 = vadd.f32 %v3651_v28, %v1989_v54 }
 0x1fc   :  { %v2418_v18 = vpop.f32.mrb[100].mxu1 }
 0x1fd   :  { %v2050_v5 = vmax.f32 %v2023_v63, %v2032_v11  ;;  %v1755_v2 = vpop.f32.mrb[60].mxu0  ;;  %v1924_v44 = vpop.f32.mrb[101].mxu1  ;;  %v1984_v63 = vmul.f32 %v3636_v22, %v1901_v30 }
 0x1fe   :  { %v2486_v3 = vadd.f32 %v1755_v2, %v3585_v25  ;;  %v1757_v45 = vpop.f32.mrb[61].mxu0  ;;  %v1925_v36 = vadd.f32 %v2484_v39, %v1924_v44  ;;  %v2419_v53 = vpop.f32.mrb[102].mxu1  ;;  %v2024_v39 = vadd.f32 %v3651_v28, %v1981_v62 }
 0x1ff   :  { %v2059_v7 = vmax.f32 %v2041_v50, %v2050_v5  ;;  %v1758_v49 = vpop.f32.mrb[62].mxu0  ;;  %v1927_v48 = vpop.f32.mrb[103].mxu1  ;;  %v2026_v50 = vadd.f32 %v3651_v28, %v1983_v9  ;;  %v2027_v30 = vadd.f32 %v3651_v28, %v1984_v63 }
 0x200   :  { %v1933_v8 = vadd.f32 %v2486_v3, %v2418_v18  ;;  %v1990_v10 = vmul.f32 %v3636_v22, %v1925_v36  ;;  %v2487_v60 = vadd.f32 %v1758_v49, %v3588_v32  ;;  %v1760_v54 = vpop.f32.mrb[63].mxu0  ;;  %v1928_v25 = vadd.f32 %v2485_v42, %v1927_v48 }
 0x201   :  { %v2068_v49 = vmax.f32 %v2059_v7, 0.0 }
 0x202   :  { %v1992_v6 = vmul.f32 %v3636_v22, %v1933_v8  ;;  %v2033_v33 = vadd.f32 %v3651_v28, %v1990_v10  ;;  %v1936_v11 = vadd.f32 %v2487_v60, %v2419_v53  ;;  %v1991_v57 = vmul.f32 %v3636_v22, %v1928_v25 }
 0x204   :  { %v2035_v18 = vadd.f32 %v3651_v28, %v1992_v6  ;;  %v2051_v32 = vmax.f32 %v2024_v39, %v2033_v33  ;;  %v1993_v42 = vmul.f32 %v3636_v22, %v1936_v11  ;;  %v2034_v62 = vadd.f32 %v3651_v28, %v1991_v57  ;;  %v2422_v5 = vpop.f32.mrb[104].mxu1 }
 0x205   :  { %v1763_v2 = vpop.f32.mrb[64].mxu0  ;;  %v1940_v44 = vpop.f32.mrb[105].mxu1 }
 0x206   :  { %v2053_v3 = vmax.f32 %v2026_v50, %v2035_v18  ;;  %v2060_v45 = vmax.f32 %v2042_v27, %v2051_v32  ;;  %v2036_v36 = vadd.f32 %v3651_v28, %v1993_v42  ;;  %v2052_v53 = vmax.f32 %v2025_v1, %v2034_v62  ;;  %v1765_v58 = vpop.f32.mrb[65].mxu0  ;;  %v2423_v9 = vpop.f32.mrb[106].mxu1 }
 0x207   :  { %v2488_v48 = vadd.f32 %v1763_v2, %v3593_v43  ;;  %v1766_v8 = vpop.f32.mrb[66].mxu0  ;;  %v1943_v10 = vpop.f32.mrb[107].mxu1  ;;  %v1985_v27 = vmul.f32 %v3636_v22, %v3760_v56  ;;  %v1987_v1 = vmul.f32 %v3636_v22, %v3771_v19 }
 0x208   :  { %v2062_v60 = vmax.f32 %v2044_v21, %v2053_v3  ;;  %v2069_v54 = vmax.f32 %v2060_v45, 0.0  ;;  %v2054_v25 = vmax.f32 %v2027_v30, %v2036_v36  ;;  %v2061_v13 = vmax.f32 %v2043_v4, %v2052_v53  ;;  %v1768_v23 = vpop.f32.mrb[67].mxu0 }
 0x209   :  { %v2489_v7 = vadd.f32 %v1766_v8, %v3598_v51  ;;  %v1941_v39 = vadd.f32 %v2488_v48, %v1940_v44  ;;  %v1986_v21 = vmul.f32 %v3636_v22, %v3767_v12  ;;  %v2028_v51 = vadd.f32 %v3651_v28, %v1985_v27 }
 0x20a   :  { %v2071_v43 = vmax.f32 %v2062_v60, 0.0  ;;  %v2344_v63 = vpack.c.bf16 %v2069_v54, %v2068_v49  ;;  %v2063_v41 = vmax.f32 %v2045_v20, %v2054_v25  ;;  %v2070_v46 = vmax.f32 %v2061_v13, 0.0 }
 0x20b   :  { %v1994_v16 = vmul.f32 %v3636_v22, %v1941_v39  ;;  %v1944_v14 = vadd.f32 %v2489_v7, %v1943_v10  ;;  %v2029_v12 = vadd.f32 %v3651_v28, %v1986_v21 }
 0x20c   :  { %2345 = vst [vmem:[%s3864_s4] sm:$0xff] %v2344_v63   ;;  %v2349_v4 = vpack.c.bf16 %v2071_v43, %v2070_v46  ;;  %v2072_v44 = vmax.f32 %v2063_v41, 0.0 }
 0x20d   :  { %v2037_v56 = vadd.f32 %v3651_v28, %v1994_v16  ;;  %v1995_v6 = vmul.f32 %v3636_v22, %v1944_v14  ;;  %v1771_v15 = vpop.f32.mrb[68].mxu0 }
 0x20e   :  { %2361 = vst [vmem:[%s3864_s4 + $0x8] sm:$0xff] %v2349_v4   ;;  %v2490_v38 = vadd.f32 %v1771_v15, %v3603_v59  ;;  %v1773_v20 = vpop.f32.mrb[69].mxu0  ;;  %v1988_v59 = vmul.f32 %v3636_v22, %v3764_v61 }
 0x20f   :  { %v2055_v33 = vmax.f32 %v2028_v51, %v2037_v56  ;;  %v2038_v11 = vadd.f32 %v3651_v28, %v1995_v6  ;;  %v1774_v57 = vpop.f32.mrb[70].mxu0 }
 0x210   :  { %v1949_v50 = vadd.f32 %v2490_v38, %v2422_v5  ;;  %v2491_v18 = vadd.f32 %v1774_v57, %v3608_v37  ;;  %v1776_v32 = vpop.f32.mrb[71].mxu0  ;;  %v2030_v37 = vadd.f32 %v3651_v28, %v1987_v1 }
 0x211   :  { %v2064_v42 = vmax.f32 %v2046_v55, %v2055_v33  ;;  %v2056_v62 = vmax.f32 %v2029_v12, %v2038_v11  ;;  %v2031_v55 = vadd.f32 %v3651_v28, %v1988_v59 }
 0x212   :  { %v1996_v30 = vmul.f32 %v3636_v22, %v1949_v50  ;;  %v1952_v2 = vadd.f32 %v2491_v18, %v2423_v9 }
 0x213   :  { %v2073_v3 = vmax.f32 %v2064_v42, 0.0  ;;  %v2065_v19 = vmax.f32 %v2047_v35, %v2056_v62 }
 0x214   :  { %v2039_v5 = vadd.f32 %v3651_v28, %v1996_v30  ;;  %v1997_v47 = vmul.f32 %v3636_v22, %v1952_v2 }
 0x215   :  { %v2354_v40 = vpack.c.bf16 %v2073_v3, %v2072_v44  ;;  %v2074_v35 = vmax.f32 %v2065_v19, 0.0 }
 0x216   :  { %v2057_v45 = vmax.f32 %v2030_v37, %v2039_v5  ;;  %v2040_v61 = vadd.f32 %v3651_v28, %v1997_v47 }
 0x217   :  { %2362 = vst [vmem:[%s3864_s4 + $0x10] sm:$0xff] %v2354_v40  }
 0x218   :  { %v2066_v31 = vmax.f32 %v2048_v24, %v2057_v45  ;;  %v2058_v26 = vmax.f32 %v2031_v55, %v2040_v61 }
 0x21a   :  { %v2075_v36 = vmax.f32 %v2066_v31, 0.0  ;;  %v2067_v22 = vmax.f32 %v2049_v0, %v2058_v26 }
 0x21c   :  { %v2359_v53 = vpack.c.bf16 %v2075_v36, %v2074_v35  ;;  %v2076_v58 = vmax.f32 %v2067_v22, 0.0 }
 0x21e   :  { %2363 = vst [vmem:[%s3864_s4 + $0x18] sm:$0xff] %v2359_v53   ;;  %v2340_v28 = vpack.c.bf16 %v2076_v58, %v2076_v58 }
 0x220   :  { %2122 = vst [vmem:[%s3864_s4 + $0x20] sm:$0xf] %v2340_v28 }

// kernel: fashion_convnet_forward.5
= control target key start
LH: loop header
LB: loop body
LE: loop exit
PB: predicated region body
PF: predicated region fallthrough
CT: control target
= control target key end

     0   :  { %v612_v36 = vlaneseq  ;;  %v6571_v37 = vmov 1966171168   ;;  %s8593_s0 = inlined_call_operand.vmem [shape: bf16[2,2304], index: 0, kind: input, shape index: {}]   ;;  %s8594_s1 = inlined_call_operand.vmem [shape: bf16[2304,512], index: 1, kind: input, shape index: {}]   ;;  %s8595_s2 = inlined_call_operand.vmem [shape: f32[1,512], index: 2, kind: input, shape index: {}]   ;;  %s8596_s3 = inlined_call_operand.vmem [shape: bf16[512,128], index: 3, kind: input, shape index: {}]   ;;  %s8597_s4 = inlined_call_operand.vmem [shape: f32[1,128], index: 4, kind: input, shape index: {}]   ;;  %s8598_s5 = inlined_call_operand.vmem [shape: f32[1,128], index: 5, kind: input, shape index: {}]   ;;  %s8599_s6 = inlined_call_operand.vmem [shape: bf16[128,128], index: 6, kind: input, shape index: {}]   ;;  %s8600_s7 = inlined_call_operand.vmem [shape: f32[1,128], index: 7, kind: input, shape index: {}]   ;;  %s8601_s8 = inlined_call_operand.hbm [shape: f32[2,128], index: 8, kind: output, shape index: {}]  }
   0x1   :  { %v5639_v0 = vld [vmem:[%s8594_s1 + $0x4] ss:$16 sps:$4 sm:$0xff]   ;;  %v5641_v1 = vld [vmem:[%s8594_s1 + $0xc] ss:$16 sps:$4 sm:$0xff]   ;;  %v5643_v2 = vld [vmem:[%s8594_s1] ss:$16 sps:$4 sm:$0xff]   ;;  %v637_v38 = vunpack.c.l.s4 %v6571_v37 }
   0x2   :  { %3653 = vmatprep.subr.bf16.mxu0 %v5639_v0  ;;  %v5644_v3 = vld [vmem:[%s8594_s1 + $0x8] ss:$16 sps:$4 sm:$0xff]   ;;  %4022 = vmatprep.subr.bf16.mxu1 %v5641_v1  ;;  %v5645_v4 = vld [vmem:[%s8594_s1 + $0x24] ss:$16 sps:$4 sm:$0xff]   ;;  %v5647_v5 = vld [vmem:[%s8594_s1 + $0x2c] ss:$16 sps:$4 sm:$0xff]  }
   0x3   :  { %3654 = vmatpush1.bf16.msra.mxu0 %v5643_v2  ;;  %4023 = vmatpush1.bf16.msra.mxu1 %v5644_v3  ;;  %v5649_v6 = vld [vmem:[%s8594_s1 + $0x20] ss:$16 sps:$4 sm:$0xff]   ;;  %v5650_v7 = vld [vmem:[%s8594_s1 + $0x28] ss:$16 sps:$4 sm:$0xff]   ;;  %v5651_v8 = vld [vmem:[%s8594_s1 + $0x44] ss:$16 sps:$4 sm:$0xff]   ;;  %v638_v43 = vunpack.c.0.s8 %v637_v38 }
   0x4   :  { %3655 = vmatprep.subr.bf16.mxu0 %v5645_v4  ;;  %4024 = vmatprep.subr.bf16.mxu1 %v5647_v5  ;;  %v5653_v9 = vld [vmem:[%s8594_s1 + $0x4c] ss:$16 sps:$4 sm:$0xff]   ;;  %v5655_v10 = vld [vmem:[%s8594_s1 + $0x40] ss:$16 sps:$4 sm:$0xff]   ;;  %v5656_v11 = vld [vmem:[%s8594_s1 + $0x48] ss:$16 sps:$4 sm:$0xff]  }
   0x5   :  { %v5657_v12 = vld [vmem:[%s8594_s1 + $0x64] ss:$16 sps:$4 sm:$0xff]   ;;  %v5659_v13 = vld [vmem:[%s8594_s1 + $0x6c] ss:$16 sps:$4 sm:$0xff]   ;;  %v5661_v14 = vld [vmem:[%s8594_s1 + $0x60] ss:$16 sps:$4 sm:$0xff]  }
   0x6   :  { %v5662_v15 = vld [vmem:[%s8594_s1 + $0x68] ss:$16 sps:$4 sm:$0xff]   ;;  %v5663_v16 = vld [vmem:[%s8594_s1 + $0x84] ss:$16 sps:$4 sm:$0xff]   ;;  %v5665_v17 = vld [vmem:[%s8594_s1 + $0x8c] ss:$16 sps:$4 sm:$0xff]  }
   0x7   :  { %3656 = vmatpush1.bf16.msra.mxu0 %v5649_v6  ;;  %4025 = vmatpush1.bf16.msra.mxu1 %v5650_v7  ;;  %v5667_v18 = vld [vmem:[%s8594_s1 + $0x80] ss:$16 sps:$4 sm:$0xff]   ;;  %v5668_v19 = vld [vmem:[%s8594_s1 + $0x88] ss:$16 sps:$4 sm:$0xff]   ;;  %v5669_v20 = vld [vmem:[%s8594_s1 + $0xa4] ss:$16 sps:$4 sm:$0xff]  }
   0x8   :  { %3657 = vmatprep.subr.bf16.mxu0 %v5651_v8  ;;  %4026 = vmatprep.subr.bf16.mxu1 %v5653_v9  ;;  %v5671_v21 = vld [vmem:[%s8594_s1 + $0xac] ss:$16 sps:$4 sm:$0xff]   ;;  %v5673_v22 = vld [vmem:[%s8594_s1 + $0xa0] ss:$16 sps:$4 sm:$0xff]   ;;  %v5674_v23 = vld [vmem:[%s8594_s1 + $0xa8] ss:$16 sps:$4 sm:$0xff]  }
   0x9   :  { %v5675_v24 = vld [vmem:[%s8594_s1 + $0xc4] ss:$16 sps:$4 sm:$0xff]   ;;  %v5677_v25 = vld [vmem:[%s8594_s1 + $0xcc] ss:$16 sps:$4 sm:$0xff]   ;;  %v5679_v26 = vld [vmem:[%s8594_s1 + $0xc0] ss:$16 sps:$4 sm:$0xff]  }
   0xa   :  { %v5680_v27 = vld [vmem:[%s8594_s1 + $0xc8] ss:$16 sps:$4 sm:$0xff]   ;;  %v5681_v28 = vld [vmem:[%s8594_s1 + $0xe4] ss:$16 sps:$4 sm:$0xff]   ;;  %v5683_v29 = vld [vmem:[%s8594_s1 + $0xec] ss:$16 sps:$4 sm:$0xff]  }
   0xb   :  { %3658 = vmatpush1.bf16.msra.mxu0 %v5655_v10  ;;  %4027 = vmatpush1.bf16.msra.mxu1 %v5656_v11  ;;  %v5685_v30 = vld [vmem:[%s8594_s1 + $0xe0] ss:$16 sps:$4 sm:$0xff]   ;;  %v5686_v31 = vld [vmem:[%s8594_s1 + $0xe8] ss:$16 sps:$4 sm:$0xff]   ;;  %v5687_v32 = vld [vmem:[%s8594_s1 + $0x104] ss:$16 sps:$4 sm:$0xff]  }
   0xc   :  { %3659 = vmatprep.subr.bf16.mxu0 %v5657_v12  ;;  %4028 = vmatprep.subr.bf16.mxu1 %v5659_v13  ;;  %v5689_v33 = vld [vmem:[%s8594_s1 + $0x10c] ss:$16 sps:$4 sm:$0xff]   ;;  %v5691_v34 = vld [vmem:[%s8594_s1 + $0x100] ss:$16 sps:$4 sm:$0xff]   ;;  %v5692_v35 = vld [vmem:[%s8594_s1 + $0x108] ss:$16 sps:$4 sm:$0xff]  }
   0xd   :  { %v5693_v39 = vld [vmem:[%s8594_s1 + $0x124] ss:$16 sps:$4 sm:$0xff]   ;;  %v5695_v40 = vld [vmem:[%s8594_s1 + $0x12c] ss:$16 sps:$4 sm:$0xff]   ;;  %v5697_v41 = vld [vmem:[%s8594_s1 + $0x120] ss:$16 sps:$4 sm:$0xff]  }
   0xe   :  { %v6737_v42 = vshrl.u32 %v612_v36, 7  ;;  %v5698_v44 = vld [vmem:[%s8594_s1 + $0x128] ss:$16 sps:$4 sm:$0xff]   ;;  %v5699_v45 = vld [vmem:[%s8594_s1 + $0x144] ss:$16 sps:$4 sm:$0xff]  }
   0xf   :  { %3660 = vmatpush1.bf16.msra.mxu0 %v5661_v14  ;;  %4029 = vmatpush1.bf16.msra.mxu1 %v5662_v15  ;;  %v5701_v46 = vld [vmem:[%s8594_s1 + $0x14c] ss:$16 sps:$4 sm:$0xff]   ;;  %v5703_v47 = vld [vmem:[%s8594_s1 + $0x140] ss:$16 sps:$4 sm:$0xff]   ;;  %v5704_v48 = vld [vmem:[%s8594_s1 + $0x148] ss:$16 sps:$4 sm:$0xff]  }
  0x10   :  { %3661 = vmatprep.subr.bf16.mxu0 %v5663_v16  ;;  %4030 = vmatprep.subr.bf16.mxu1 %v5665_v17  ;;  %v6755_v49 = vsub.s32 %v638_v43, %v6737_v42  ;;  %v5705_v50 = vld [vmem:[%s8594_s1 + $0x164] ss:$16 sps:$4 sm:$0xff]   ;;  %v5707_v51 = vld [vmem:[%s8594_s1 + $0x16c] ss:$16 sps:$4 sm:$0xff]   ;;  %v5709_v53 = vld [vmem:[%s8594_s1 + $0x160] ss:$16 sps:$4 sm:$0xff]  }
  0x11   :  { %v6766_v52 = vld [vmem:[%s8593_s0] sm:$0xff]  ;;  %v5710_v55 = vld [vmem:[%s8594_s1 + $0x168] ss:$16 sps:$4 sm:$0xff]   ;;  %v5713_v57 = vld [vmem:[%s8594_s1 + $0x18c] ss:$16 sps:$4 sm:$0xff]  }
  0x12   :  { %v642_v54 = vrot.slane %v6766_v52, %v6755_v49  ;;  %v5711_v56 = vld [vmem:[%s8594_s1 + $0x184] ss:$16 sps:$4 sm:$0xff]   ;;  %v5715_v59 = vld [vmem:[%s8594_s1 + $0x180] ss:$16 sps:$4 sm:$0xff]   ;;  %v5716_v61 = vld [vmem:[%s8594_s1 + $0x188] ss:$16 sps:$4 sm:$0xff]  }
  0x13   :  { %3662 = vmatpush1.bf16.msra.mxu0 %v5667_v18  ;;  %4031 = vmatpush1.bf16.msra.mxu1 %v5668_v19  ;;  %v5717_v62 = vld [vmem:[%s8594_s1 + $0x1a4] ss:$16 sps:$4 sm:$0xff]   ;;  %v5719_v63 = vld [vmem:[%s8594_s1 + $0x1ac] ss:$16 sps:$4 sm:$0xff]   ;;  %v5721_v0 = vld [vmem:[%s8594_s1 + $0x1a0] ss:$16 sps:$4 sm:$0xff]  }
  0x14   :  { %3663 = vmatprep.subr.bf16.mxu0 %v5669_v20  ;;  %4032 = vmatprep.subr.bf16.mxu1 %v5671_v21  ;;  %v650_v58 = vcombine.high %v642_v54, %v642_v54  ;;  %v5722_v1 = vld [vmem:[%s8594_s1 + $0x1a8] ss:$16 sps:$4 sm:$0xff]   ;;  %v5723_v2 = vld [vmem:[%s8594_s1 + $0x1c4] ss:$16 sps:$4 sm:$0xff]   ;;  %v5725_v3 = vld [vmem:[%s8594_s1 + $0x1cc] ss:$16 sps:$4 sm:$0xff]   ;;  %v6835_v13 = vrot.slane %v642_v54, %v6755_v49 }
  0x15   :  { %v5727_v4 = vld [vmem:[%s8594_s1 + $0x1c0] ss:$16 sps:$4 sm:$0xff]   ;;  %v5728_v5 = vld [vmem:[%s8594_s1 + $0x1c8] ss:$16 sps:$4 sm:$0xff]   ;;  %v5729_v6 = vld [vmem:[%s8594_s1 + $0x1e4] ss:$16 sps:$4 sm:$0xff]  }
  0x16   :  { %v672_v60 = vrot.slane %v650_v58, %v6755_v49  ;;  %v5731_v7 = vld [vmem:[%s8594_s1 + $0x1ec] ss:$16 sps:$4 sm:$0xff]   ;;  %v5733_v8 = vld [vmem:[%s8594_s1 + $0x1e0] ss:$16 sps:$4 sm:$0xff]   ;;  %v5734_v9 = vld [vmem:[%s8594_s1 + $0x1e8] ss:$16 sps:$4 sm:$0xff]  }
  0x17   :  { %3664 = vmatpush1.bf16.msra.mxu0 %v5673_v22  ;;  %4033 = vmatpush1.bf16.msra.mxu1 %v5674_v23  ;;  %v5737_v10 = vld [vmem:[%s8594_s1 + $0x204] ss:$16 sps:$4 sm:$0xff]   ;;  %v5740_v11 = vld [vmem:[%s8594_s1 + $0x20c] ss:$16 sps:$4 sm:$0xff]   ;;  %v5735_v12 = vld [vmem:[%s8594_s1 + $0x200] ss:$16 sps:$4 sm:$0xff]  }
  0x18   :  { %3665 = vmatprep.subr.bf16.mxu0 %v5675_v24  ;;  %4034 = vmatprep.subr.bf16.mxu1 %v5677_v25  ;;  %v5738_v14 = vld [vmem:[%s8594_s1 + $0x208] ss:$16 sps:$4 sm:$0xff]   ;;  %v5743_v15 = vld [vmem:[%s8594_s1 + $0x224] ss:$16 sps:$4 sm:$0xff]   ;;  %v5746_v16 = vld [vmem:[%s8594_s1 + $0x22c] ss:$16 sps:$4 sm:$0xff]   ;;  %v682_v17 = vcombine.high %v672_v60, %v672_v60 }
  0x19   :  { %3685 = vmatprep.mubr.bf16.mxu0 %v672_v60  ;;  %4054 = vmatprep.mubr.bf16.mxu1 %v672_v60  ;;  %v5741_v18 = vld [vmem:[%s8594_s1 + $0x220] ss:$16 sps:$4 sm:$0xff]   ;;  %v5744_v19 = vld [vmem:[%s8594_s1 + $0x228] ss:$16 sps:$4 sm:$0xff]   ;;  %v5749_v20 = vld [vmem:[%s8594_s1 + $0x244] ss:$16 sps:$4 sm:$0xff]  }
  0x1a   :  { %v5752_v21 = vld [vmem:[%s8594_s1 + $0x24c] ss:$16 sps:$4 sm:$0xff]   ;;  %v5747_v22 = vld [vmem:[%s8594_s1 + $0x240] ss:$16 sps:$4 sm:$0xff]   ;;  %v5750_v23 = vld [vmem:[%s8594_s1 + $0x248] ss:$16 sps:$4 sm:$0xff]  }
  0x1b   :  { %3666 = vmatpush1.bf16.msra.mxu0 %v5679_v26  ;;  %4035 = vmatpush1.bf16.msra.mxu1 %v5680_v27  ;;  %v5755_v24 = vld [vmem:[%s8594_s1 + $0x264] ss:$16 sps:$4 sm:$0xff]   ;;  %v5758_v25 = vld [vmem:[%s8594_s1 + $0x26c] ss:$16 sps:$4 sm:$0xff]   ;;  %v5753_v26 = vld [vmem:[%s8594_s1 + $0x260] ss:$16 sps:$4 sm:$0xff]  }
  0x1c   :  { %3667 = vmatprep.subr.bf16.mxu0 %v5681_v28  ;;  %4036 = vmatprep.subr.bf16.mxu1 %v5683_v29  ;;  %v5756_v27 = vld [vmem:[%s8594_s1 + $0x268] ss:$16 sps:$4 sm:$0xff]   ;;  %v5761_v28 = vld [vmem:[%s8594_s1 + $0x284] ss:$16 sps:$4 sm:$0xff]   ;;  %v5764_v29 = vld [vmem:[%s8594_s1 + $0x28c] ss:$16 sps:$4 sm:$0xff]  }
  0x1d   :  { %v5773_v36 = vld [vmem:[%s8594_s1 + $0x2c4] ss:$16 sps:$4 sm:$0xff]   ;;  %v5776_v37 = vld [vmem:[%s8594_s1 + $0x2cc] ss:$16 sps:$4 sm:$0xff]   ;;  %v5771_v38 = vld [vmem:[%s8594_s1 + $0x2c0] ss:$16 sps:$4 sm:$0xff]  }
  0x1e   :  { %v5777_v43 = vld [vmem:[%s8594_s1 + $0x2e0] ss:$16 sps:$4 sm:$0xff]   ;;  %v5792_v54 = vld [vmem:[%s8594_s1 + $0x328] ss:$16 sps:$4 sm:$0xff]   ;;  %v5806_v60 = vld [vmem:[%s8594_s1 + $0x36c] ss:$16 sps:$4 sm:$0xff]  }
  0x1f   :  { %3668 = vmatpush1.bf16.msra.mxu0 %v5685_v30  ;;  %4037 = vmatpush1.bf16.msra.mxu1 %v5686_v31  ;;  %v5759_v30 = vld [vmem:[%s8594_s1 + $0x280] ss:$16 sps:$4 sm:$0xff]   ;;  %v5762_v31 = vld [vmem:[%s8594_s1 + $0x288] ss:$16 sps:$4 sm:$0xff]  }
  0x20   :  { %3669 = vmatprep.subr.bf16.mxu0 %v5687_v32  ;;  %4038 = vmatprep.subr.bf16.mxu1 %v5689_v33  ;;  %v5767_v32 = vld [vmem:[%s8594_s1 + $0x2a4] ss:$16 sps:$4 sm:$0xff]   ;;  %v5770_v33 = vld [vmem:[%s8594_s1 + $0x2ac] ss:$16 sps:$4 sm:$0xff]   ;;  %v5798_v58 = vld [vmem:[%s8594_s1 + $0x348] ss:$16 sps:$4 sm:$0xff]  }
  0x23   :  { %3670 = vmatpush1.bf16.msra.mxu0 %v5691_v34  ;;  %4039 = vmatpush1.bf16.msra.mxu1 %v5692_v35  ;;  %v5765_v34 = vld [vmem:[%s8594_s1 + $0x2a0] ss:$16 sps:$4 sm:$0xff]   ;;  %v5768_v35 = vld [vmem:[%s8594_s1 + $0x2a8] ss:$16 sps:$4 sm:$0xff]  }
  0x24   :  { %3671 = vmatprep.subr.bf16.mxu0 %v5693_v39  ;;  %4040 = vmatprep.subr.bf16.mxu1 %v5695_v40  ;;  %v5774_v39 = vld [vmem:[%s8594_s1 + $0x2c8] ss:$16 sps:$4 sm:$0xff]   ;;  %v5779_v40 = vld [vmem:[%s8594_s1 + $0x2e4] ss:$16 sps:$4 sm:$0xff]  }
  0x27   :  { %3672 = vmatpush1.bf16.msra.mxu0 %v5697_v41  ;;  %4041 = vmatpush1.bf16.msra.mxu1 %v5698_v44  ;;  %v5782_v41 = vld [vmem:[%s8594_s1 + $0x2ec] ss:$16 sps:$4 sm:$0xff]   ;;  %v5780_v44 = vld [vmem:[%s8594_s1 + $0x2e8] ss:$16 sps:$4 sm:$0xff]  }
  0x28   :  { %3673 = vmatprep.subr.bf16.mxu0 %v5699_v45  ;;  %4042 = vmatprep.subr.bf16.mxu1 %v5701_v46  ;;  %v5785_v45 = vld [vmem:[%s8594_s1 + $0x304] ss:$16 sps:$4 sm:$0xff]   ;;  %v5788_v46 = vld [vmem:[%s8594_s1 + $0x30c] ss:$16 sps:$4 sm:$0xff]  }
  0x2b   :  { %3674 = vmatpush1.bf16.msra.mxu0 %v5703_v47  ;;  %4043 = vmatpush1.bf16.msra.mxu1 %v5704_v48  ;;  %v5783_v47 = vld [vmem:[%s8594_s1 + $0x300] ss:$16 sps:$4 sm:$0xff]   ;;  %v5786_v48 = vld [vmem:[%s8594_s1 + $0x308] ss:$16 sps:$4 sm:$0xff]  }
  0x2c   :  { %3675 = vmatprep.subr.bf16.mxu0 %v5705_v50  ;;  %4044 = vmatprep.subr.bf16.mxu1 %v5707_v51  ;;  %v5791_v50 = vld [vmem:[%s8594_s1 + $0x324] ss:$16 sps:$4 sm:$0xff]   ;;  %v5794_v51 = vld [vmem:[%s8594_s1 + $0x32c] ss:$16 sps:$4 sm:$0xff]  }
  0x2f   :  { %3676 = vmatpush1.bf16.msra.mxu0 %v5709_v53  ;;  %4045 = vmatpush1.bf16.msra.mxu1 %v5710_v55  ;;  %v5789_v53 = vld [vmem:[%s8594_s1 + $0x320] ss:$16 sps:$4 sm:$0xff]   ;;  %v5797_v55 = vld [vmem:[%s8594_s1 + $0x344] ss:$16 sps:$4 sm:$0xff]  }
  0x30   :  { %3677 = vmatprep.subr.bf16.mxu0 %v5711_v56  ;;  %4046 = vmatprep.subr.bf16.mxu1 %v5713_v57  ;;  %v5800_v56 = vld [vmem:[%s8594_s1 + $0x34c] ss:$16 sps:$4 sm:$0xff]   ;;  %v5795_v57 = vld [vmem:[%s8594_s1 + $0x340] ss:$16 sps:$4 sm:$0xff]  }
  0x33   :  { %3678 = vmatpush1.bf16.msra.mxu0 %v5715_v59  ;;  %4047 = vmatpush1.bf16.msra.mxu1 %v5716_v61  ;;  %v5803_v59 = vld [vmem:[%s8594_s1 + $0x364] ss:$16 sps:$4 sm:$0xff]   ;;  %v5801_v61 = vld [vmem:[%s8594_s1 + $0x360] ss:$16 sps:$4 sm:$0xff]  }
  0x34   :  { %3679 = vmatprep.subr.bf16.mxu0 %v5717_v62  ;;  %4048 = vmatprep.subr.bf16.mxu1 %v5719_v63  ;;  %v5804_v62 = vld [vmem:[%s8594_s1 + $0x368] ss:$16 sps:$4 sm:$0xff]   ;;  %v5809_v63 = vld [vmem:[%s8594_s1 + $0x384] ss:$16 sps:$4 sm:$0xff]  }
  0x37   :  { %3680 = vmatpush1.bf16.msra.mxu0 %v5721_v0  ;;  %4049 = vmatpush1.bf16.msra.mxu1 %v5722_v1  ;;  %v5812_v0 = vld [vmem:[%s8594_s1 + $0x38c] ss:$16 sps:$4 sm:$0xff]   ;;  %v5807_v1 = vld [vmem:[%s8594_s1 + $0x380] ss:$16 sps:$4 sm:$0xff]  }
  0x38   :  { %3681 = vmatprep.subr.bf16.mxu0 %v5723_v2  ;;  %4050 = vmatprep.subr.bf16.mxu1 %v5725_v3  ;;  %v5810_v2 = vld [vmem:[%s8594_s1 + $0x388] ss:$16 sps:$4 sm:$0xff]   ;;  %v5815_v3 = vld [vmem:[%s8594_s1 + $0x3a4] ss:$16 sps:$4 sm:$0xff]  }
  0x3b   :  { %3682 = vmatpush1.bf16.msra.mxu0 %v5727_v4  ;;  %4051 = vmatpush1.bf16.msra.mxu1 %v5728_v5  ;;  %v5818_v4 = vld [vmem:[%s8594_s1 + $0x3ac] ss:$16 sps:$4 sm:$0xff]   ;;  %v5813_v5 = vld [vmem:[%s8594_s1 + $0x3a0] ss:$16 sps:$4 sm:$0xff]  }
  0x3c   :  { %3683 = vmatprep.subr.bf16.mxu0 %v5729_v6  ;;  %4052 = vmatprep.subr.bf16.mxu1 %v5731_v7  ;;  %v5816_v6 = vld [vmem:[%s8594_s1 + $0x3a8] ss:$16 sps:$4 sm:$0xff]   ;;  %v5821_v7 = vld [vmem:[%s8594_s1 + $0x3c4] ss:$16 sps:$4 sm:$0xff]  }
  0x3f   :  { %3684 = vmatpush1.bf16.msra.mxu0 %v5733_v8  ;;  %4053 = vmatpush1.bf16.msra.mxu1 %v5734_v9  ;;  %v5824_v8 = vld [vmem:[%s8594_s1 + $0x3cc] ss:$16 sps:$4 sm:$0xff]   ;;  %v635_v9 = vcombine.high %v6766_v52, %v6766_v52 }
  0x40   :  { %3694 = vmatprep.subr.bf16.mxu0 %v5737_v10  ;;  %4063 = vmatprep.subr.bf16.mxu1 %v5740_v11  ;;  %v5819_v10 = vld [vmem:[%s8594_s1 + $0x3c0] ss:$16 sps:$4 sm:$0xff]   ;;  %v5822_v11 = vld [vmem:[%s8594_s1 + $0x3c8] ss:$16 sps:$4 sm:$0xff]   ;;  %v5830_v52 = vld [vmem:[%s8594_s1 + $0x3ec] ss:$16 sps:$4 sm:$0xff]  }
  0x42   :  { %3686 = vmatmul.mubr.bf16.vlgmr.msra.gmra.mrb[0].mxu0 %v6835_v13  ;;  %4055 = vmatmul.mubr.bf16.vlgmr.msra.gmra.mrb[0].mxu1 %v6835_v13 }
  0x43   :  { %3695 = vmatpush1.bf16.msra.mxu0 %v5735_v12  ;;  %4064 = vmatpush1.bf16.msra.mxu1 %v5738_v14  ;;  %v5827_v12 = vld [vmem:[%s8594_s1 + $0x3e4] ss:$16 sps:$4 sm:$0xff]   ;;  %v7019_v14 = vrot.slane %v635_v9, %v6755_v49  ;;  %v5906_v9 = vld [vmem:[%s8594_s1 + $0x588] ss:$16 sps:$4 sm:$0xff]  }
  0x44   :  { %3696 = vmatprep.subr.bf16.mxu0 %v5743_v15  ;;  %4065 = vmatprep.subr.bf16.mxu1 %v5746_v16  ;;  %v5825_v15 = vld [vmem:[%s8594_s1 + $0x3e0] ss:$16 sps:$4 sm:$0xff]   ;;  %v5828_v16 = vld [vmem:[%s8594_s1 + $0x3e8] ss:$16 sps:$4 sm:$0xff]  }
  0x45   :  { %3726 = vmatprep.mubr.bf16.mxu0 %v682_v17  ;;  %4095 = vmatprep.mubr.bf16.mxu1 %v682_v17  ;;  %v5833_v17 = vld [vmem:[%s8594_s1 + $0x404] ss:$16 sps:$4 sm:$0xff]  }
  0x47   :  { %3697 = vmatpush1.bf16.msra.mxu0 %v5741_v18  ;;  %4066 = vmatpush1.bf16.msra.mxu1 %v5744_v19  ;;  %v5836_v18 = vld [vmem:[%s8594_s1 + $0x40c] ss:$16 sps:$4 sm:$0xff]   ;;  %v651_v19 = vcombine.high %v7019_v14, %v7019_v14 }
  0x48   :  { %3698 = vmatprep.subr.bf16.mxu0 %v5749_v20  ;;  %4067 = vmatprep.subr.bf16.mxu1 %v5752_v21  ;;  %v5831_v20 = vld [vmem:[%s8594_s1 + $0x400] ss:$16 sps:$4 sm:$0xff]   ;;  %v680_v21 = vcombine.high %v6835_v13, %v6835_v13 }
  0x49   :  { %v5837_v13 = vld [vmem:[%s8594_s1 + $0x420] ss:$16 sps:$4 sm:$0xff]  }
  0x4b   :  { %3699 = vmatpush1.bf16.msra.mxu0 %v5747_v22  ;;  %4068 = vmatpush1.bf16.msra.mxu1 %v5750_v23  ;;  %v5834_v22 = vld [vmem:[%s8594_s1 + $0x408] ss:$16 sps:$4 sm:$0xff]   ;;  %v5839_v23 = vld [vmem:[%s8594_s1 + $0x424] ss:$16 sps:$4 sm:$0xff]  }
  0x4c   :  { %3700 = vmatprep.subr.bf16.mxu0 %v5755_v24  ;;  %4069 = vmatprep.subr.bf16.mxu1 %v5758_v25  ;;  %v5842_v24 = vld [vmem:[%s8594_s1 + $0x42c] ss:$16 sps:$4 sm:$0xff]   ;;  %v7050_v25 = vrot.slane %v651_v19, %v6755_v49  ;;  %v5923_v19 = vld [vmem:[%s8594_s1 + $0x5e4] ss:$16 sps:$4 sm:$0xff]  }
  0x4f   :  { %3701 = vmatpush1.bf16.msra.mxu0 %v5753_v26  ;;  %4070 = vmatpush1.bf16.msra.mxu1 %v5756_v27  ;;  %v5840_v26 = vld [vmem:[%s8594_s1 + $0x428] ss:$16 sps:$4 sm:$0xff]   ;;  %v5845_v27 = vld [vmem:[%s8594_s1 + $0x444] ss:$16 sps:$4 sm:$0xff]  }
  0x50   :  { %3702 = vmatprep.subr.bf16.mxu0 %v5761_v28  ;;  %4071 = vmatprep.subr.bf16.mxu1 %v5764_v29  ;;  %v5848_v28 = vld [vmem:[%s8594_s1 + $0x44c] ss:$16 sps:$4 sm:$0xff]   ;;  %v5843_v29 = vld [vmem:[%s8594_s1 + $0x440] ss:$16 sps:$4 sm:$0xff]  }
  0x53   :  { %3703 = vmatpush1.bf16.msra.mxu0 %v5759_v30  ;;  %4072 = vmatpush1.bf16.msra.mxu1 %v5762_v31  ;;  %v5846_v30 = vld [vmem:[%s8594_s1 + $0x448] ss:$16 sps:$4 sm:$0xff]   ;;  %v5851_v31 = vld [vmem:[%s8594_s1 + $0x464] ss:$16 sps:$4 sm:$0xff]  }
  0x54   :  { %3704 = vmatprep.subr.bf16.mxu0 %v5767_v32  ;;  %4073 = vmatprep.subr.bf16.mxu1 %v5770_v33  ;;  %v5854_v32 = vld [vmem:[%s8594_s1 + $0x46c] ss:$16 sps:$4 sm:$0xff]   ;;  %v5849_v33 = vld [vmem:[%s8594_s1 + $0x460] ss:$16 sps:$4 sm:$0xff]  }
  0x57   :  { %3705 = vmatpush1.bf16.msra.mxu0 %v5765_v34  ;;  %4074 = vmatpush1.bf16.msra.mxu1 %v5768_v35  ;;  %v5852_v34 = vld [vmem:[%s8594_s1 + $0x468] ss:$16 sps:$4 sm:$0xff]   ;;  %v5857_v35 = vld [vmem:[%s8594_s1 + $0x484] ss:$16 sps:$4 sm:$0xff]  }
  0x58   :  { %3706 = vmatprep.subr.bf16.mxu0 %v5773_v36  ;;  %4075 = vmatprep.subr.bf16.mxu1 %v5776_v37  ;;  %v5860_v36 = vld [vmem:[%s8594_s1 + $0x48c] ss:$16 sps:$4 sm:$0xff]   ;;  %v5855_v37 = vld [vmem:[%s8594_s1 + $0x480] ss:$16 sps:$4 sm:$0xff]  }
  0x5b   :  { %3707 = vmatpush1.bf16.msra.mxu0 %v5771_v38  ;;  %4076 = vmatpush1.bf16.msra.mxu1 %v5774_v39  ;;  %v5858_v38 = vld [vmem:[%s8594_s1 + $0x488] ss:$16 sps:$4 sm:$0xff]   ;;  %v5863_v39 = vld [vmem:[%s8594_s1 + $0x4a4] ss:$16 sps:$4 sm:$0xff]  }
  0x5c   :  { %3708 = vmatprep.subr.bf16.mxu0 %v5779_v40  ;;  %4077 = vmatprep.subr.bf16.mxu1 %v5782_v41  ;;  %v5866_v40 = vld [vmem:[%s8594_s1 + $0x4ac] ss:$16 sps:$4 sm:$0xff]   ;;  %v5861_v41 = vld [vmem:[%s8594_s1 + $0x4a0] ss:$16 sps:$4 sm:$0xff]  }
  0x5f   :  { %3709 = vmatpush1.bf16.msra.mxu0 %v5777_v43  ;;  %4078 = vmatpush1.bf16.msra.mxu1 %v5780_v44  ;;  %v5864_v43 = vld [vmem:[%s8594_s1 + $0x4a8] ss:$16 sps:$4 sm:$0xff]   ;;  %v5869_v44 = vld [vmem:[%s8594_s1 + $0x4c4] ss:$16 sps:$4 sm:$0xff]  }
  0x60   :  { %3710 = vmatprep.subr.bf16.mxu0 %v5785_v45  ;;  %4079 = vmatprep.subr.bf16.mxu1 %v5788_v46  ;;  %v5872_v45 = vld [vmem:[%s8594_s1 + $0x4cc] ss:$16 sps:$4 sm:$0xff]   ;;  %v5867_v46 = vld [vmem:[%s8594_s1 + $0x4c0] ss:$16 sps:$4 sm:$0xff]  }
  0x63   :  { %3711 = vmatpush1.bf16.msra.mxu0 %v5783_v47  ;;  %4080 = vmatpush1.bf16.msra.mxu1 %v5786_v48  ;;  %v5870_v47 = vld [vmem:[%s8594_s1 + $0x4c8] ss:$16 sps:$4 sm:$0xff]   ;;  %v5875_v48 = vld [vmem:[%s8594_s1 + $0x4e4] ss:$16 sps:$4 sm:$0xff]  }
  0x64   :  { %3712 = vmatprep.subr.bf16.mxu0 %v5791_v50  ;;  %4081 = vmatprep.subr.bf16.mxu1 %v5794_v51  ;;  %v5878_v50 = vld [vmem:[%s8594_s1 + $0x4ec] ss:$16 sps:$4 sm:$0xff]   ;;  %v5873_v51 = vld [vmem:[%s8594_s1 + $0x4e0] ss:$16 sps:$4 sm:$0xff]  }
  0x67   :  { %3713 = vmatpush1.bf16.msra.mxu0 %v5789_v53  ;;  %4082 = vmatpush1.bf16.msra.mxu1 %v5792_v54  ;;  %v5876_v53 = vld [vmem:[%s8594_s1 + $0x4e8] ss:$16 sps:$4 sm:$0xff]   ;;  %v5881_v54 = vld [vmem:[%s8594_s1 + $0x504] ss:$16 sps:$4 sm:$0xff]  }
  0x68   :  { %3714 = vmatprep.subr.bf16.mxu0 %v5797_v55  ;;  %4083 = vmatprep.subr.bf16.mxu1 %v5800_v56  ;;  %v5884_v55 = vld [vmem:[%s8594_s1 + $0x50c] ss:$16 sps:$4 sm:$0xff]   ;;  %v5879_v56 = vld [vmem:[%s8594_s1 + $0x500] ss:$16 sps:$4 sm:$0xff]  }
  0x6b   :  { %3715 = vmatpush1.bf16.msra.mxu0 %v5795_v57  ;;  %4084 = vmatpush1.bf16.msra.mxu1 %v5798_v58  ;;  %v5882_v57 = vld [vmem:[%s8594_s1 + $0x508] ss:$16 sps:$4 sm:$0xff]   ;;  %v5887_v58 = vld [vmem:[%s8594_s1 + $0x524] ss:$16 sps:$4 sm:$0xff]  }
  0x6c   :  { %3716 = vmatprep.subr.bf16.mxu0 %v5803_v59  ;;  %4085 = vmatprep.subr.bf16.mxu1 %v5806_v60  ;;  %v5890_v59 = vld [vmem:[%s8594_s1 + $0x52c] ss:$16 sps:$4 sm:$0xff]   ;;  %v5885_v60 = vld [vmem:[%s8594_s1 + $0x520] ss:$16 sps:$4 sm:$0xff]  }
  0x6f   :  { %3717 = vmatpush1.bf16.msra.mxu0 %v5801_v61  ;;  %4086 = vmatpush1.bf16.msra.mxu1 %v5804_v62  ;;  %v5888_v61 = vld [vmem:[%s8594_s1 + $0x528] ss:$16 sps:$4 sm:$0xff]   ;;  %v5893_v62 = vld [vmem:[%s8594_s1 + $0x544] ss:$16 sps:$4 sm:$0xff]  }
  0x70   :  { %3718 = vmatprep.subr.bf16.mxu0 %v5809_v63  ;;  %4087 = vmatprep.subr.bf16.mxu1 %v5812_v0  ;;  %v5896_v63 = vld [vmem:[%s8594_s1 + $0x54c] ss:$16 sps:$4 sm:$0xff]   ;;  %v5891_v0 = vld [vmem:[%s8594_s1 + $0x540] ss:$16 sps:$4 sm:$0xff]  }
  0x73   :  { %3719 = vmatpush1.bf16.msra.mxu0 %v5807_v1  ;;  %4088 = vmatpush1.bf16.msra.mxu1 %v5810_v2  ;;  %v5894_v1 = vld [vmem:[%s8594_s1 + $0x548] ss:$16 sps:$4 sm:$0xff]   ;;  %v5899_v2 = vld [vmem:[%s8594_s1 + $0x564] ss:$16 sps:$4 sm:$0xff]  }
  0x74   :  { %3720 = vmatprep.subr.bf16.mxu0 %v5815_v3  ;;  %4089 = vmatprep.subr.bf16.mxu1 %v5818_v4  ;;  %v5902_v3 = vld [vmem:[%s8594_s1 + $0x56c] ss:$16 sps:$4 sm:$0xff]   ;;  %v5897_v4 = vld [vmem:[%s8594_s1 + $0x560] ss:$16 sps:$4 sm:$0xff]  }
  0x77   :  { %3721 = vmatpush1.bf16.msra.mxu0 %v5813_v5  ;;  %4090 = vmatpush1.bf16.msra.mxu1 %v5816_v6  ;;  %v5900_v5 = vld [vmem:[%s8594_s1 + $0x568] ss:$16 sps:$4 sm:$0xff]   ;;  %v5905_v6 = vld [vmem:[%s8594_s1 + $0x584] ss:$16 sps:$4 sm:$0xff]  }
  0x78   :  { %3722 = vmatprep.subr.bf16.mxu0 %v5821_v7  ;;  %4091 = vmatprep.subr.bf16.mxu1 %v5824_v8  ;;  %v5908_v7 = vld [vmem:[%s8594_s1 + $0x58c] ss:$16 sps:$4 sm:$0xff]   ;;  %v5903_v8 = vld [vmem:[%s8594_s1 + $0x580] ss:$16 sps:$4 sm:$0xff]  }
  0x7b   :  { %3723 = vmatpush1.bf16.msra.mxu0 %v5819_v10  ;;  %4092 = vmatpush1.bf16.msra.mxu1 %v5822_v11  ;;  %v5911_v10 = vld [vmem:[%s8594_s1 + $0x5a4] ss:$16 sps:$4 sm:$0xff]   ;;  %v5914_v11 = vld [vmem:[%s8594_s1 + $0x5ac] ss:$16 sps:$4 sm:$0xff]  }
  0x7c   :  { %3724 = vmatprep.subr.bf16.mxu0 %v5827_v12  ;;  %4093 = vmatprep.subr.bf16.mxu1 %v5830_v52  ;;  %v5909_v12 = vld [vmem:[%s8594_s1 + $0x5a0] ss:$16 sps:$4 sm:$0xff]   ;;  %v5912_v52 = vld [vmem:[%s8594_s1 + $0x5a8] ss:$16 sps:$4 sm:$0xff]  }
  0x7f   :  { %3725 = vmatpush1.bf16.msra.mxu0 %v5825_v15  ;;  %4094 = vmatpush1.bf16.msra.mxu1 %v5828_v16  ;;  %v5917_v15 = vld [vmem:[%s8594_s1 + $0x5c4] ss:$16 sps:$4 sm:$0xff]   ;;  %v5920_v16 = vld [vmem:[%s8594_s1 + $0x5cc] ss:$16 sps:$4 sm:$0xff]  }
  0x80   :  { %3735 = vmatprep.subr.bf16.mxu0 %v5833_v17  ;;  %4104 = vmatprep.subr.bf16.mxu1 %v5836_v18  ;;  %v5915_v17 = vld [vmem:[%s8594_s1 + $0x5c0] ss:$16 sps:$4 sm:$0xff]   ;;  %v5918_v18 = vld [vmem:[%s8594_s1 + $0x5c8] ss:$16 sps:$4 sm:$0xff]  }
  0x82   :  { %3727 = vmatmul.mubr.bf16.vlgmr.msra.gmra.mrb[0].mxu0 %v680_v21  ;;  %4096 = vmatmul.mubr.bf16.vlgmr.msra.gmra.mrb[0].mxu1 %v680_v21  ;;  %v5921_v21 = vld [vmem:[%s8594_s1 + $0x5e0] ss:$16 sps:$4 sm:$0xff]  }
  0x83   :  { %3736 = vmatpush1.bf16.msra.mxu0 %v5831_v20  ;;  %4105 = vmatpush1.bf16.msra.mxu1 %v5834_v22  ;;  %v5926_v20 = vld [vmem:[%s8594_s1 + $0x5ec] ss:$16 sps:$4 sm:$0xff]   ;;  %v5924_v22 = vld [vmem:[%s8594_s1 + $0x5e8] ss:$16 sps:$4 sm:$0xff]  }
  0x84   :  { %3737 = vmatprep.subr.bf16.mxu0 %v5839_v23  ;;  %4106 = vmatprep.subr.bf16.mxu1 %v5842_v24  ;;  %v5930_v23 = vld [vmem:[%s8594_s1 + $0x604] ss:$16 sps:$4 sm:$0xff]   ;;  %v5933_v24 = vld [vmem:[%s8594_s1 + $0x60c] ss:$16 sps:$4 sm:$0xff]  }
  0x85   :  { %3767 = vmatprep.mubr.bf16.mxu0 %v7050_v25  ;;  %4136 = vmatprep.mubr.bf16.mxu1 %v7050_v25 }
  0x87   :  { %3738 = vmatpush1.bf16.msra.mxu0 %v5837_v13  ;;  %4107 = vmatpush1.bf16.msra.mxu1 %v5840_v26  ;;  %v5928_v13 = vld [vmem:[%s8594_s1 + $0x600] ss:$16 sps:$4 sm:$0xff]   ;;  %v7239_v26 = vrot.slane %v7019_v14, %v6755_v49  ;;  %v683_v14 = vcombine.high %v7050_v25, %v7050_v25  ;;  %v5942_v25 = vld [vmem:[%s8594_s1 + $0x644] ss:$16 sps:$4 sm:$0xff]  }
  0x88   :  { %3739 = vmatprep.subr.bf16.mxu0 %v5845_v27  ;;  %4108 = vmatprep.subr.bf16.mxu1 %v5848_v28  ;;  %v5931_v27 = vld [vmem:[%s8594_s1 + $0x608] ss:$16 sps:$4 sm:$0xff]   ;;  %v5936_v28 = vld [vmem:[%s8594_s1 + $0x624] ss:$16 sps:$4 sm:$0xff]  }
  0x8b   :  { %3740 = vmatpush1.bf16.msra.mxu0 %v5843_v29  ;;  %4109 = vmatpush1.bf16.msra.mxu1 %v5846_v30  ;;  %v5939_v29 = vld [vmem:[%s8594_s1 + $0x62c] ss:$16 sps:$4 sm:$0xff]   ;;  %v5934_v30 = vld [vmem:[%s8594_s1 + $0x620] ss:$16 sps:$4 sm:$0xff]  }
  0x8c   :  { %3741 = vmatprep.subr.bf16.mxu0 %v5851_v31  ;;  %4110 = vmatprep.subr.bf16.mxu1 %v5854_v32  ;;  %v5937_v31 = vld [vmem:[%s8594_s1 + $0x628] ss:$16 sps:$4 sm:$0xff]   ;;  %v5945_v32 = vld [vmem:[%s8594_s1 + $0x64c] ss:$16 sps:$4 sm:$0xff]  }
  0x8f   :  { %3742 = vmatpush1.bf16.msra.mxu0 %v5849_v33  ;;  %4111 = vmatpush1.bf16.msra.mxu1 %v5852_v34  ;;  %v5940_v33 = vld [vmem:[%s8594_s1 + $0x640] ss:$16 sps:$4 sm:$0xff]   ;;  %v5943_v34 = vld [vmem:[%s8594_s1 + $0x648] ss:$16 sps:$4 sm:$0xff]  }
  0x90   :  { %3743 = vmatprep.subr.bf16.mxu0 %v5857_v35  ;;  %4112 = vmatprep.subr.bf16.mxu1 %v5860_v36  ;;  %v5948_v35 = vld [vmem:[%s8594_s1 + $0x664] ss:$16 sps:$4 sm:$0xff]   ;;  %v5951_v36 = vld [vmem:[%s8594_s1 + $0x66c] ss:$16 sps:$4 sm:$0xff]  }
  0x93   :  { %3744 = vmatpush1.bf16.msra.mxu0 %v5855_v37  ;;  %4113 = vmatpush1.bf16.msra.mxu1 %v5858_v38  ;;  %v5946_v37 = vld [vmem:[%s8594_s1 + $0x660] ss:$16 sps:$4 sm:$0xff]   ;;  %v5949_v38 = vld [vmem:[%s8594_s1 + $0x668] ss:$16 sps:$4 sm:$0xff]  }
  0x94   :  { %3745 = vmatprep.subr.bf16.mxu0 %v5863_v39  ;;  %4114 = vmatprep.subr.bf16.mxu1 %v5866_v40  ;;  %v5954_v39 = vld [vmem:[%s8594_s1 + $0x684] ss:$16 sps:$4 sm:$0xff]   ;;  %v5957_v40 = vld [vmem:[%s8594_s1 + $0x68c] ss:$16 sps:$4 sm:$0xff]  }
  0x97   :  { %3746 = vmatpush1.bf16.msra.mxu0 %v5861_v41  ;;  %4115 = vmatpush1.bf16.msra.mxu1 %v5864_v43  ;;  %v5952_v41 = vld [vmem:[%s8594_s1 + $0x680] ss:$16 sps:$4 sm:$0xff]   ;;  %v5955_v43 = vld [vmem:[%s8594_s1 + $0x688] ss:$16 sps:$4 sm:$0xff]  }
  0x98   :  { %3747 = vmatprep.subr.bf16.mxu0 %v5869_v44  ;;  %4116 = vmatprep.subr.bf16.mxu1 %v5872_v45  ;;  %v5960_v44 = vld [vmem:[%s8594_s1 + $0x6a4] ss:$16 sps:$4 sm:$0xff]   ;;  %v5963_v45 = vld [vmem:[%s8594_s1 + $0x6ac] ss:$16 sps:$4 sm:$0xff]  }
  0x9b   :  { %3748 = vmatpush1.bf16.msra.mxu0 %v5867_v46  ;;  %4117 = vmatpush1.bf16.msra.mxu1 %v5870_v47  ;;  %v5958_v46 = vld [vmem:[%s8594_s1 + $0x6a0] ss:$16 sps:$4 sm:$0xff]   ;;  %v5961_v47 = vld [vmem:[%s8594_s1 + $0x6a8] ss:$16 sps:$4 sm:$0xff]  }
  0x9c   :  { %3749 = vmatprep.subr.bf16.mxu0 %v5875_v48  ;;  %4118 = vmatprep.subr.bf16.mxu1 %v5878_v50  ;;  %v5966_v48 = vld [vmem:[%s8594_s1 + $0x6c4] ss:$16 sps:$4 sm:$0xff]   ;;  %v5969_v50 = vld [vmem:[%s8594_s1 + $0x6cc] ss:$16 sps:$4 sm:$0xff]  }
  0x9f   :  { %3750 = vmatpush1.bf16.msra.mxu0 %v5873_v51  ;;  %4119 = vmatpush1.bf16.msra.mxu1 %v5876_v53  ;;  %v5964_v51 = vld [vmem:[%s8594_s1 + $0x6c0] ss:$16 sps:$4 sm:$0xff]   ;;  %v5967_v53 = vld [vmem:[%s8594_s1 + $0x6c8] ss:$16 sps:$4 sm:$0xff]  }
  0xa0   :  { %3751 = vmatprep.subr.bf16.mxu0 %v5881_v54  ;;  %4120 = vmatprep.subr.bf16.mxu1 %v5884_v55  ;;  %v5972_v54 = vld [vmem:[%s8594_s1 + $0x6e4] ss:$16 sps:$4 sm:$0xff]   ;;  %v5975_v55 = vld [vmem:[%s8594_s1 + $0x6ec] ss:$16 sps:$4 sm:$0xff]  }
  0xa3   :  { %3752 = vmatpush1.bf16.msra.mxu0 %v5879_v56  ;;  %4121 = vmatpush1.bf16.msra.mxu1 %v5882_v57  ;;  %v5970_v56 = vld [vmem:[%s8594_s1 + $0x6e0] ss:$16 sps:$4 sm:$0xff]   ;;  %v5973_v57 = vld [vmem:[%s8594_s1 + $0x6e8] ss:$16 sps:$4 sm:$0xff]  }
  0xa4   :  { %3753 = vmatprep.subr.bf16.mxu0 %v5887_v58  ;;  %4122 = vmatprep.subr.bf16.mxu1 %v5890_v59  ;;  %v5978_v58 = vld [vmem:[%s8594_s1 + $0x704] ss:$16 sps:$4 sm:$0xff]   ;;  %v5981_v59 = vld [vmem:[%s8594_s1 + $0x70c] ss:$16 sps:$4 sm:$0xff]  }
  0xa7   :  { %3754 = vmatpush1.bf16.msra.mxu0 %v5885_v60  ;;  %4123 = vmatpush1.bf16.msra.mxu1 %v5888_v61  ;;  %v5976_v60 = vld [vmem:[%s8594_s1 + $0x700] ss:$16 sps:$4 sm:$0xff]   ;;  %v5979_v61 = vld [vmem:[%s8594_s1 + $0x708] ss:$16 sps:$4 sm:$0xff]  }
  0xa8   :  { %3755 = vmatprep.subr.bf16.mxu0 %v5893_v62  ;;  %4124 = vmatprep.subr.bf16.mxu1 %v5896_v63  ;;  %v5984_v62 = vld [vmem:[%s8594_s1 + $0x724] ss:$16 sps:$4 sm:$0xff]   ;;  %v5987_v63 = vld [vmem:[%s8594_s1 + $0x72c] ss:$16 sps:$4 sm:$0xff]  }
  0xab   :  { %3756 = vmatpush1.bf16.msra.mxu0 %v5891_v0  ;;  %4125 = vmatpush1.bf16.msra.mxu1 %v5894_v1  ;;  %v5982_v0 = vld [vmem:[%s8594_s1 + $0x720] ss:$16 sps:$4 sm:$0xff]   ;;  %v5985_v1 = vld [vmem:[%s8594_s1 + $0x728] ss:$16 sps:$4 sm:$0xff]  }
  0xac   :  { %3757 = vmatprep.subr.bf16.mxu0 %v5899_v2  ;;  %4126 = vmatprep.subr.bf16.mxu1 %v5902_v3  ;;  %v5990_v2 = vld [vmem:[%s8594_s1 + $0x744] ss:$16 sps:$4 sm:$0xff]   ;;  %v5993_v3 = vld [vmem:[%s8594_s1 + $0x74c] ss:$16 sps:$4 sm:$0xff]  }
  0xaf   :  { %3758 = vmatpush1.bf16.msra.mxu0 %v5897_v4  ;;  %4127 = vmatpush1.bf16.msra.mxu1 %v5900_v5  ;;  %v5988_v4 = vld [vmem:[%s8594_s1 + $0x740] ss:$16 sps:$4 sm:$0xff]   ;;  %v5991_v5 = vld [vmem:[%s8594_s1 + $0x748] ss:$16 sps:$4 sm:$0xff]  }
  0xb0   :  { %3759 = vmatprep.subr.bf16.mxu0 %v5905_v6  ;;  %4128 = vmatprep.subr.bf16.mxu1 %v5908_v7  ;;  %v5996_v6 = vld [vmem:[%s8594_s1 + $0x764] ss:$16 sps:$4 sm:$0xff]   ;;  %v5999_v7 = vld [vmem:[%s8594_s1 + $0x76c] ss:$16 sps:$4 sm:$0xff]  }
  0xb3   :  { %3760 = vmatpush1.bf16.msra.mxu0 %v5903_v8  ;;  %4129 = vmatpush1.bf16.msra.mxu1 %v5906_v9  ;;  %v5994_v8 = vld [vmem:[%s8594_s1 + $0x760] ss:$16 sps:$4 sm:$0xff]   ;;  %v5997_v9 = vld [vmem:[%s8594_s1 + $0x768] ss:$16 sps:$4 sm:$0xff]  }
  0xb4   :  { %3761 = vmatprep.subr.bf16.mxu0 %v5911_v10  ;;  %4130 = vmatprep.subr.bf16.mxu1 %v5914_v11  ;;  %v6002_v10 = vld [vmem:[%s8594_s1 + $0x784] ss:$16 sps:$4 sm:$0xff]   ;;  %v6005_v11 = vld [vmem:[%s8594_s1 + $0x78c] ss:$16 sps:$4 sm:$0xff]  }
  0xb7   :  { %3762 = vmatpush1.bf16.msra.mxu0 %v5909_v12  ;;  %4131 = vmatpush1.bf16.msra.mxu1 %v5912_v52  ;;  %v6000_v12 = vld [vmem:[%s8594_s1 + $0x780] ss:$16 sps:$4 sm:$0xff]   ;;  %v6003_v52 = vld [vmem:[%s8594_s1 + $0x788] ss:$16 sps:$4 sm:$0xff]  }
  0xb8   :  { %3763 = vmatprep.subr.bf16.mxu0 %v5917_v15  ;;  %4132 = vmatprep.subr.bf16.mxu1 %v5920_v16  ;;  %v6008_v15 = vld [vmem:[%s8594_s1 + $0x7a4] ss:$16 sps:$4 sm:$0xff]   ;;  %v6011_v16 = vld [vmem:[%s8594_s1 + $0x7ac] ss:$16 sps:$4 sm:$0xff]  }
  0xbb   :  { %3764 = vmatpush1.bf16.msra.mxu0 %v5915_v17  ;;  %4133 = vmatpush1.bf16.msra.mxu1 %v5918_v18  ;;  %v6006_v17 = vld [vmem:[%s8594_s1 + $0x7a0] ss:$16 sps:$4 sm:$0xff]   ;;  %v6009_v18 = vld [vmem:[%s8594_s1 + $0x7a8] ss:$16 sps:$4 sm:$0xff]  }
  0xbc   :  { %3765 = vmatprep.subr.bf16.mxu0 %v5923_v19  ;;  %4134 = vmatprep.subr.bf16.mxu1 %v5926_v20  ;;  %v6014_v19 = vld [vmem:[%s8594_s1 + $0x7c4] ss:$16 sps:$4 sm:$0xff]   ;;  %v6017_v20 = vld [vmem:[%s8594_s1 + $0x7cc] ss:$16 sps:$4 sm:$0xff]  }
  0xbf   :  { %3766 = vmatpush1.bf16.msra.mxu0 %v5921_v21  ;;  %4135 = vmatpush1.bf16.msra.mxu1 %v5924_v22  ;;  %v7413_v21 = vld.sshfl [vmem:[%s8593_s0 + $0x8] sm:$0xff pattern:$0x75316420]  ;;  %v6012_v22 = vld [vmem:[%s8594_s1 + $0x7c0] ss:$16 sps:$4 sm:$0xff]  }
  0xc0   :  { %3776 = vmatprep.subr.bf16.mxu0 %v5930_v23  ;;  %4145 = vmatprep.subr.bf16.mxu1 %v5933_v24  ;;  %v6015_v23 = vld [vmem:[%s8594_s1 + $0x7c8] ss:$16 sps:$4 sm:$0xff]   ;;  %v6020_v24 = vld [vmem:[%s8594_s1 + $0x7e4] ss:$16 sps:$4 sm:$0xff]  }
  0xc2   :  { %3768 = vmatmul.mubr.bf16.vlgmr.msra.gmra.mrb[0].mxu0 %v7239_v26  ;;  %4137 = vmatmul.mubr.bf16.vlgmr.msra.gmra.mrb[0].mxu1 %v7239_v26 }
  0xc3   :  { %3777 = vmatpush1.bf16.msra.mxu0 %v5928_v13  ;;  %4146 = vmatpush1.bf16.msra.mxu1 %v5931_v27  ;;  %v6023_v13 = vld [vmem:[%s8594_s1 + $0x7ec] ss:$16 sps:$4 sm:$0xff]   ;;  %v6018_v27 = vld [vmem:[%s8594_s1 + $0x7e0] ss:$16 sps:$4 sm:$0xff]  }
  0xc4   :  { %3778 = vmatprep.subr.bf16.mxu0 %v5936_v28  ;;  %4147 = vmatprep.subr.bf16.mxu1 %v5939_v29  ;;  %v6021_v28 = vld [vmem:[%s8594_s1 + $0x7e8] ss:$16 sps:$4 sm:$0xff]   ;;  %v6026_v29 = vld [vmem:[%s8594_s1 + $0x804] ss:$16 sps:$4 sm:$0xff]  }
  0xc5   :  { %3808 = vmatprep.mubr.bf16.mxu0 %v683_v14  ;;  %4177 = vmatprep.mubr.bf16.mxu1 %v683_v14  ;;  %v6029_v14 = vld [vmem:[%s8594_s1 + $0x80c] ss:$16 sps:$4 sm:$0xff]  }
  0xc7   :  { %3779 = vmatpush1.bf16.msra.mxu0 %v5934_v30  ;;  %4148 = vmatpush1.bf16.msra.mxu1 %v5937_v31  ;;  %v699_v30 = vcombine.high %v7413_v21, %v7413_v21  ;;  %v681_v31 = vcombine.high %v7239_v26, %v7239_v26  ;;  %v6035_v26 = vld [vmem:[%s8594_s1 + $0x82c] ss:$16 sps:$4 sm:$0xff]  }
  0xc8   :  { %3780 = vmatprep.subr.bf16.mxu0 %v5942_v25  ;;  %4149 = vmatprep.subr.bf16.mxu1 %v5945_v32  ;;  %v6024_v25 = vld [vmem:[%s8594_s1 + $0x800] ss:$16 sps:$4 sm:$0xff]   ;;  %v6027_v32 = vld [vmem:[%s8594_s1 + $0x808] ss:$16 sps:$4 sm:$0xff]  }
  0xcb   :  { %3781 = vmatpush1.bf16.msra.mxu0 %v5940_v33  ;;  %4150 = vmatpush1.bf16.msra.mxu1 %v5943_v34  ;;  %v6032_v33 = vld [vmem:[%s8594_s1 + $0x824] ss:$16 sps:$4 sm:$0xff]   ;;  %v7456_v34 = vrot.slane %v699_v30, %v6755_v49 }
  0xcc   :  { %3782 = vmatprep.subr.bf16.mxu0 %v5948_v35  ;;  %4151 = vmatprep.subr.bf16.mxu1 %v5951_v36  ;;  %v6030_v35 = vld [vmem:[%s8594_s1 + $0x820] ss:$16 sps:$4 sm:$0xff]   ;;  %v6033_v36 = vld [vmem:[%s8594_s1 + $0x828] ss:$16 sps:$4 sm:$0xff]   ;;  %v6116_v30 = vld [vmem:[%s8594_s1 + $0x9e4] ss:$16 sps:$4 sm:$0xff]  }
  0xcf   :  { %3783 = vmatpush1.bf16.msra.mxu0 %v5946_v37  ;;  %4152 = vmatpush1.bf16.msra.mxu1 %v5949_v38  ;;  %v6038_v37 = vld [vmem:[%s8594_s1 + $0x844] ss:$16 sps:$4 sm:$0xff]   ;;  %v6041_v38 = vld [vmem:[%s8594_s1 + $0x84c] ss:$16 sps:$4 sm:$0xff]  }
  0xd0   :  { %3784 = vmatprep.subr.bf16.mxu0 %v5954_v39  ;;  %4153 = vmatprep.subr.bf16.mxu1 %v5957_v40  ;;  %v6036_v39 = vld [vmem:[%s8594_s1 + $0x840] ss:$16 sps:$4 sm:$0xff]   ;;  %v6039_v40 = vld [vmem:[%s8594_s1 + $0x848] ss:$16 sps:$4 sm:$0xff]  }
  0xd3   :  { %3785 = vmatpush1.bf16.msra.mxu0 %v5952_v41  ;;  %4154 = vmatpush1.bf16.msra.mxu1 %v5955_v43  ;;  %v6044_v41 = vld [vmem:[%s8594_s1 + $0x864] ss:$16 sps:$4 sm:$0xff]   ;;  %v6047_v43 = vld [vmem:[%s8594_s1 + $0x86c] ss:$16 sps:$4 sm:$0xff]  }
  0xd4   :  { %3786 = vmatprep.subr.bf16.mxu0 %v5960_v44  ;;  %4155 = vmatprep.subr.bf16.mxu1 %v5963_v45  ;;  %v6042_v44 = vld [vmem:[%s8594_s1 + $0x860] ss:$16 sps:$4 sm:$0xff]   ;;  %v6045_v45 = vld [vmem:[%s8594_s1 + $0x868] ss:$16 sps:$4 sm:$0xff]  }
  0xd7   :  { %3787 = vmatpush1.bf16.msra.mxu0 %v5958_v46  ;;  %4156 = vmatpush1.bf16.msra.mxu1 %v5961_v47  ;;  %v6050_v46 = vld [vmem:[%s8594_s1 + $0x884] ss:$16 sps:$4 sm:$0xff]   ;;  %v6053_v47 = vld [vmem:[%s8594_s1 + $0x88c] ss:$16 sps:$4 sm:$0xff]  }
  0xd8   :  { %3788 = vmatprep.subr.bf16.mxu0 %v5966_v48  ;;  %4157 = vmatprep.subr.bf16.mxu1 %v5969_v50  ;;  %v6048_v48 = vld [vmem:[%s8594_s1 + $0x880] ss:$16 sps:$4 sm:$0xff]   ;;  %v6051_v50 = vld [vmem:[%s8594_s1 + $0x888] ss:$16 sps:$4 sm:$0xff]  }
  0xdb   :  { %3789 = vmatpush1.bf16.msra.mxu0 %v5964_v51  ;;  %4158 = vmatpush1.bf16.msra.mxu1 %v5967_v53  ;;  %v6056_v51 = vld [vmem:[%s8594_s1 + $0x8a4] ss:$16 sps:$4 sm:$0xff]   ;;  %v6059_v53 = vld [vmem:[%s8594_s1 + $0x8ac] ss:$16 sps:$4 sm:$0xff]  }
  0xdc   :  { %3790 = vmatprep.subr.bf16.mxu0 %v5972_v54  ;;  %4159 = vmatprep.subr.bf16.mxu1 %v5975_v55  ;;  %v6054_v54 = vld [vmem:[%s8594_s1 + $0x8a0] ss:$16 sps:$4 sm:$0xff]   ;;  %v6057_v55 = vld [vmem:[%s8594_s1 + $0x8a8] ss:$16 sps:$4 sm:$0xff]  }
  0xdf   :  { %3791 = vmatpush1.bf16.msra.mxu0 %v5970_v56  ;;  %4160 = vmatpush1.bf16.msra.mxu1 %v5973_v57  ;;  %v6062_v56 = vld [vmem:[%s8594_s1 + $0x8c4] ss:$16 sps:$4 sm:$0xff]   ;;  %v6065_v57 = vld [vmem:[%s8594_s1 + $0x8cc] ss:$16 sps:$4 sm:$0xff]  }
  0xe0   :  { %3792 = vmatprep.subr.bf16.mxu0 %v5978_v58  ;;  %4161 = vmatprep.subr.bf16.mxu1 %v5981_v59  ;;  %v6060_v58 = vld [vmem:[%s8594_s1 + $0x8c0] ss:$16 sps:$4 sm:$0xff]   ;;  %v6063_v59 = vld [vmem:[%s8594_s1 + $0x8c8] ss:$16 sps:$4 sm:$0xff]  }
  0xe3   :  { %3793 = vmatpush1.bf16.msra.mxu0 %v5976_v60  ;;  %4162 = vmatpush1.bf16.msra.mxu1 %v5979_v61  ;;  %v6068_v60 = vld [vmem:[%s8594_s1 + $0x8e4] ss:$16 sps:$4 sm:$0xff]   ;;  %v6071_v61 = vld [vmem:[%s8594_s1 + $0x8ec] ss:$16 sps:$4 sm:$0xff]  }
  0xe4   :  { %3794 = vmatprep.subr.bf16.mxu0 %v5984_v62  ;;  %4163 = vmatprep.subr.bf16.mxu1 %v5987_v63  ;;  %v6066_v62 = vld [vmem:[%s8594_s1 + $0x8e0] ss:$16 sps:$4 sm:$0xff]   ;;  %v6069_v63 = vld [vmem:[%s8594_s1 + $0x8e8] ss:$16 sps:$4 sm:$0xff]  }
  0xe7   :  { %3795 = vmatpush1.bf16.msra.mxu0 %v5982_v0  ;;  %4164 = vmatpush1.bf16.msra.mxu1 %v5985_v1  ;;  %v6074_v0 = vld [vmem:[%s8594_s1 + $0x904] ss:$16 sps:$4 sm:$0xff]   ;;  %v6077_v1 = vld [vmem:[%s8594_s1 + $0x90c] ss:$16 sps:$4 sm:$0xff]  }
  0xe8   :  { %3796 = vmatprep.subr.bf16.mxu0 %v5990_v2  ;;  %4165 = vmatprep.subr.bf16.mxu1 %v5993_v3  ;;  %v6072_v2 = vld [vmem:[%s8594_s1 + $0x900] ss:$16 sps:$4 sm:$0xff]   ;;  %v6075_v3 = vld [vmem:[%s8594_s1 + $0x908] ss:$16 sps:$4 sm:$0xff]  }
  0xeb   :  { %3797 = vmatpush1.bf16.msra.mxu0 %v5988_v4  ;;  %4166 = vmatpush1.bf16.msra.mxu1 %v5991_v5  ;;  %v6080_v4 = vld [vmem:[%s8594_s1 + $0x924] ss:$16 sps:$4 sm:$0xff]   ;;  %v6083_v5 = vld [vmem:[%s8594_s1 + $0x92c] ss:$16 sps:$4 sm:$0xff]  }
  0xec   :  { %3798 = vmatprep.subr.bf16.mxu0 %v5996_v6  ;;  %4167 = vmatprep.subr.bf16.mxu1 %v5999_v7  ;;  %v6078_v6 = vld [vmem:[%s8594_s1 + $0x920] ss:$16 sps:$4 sm:$0xff]   ;;  %v6081_v7 = vld [vmem:[%s8594_s1 + $0x928] ss:$16 sps:$4 sm:$0xff]  }
  0xef   :  { %3799 = vmatpush1.bf16.msra.mxu0 %v5994_v8  ;;  %4168 = vmatpush1.bf16.msra.mxu1 %v5997_v9  ;;  %v6086_v8 = vld [vmem:[%s8594_s1 + $0x944] ss:$16 sps:$4 sm:$0xff]   ;;  %v6089_v9 = vld [vmem:[%s8594_s1 + $0x94c] ss:$16 sps:$4 sm:$0xff]  }
  0xf0   :  { %3800 = vmatprep.subr.bf16.mxu0 %v6002_v10  ;;  %4169 = vmatprep.subr.bf16.mxu1 %v6005_v11  ;;  %v6084_v10 = vld [vmem:[%s8594_s1 + $0x940] ss:$16 sps:$4 sm:$0xff]   ;;  %v6087_v11 = vld [vmem:[%s8594_s1 + $0x948] ss:$16 sps:$4 sm:$0xff]  }
  0xf3   :  { %3801 = vmatpush1.bf16.msra.mxu0 %v6000_v12  ;;  %4170 = vmatpush1.bf16.msra.mxu1 %v6003_v52  ;;  %v6092_v12 = vld [vmem:[%s8594_s1 + $0x964] ss:$16 sps:$4 sm:$0xff]   ;;  %v6095_v52 = vld [vmem:[%s8594_s1 + $0x96c] ss:$16 sps:$4 sm:$0xff]  }
  0xf4   :  { %3802 = vmatprep.subr.bf16.mxu0 %v6008_v15  ;;  %4171 = vmatprep.subr.bf16.mxu1 %v6011_v16  ;;  %v6090_v15 = vld [vmem:[%s8594_s1 + $0x960] ss:$16 sps:$4 sm:$0xff]   ;;  %v6093_v16 = vld [vmem:[%s8594_s1 + $0x968] ss:$16 sps:$4 sm:$0xff]  }
  0xf7   :  { %3803 = vmatpush1.bf16.msra.mxu0 %v6006_v17  ;;  %4172 = vmatpush1.bf16.msra.mxu1 %v6009_v18  ;;  %v6098_v17 = vld [vmem:[%s8594_s1 + $0x984] ss:$16 sps:$4 sm:$0xff]   ;;  %v6101_v18 = vld [vmem:[%s8594_s1 + $0x98c] ss:$16 sps:$4 sm:$0xff]  }
  0xf8   :  { %3804 = vmatprep.subr.bf16.mxu0 %v6014_v19  ;;  %4173 = vmatprep.subr.bf16.mxu1 %v6017_v20  ;;  %v6096_v19 = vld [vmem:[%s8594_s1 + $0x980] ss:$16 sps:$4 sm:$0xff]   ;;  %v6099_v20 = vld [vmem:[%s8594_s1 + $0x988] ss:$16 sps:$4 sm:$0xff]  }
  0xfb   :  { %3805 = vmatpush1.bf16.msra.mxu0 %v6012_v22  ;;  %4174 = vmatpush1.bf16.msra.mxu1 %v6015_v23  ;;  %v6104_v22 = vld [vmem:[%s8594_s1 + $0x9a4] ss:$16 sps:$4 sm:$0xff]   ;;  %v6107_v23 = vld [vmem:[%s8594_s1 + $0x9ac] ss:$16 sps:$4 sm:$0xff]  }
  0xfc   :  { %3806 = vmatprep.subr.bf16.mxu0 %v6020_v24  ;;  %4175 = vmatprep.subr.bf16.mxu1 %v6023_v13  ;;  %v6102_v24 = vld [vmem:[%s8594_s1 + $0x9a0] ss:$16 sps:$4 sm:$0xff]   ;;  %v6105_v13 = vld [vmem:[%s8594_s1 + $0x9a8] ss:$16 sps:$4 sm:$0xff]  }
  0xff   :  { %3807 = vmatpush1.bf16.msra.mxu0 %v6018_v27  ;;  %4176 = vmatpush1.bf16.msra.mxu1 %v6021_v28  ;;  %v6110_v27 = vld [vmem:[%s8594_s1 + $0x9c4] ss:$16 sps:$4 sm:$0xff]   ;;  %v6113_v28 = vld [vmem:[%s8594_s1 + $0x9cc] ss:$16 sps:$4 sm:$0xff]  }
 0x100   :  { %3817 = vmatprep.subr.bf16.mxu0 %v6026_v29  ;;  %4186 = vmatprep.subr.bf16.mxu1 %v6029_v14  ;;  %v6108_v29 = vld [vmem:[%s8594_s1 + $0x9c0] ss:$16 sps:$4 sm:$0xff]   ;;  %v6111_v14 = vld [vmem:[%s8594_s1 + $0x9c8] ss:$16 sps:$4 sm:$0xff]  }
 0x102   :  { %3809 = vmatmul.mubr.bf16.vlgmr.msra.gmra.mrb[0].mxu0 %v681_v31  ;;  %4178 = vmatmul.mubr.bf16.vlgmr.msra.gmra.mrb[0].mxu1 %v681_v31  ;;  %v6119_v31 = vld [vmem:[%s8594_s1 + $0x9ec] ss:$16 sps:$4 sm:$0xff]  }
 0x103   :  { %3818 = vmatpush1.bf16.msra.mxu0 %v6024_v25  ;;  %4187 = vmatpush1.bf16.msra.mxu1 %v6027_v32  ;;  %v6114_v25 = vld [vmem:[%s8594_s1 + $0x9e0] ss:$16 sps:$4 sm:$0xff]   ;;  %v6117_v32 = vld [vmem:[%s8594_s1 + $0x9e8] ss:$16 sps:$4 sm:$0xff]  }
 0x104   :  { %3819 = vmatprep.subr.bf16.mxu0 %v6032_v33  ;;  %4188 = vmatprep.subr.bf16.mxu1 %v6035_v26  ;;  %v6122_v33 = vld [vmem:[%s8594_s1 + $0xa04] ss:$16 sps:$4 sm:$0xff]   ;;  %v6125_v26 = vld [vmem:[%s8594_s1 + $0xa0c] ss:$16 sps:$4 sm:$0xff]  }
 0x105   :  { %3849 = vmatprep.mubr.bf16.mxu0 %v7456_v34  ;;  %4218 = vmatprep.mubr.bf16.mxu1 %v7456_v34 }
 0x107   :  { %3820 = vmatpush1.bf16.msra.mxu0 %v6030_v35  ;;  %4189 = vmatpush1.bf16.msra.mxu1 %v6033_v36  ;;  %v7642_v35 = vrot.slane %v7413_v21, %v6755_v49  ;;  %v6120_v36 = vld [vmem:[%s8594_s1 + $0xa00] ss:$16 sps:$4 sm:$0xff]   ;;  %v6131_v21 = vld [vmem:[%s8594_s1 + $0xa2c] ss:$16 sps:$4 sm:$0xff]  }
 0x108   :  { %3821 = vmatprep.subr.bf16.mxu0 %v6038_v37  ;;  %4190 = vmatprep.subr.bf16.mxu1 %v6041_v38  ;;  %v6123_v37 = vld [vmem:[%s8594_s1 + $0xa08] ss:$16 sps:$4 sm:$0xff]   ;;  %v6128_v38 = vld [vmem:[%s8594_s1 + $0xa24] ss:$16 sps:$4 sm:$0xff]  }
 0x10b   :  { %3822 = vmatpush1.bf16.msra.mxu0 %v6036_v39  ;;  %4191 = vmatpush1.bf16.msra.mxu1 %v6039_v40  ;;  %v731_v39 = vcombine.high %v7456_v34, %v7456_v34  ;;  %v6126_v40 = vld [vmem:[%s8594_s1 + $0xa20] ss:$16 sps:$4 sm:$0xff]   ;;  %v6134_v34 = vld [vmem:[%s8594_s1 + $0xa44] ss:$16 sps:$4 sm:$0xff]  }
 0x10c   :  { %3823 = vmatprep.subr.bf16.mxu0 %v6044_v41  ;;  %4192 = vmatprep.subr.bf16.mxu1 %v6047_v43  ;;  %v6129_v41 = vld [vmem:[%s8594_s1 + $0xa28] ss:$16 sps:$4 sm:$0xff]   ;;  %v6137_v43 = vld [vmem:[%s8594_s1 + $0xa4c] ss:$16 sps:$4 sm:$0xff]  }
 0x10f   :  { %3824 = vmatpush1.bf16.msra.mxu0 %v6042_v44  ;;  %4193 = vmatpush1.bf16.msra.mxu1 %v6045_v45  ;;  %v6132_v44 = vld [vmem:[%s8594_s1 + $0xa40] ss:$16 sps:$4 sm:$0xff]   ;;  %v6135_v45 = vld [vmem:[%s8594_s1 + $0xa48] ss:$16 sps:$4 sm:$0xff]  }
 0x110   :  { %3825 = vmatprep.subr.bf16.mxu0 %v6050_v46  ;;  %4194 = vmatprep.subr.bf16.mxu1 %v6053_v47  ;;  %v6140_v46 = vld [vmem:[%s8594_s1 + $0xa64] ss:$16 sps:$4 sm:$0xff]   ;;  %v6143_v47 = vld [vmem:[%s8594_s1 + $0xa6c] ss:$16 sps:$4 sm:$0xff]  }
 0x113   :  { %3826 = vmatpush1.bf16.msra.mxu0 %v6048_v48  ;;  %4195 = vmatpush1.bf16.msra.mxu1 %v6051_v50  ;;  %v6138_v48 = vld [vmem:[%s8594_s1 + $0xa60] ss:$16 sps:$4 sm:$0xff]   ;;  %v6141_v50 = vld [vmem:[%s8594_s1 + $0xa68] ss:$16 sps:$4 sm:$0xff]  }
 0x114   :  { %3827 = vmatprep.subr.bf16.mxu0 %v6056_v51  ;;  %4196 = vmatprep.subr.bf16.mxu1 %v6059_v53  ;;  %v6146_v51 = vld [vmem:[%s8594_s1 + $0xa84] ss:$16 sps:$4 sm:$0xff]   ;;  %v6149_v53 = vld [vmem:[%s8594_s1 + $0xa8c] ss:$16 sps:$4 sm:$0xff]  }
 0x117   :  { %3828 = vmatpush1.bf16.msra.mxu0 %v6054_v54  ;;  %4197 = vmatpush1.bf16.msra.mxu1 %v6057_v55  ;;  %v6144_v54 = vld [vmem:[%s8594_s1 + $0xa80] ss:$16 sps:$4 sm:$0xff]   ;;  %v6147_v55 = vld [vmem:[%s8594_s1 + $0xa88] ss:$16 sps:$4 sm:$0xff]  }
 0x118   :  { %3829 = vmatprep.subr.bf16.mxu0 %v6062_v56  ;;  %4198 = vmatprep.subr.bf16.mxu1 %v6065_v57  ;;  %v6152_v56 = vld [vmem:[%s8594_s1 + $0xaa4] ss:$16 sps:$4 sm:$0xff]   ;;  %v6155_v57 = vld [vmem:[%s8594_s1 + $0xaac] ss:$16 sps:$4 sm:$0xff]  }
 0x11b   :  { %3830 = vmatpush1.bf16.msra.mxu0 %v6060_v58  ;;  %4199 = vmatpush1.bf16.msra.mxu1 %v6063_v59  ;;  %v6150_v58 = vld [vmem:[%s8594_s1 + $0xaa0] ss:$16 sps:$4 sm:$0xff]   ;;  %v6153_v59 = vld [vmem:[%s8594_s1 + $0xaa8] ss:$16 sps:$4 sm:$0xff]  }
 0x11c   :  { %3831 = vmatprep.subr.bf16.mxu0 %v6068_v60  ;;  %4200 = vmatprep.subr.bf16.mxu1 %v6071_v61  ;;  %v6158_v60 = vld [vmem:[%s8594_s1 + $0xac4] ss:$16 sps:$4 sm:$0xff]   ;;  %v6161_v61 = vld [vmem:[%s8594_s1 + $0xacc] ss:$16 sps:$4 sm:$0xff]  }
 0x11f   :  { %3832 = vmatpush1.bf16.msra.mxu0 %v6066_v62  ;;  %4201 = vmatpush1.bf16.msra.mxu1 %v6069_v63  ;;  %v6156_v62 = vld [vmem:[%s8594_s1 + $0xac0] ss:$16 sps:$4 sm:$0xff]   ;;  %v6159_v63 = vld [vmem:[%s8594_s1 + $0xac8] ss:$16 sps:$4 sm:$0xff]  }
 0x120   :  { %3833 = vmatprep.subr.bf16.mxu0 %v6074_v0  ;;  %4202 = vmatprep.subr.bf16.mxu1 %v6077_v1  ;;  %v6164_v0 = vld [vmem:[%s8594_s1 + $0xae4] ss:$16 sps:$4 sm:$0xff]   ;;  %v6167_v1 = vld [vmem:[%s8594_s1 + $0xaec] ss:$16 sps:$4 sm:$0xff]  }
 0x123   :  { %3834 = vmatpush1.bf16.msra.mxu0 %v6072_v2  ;;  %4203 = vmatpush1.bf16.msra.mxu1 %v6075_v3  ;;  %v6162_v2 = vld [vmem:[%s8594_s1 + $0xae0] ss:$16 sps:$4 sm:$0xff]   ;;  %v6165_v3 = vld [vmem:[%s8594_s1 + $0xae8] ss:$16 sps:$4 sm:$0xff]  }
 0x124   :  { %3835 = vmatprep.subr.bf16.mxu0 %v6080_v4  ;;  %4204 = vmatprep.subr.bf16.mxu1 %v6083_v5  ;;  %v6170_v4 = vld [vmem:[%s8594_s1 + $0xb04] ss:$16 sps:$4 sm:$0xff]   ;;  %v6173_v5 = vld [vmem:[%s8594_s1 + $0xb0c] ss:$16 sps:$4 sm:$0xff]  }
 0x127   :  { %3836 = vmatpush1.bf16.msra.mxu0 %v6078_v6  ;;  %4205 = vmatpush1.bf16.msra.mxu1 %v6081_v7  ;;  %v6168_v6 = vld [vmem:[%s8594_s1 + $0xb00] ss:$16 sps:$4 sm:$0xff]   ;;  %v6171_v7 = vld [vmem:[%s8594_s1 + $0xb08] ss:$16 sps:$4 sm:$0xff]  }
 0x128   :  { %3837 = vmatprep.subr.bf16.mxu0 %v6086_v8  ;;  %4206 = vmatprep.subr.bf16.mxu1 %v6089_v9  ;;  %v6176_v8 = vld [vmem:[%s8594_s1 + $0xb24] ss:$16 sps:$4 sm:$0xff]   ;;  %v6179_v9 = vld [vmem:[%s8594_s1 + $0xb2c] ss:$16 sps:$4 sm:$0xff]  }
 0x12b   :  { %3838 = vmatpush1.bf16.msra.mxu0 %v6084_v10  ;;  %4207 = vmatpush1.bf16.msra.mxu1 %v6087_v11  ;;  %v6174_v10 = vld [vmem:[%s8594_s1 + $0xb20] ss:$16 sps:$4 sm:$0xff]   ;;  %v6177_v11 = vld [vmem:[%s8594_s1 + $0xb28] ss:$16 sps:$4 sm:$0xff]  }
 0x12c   :  { %3839 = vmatprep.subr.bf16.mxu0 %v6092_v12  ;;  %4208 = vmatprep.subr.bf16.mxu1 %v6095_v52  ;;  %v6182_v12 = vld [vmem:[%s8594_s1 + $0xb44] ss:$16 sps:$4 sm:$0xff]   ;;  %v6185_v52 = vld [vmem:[%s8594_s1 + $0xb4c] ss:$16 sps:$4 sm:$0xff]  }
 0x12f   :  { %3840 = vmatpush1.bf16.msra.mxu0 %v6090_v15  ;;  %4209 = vmatpush1.bf16.msra.mxu1 %v6093_v16  ;;  %v6180_v15 = vld [vmem:[%s8594_s1 + $0xb40] ss:$16 sps:$4 sm:$0xff]   ;;  %v6183_v16 = vld [vmem:[%s8594_s1 + $0xb48] ss:$16 sps:$4 sm:$0xff]  }
 0x130   :  { %3841 = vmatprep.subr.bf16.mxu0 %v6098_v17  ;;  %4210 = vmatprep.subr.bf16.mxu1 %v6101_v18  ;;  %v6188_v17 = vld [vmem:[%s8594_s1 + $0xb64] ss:$16 sps:$4 sm:$0xff]   ;;  %v6191_v18 = vld [vmem:[%s8594_s1 + $0xb6c] ss:$16 sps:$4 sm:$0xff]  }
 0x133   :  { %3842 = vmatpush1.bf16.msra.mxu0 %v6096_v19  ;;  %4211 = vmatpush1.bf16.msra.mxu1 %v6099_v20  ;;  %v6186_v19 = vld [vmem:[%s8594_s1 + $0xb60] ss:$16 sps:$4 sm:$0xff]   ;;  %v6189_v20 = vld [vmem:[%s8594_s1 + $0xb68] ss:$16 sps:$4 sm:$0xff]  }
 0x134   :  { %3843 = vmatprep.subr.bf16.mxu0 %v6104_v22  ;;  %4212 = vmatprep.subr.bf16.mxu1 %v6107_v23  ;;  %v6194_v22 = vld [vmem:[%s8594_s1 + $0xb84] ss:$16 sps:$4 sm:$0xff]   ;;  %v6197_v23 = vld [vmem:[%s8594_s1 + $0xb8c] ss:$16 sps:$4 sm:$0xff]  }
 0x137   :  { %3844 = vmatpush1.bf16.msra.mxu0 %v6102_v24  ;;  %4213 = vmatpush1.bf16.msra.mxu1 %v6105_v13  ;;  %v6192_v24 = vld [vmem:[%s8594_s1 + $0xb80] ss:$16 sps:$4 sm:$0xff]   ;;  %v6195_v13 = vld [vmem:[%s8594_s1 + $0xb88] ss:$16 sps:$4 sm:$0xff]  }
 0x138   :  { %3845 = vmatprep.subr.bf16.mxu0 %v6110_v27  ;;  %4214 = vmatprep.subr.bf16.mxu1 %v6113_v28  ;;  %v6200_v27 = vld [vmem:[%s8594_s1 + $0xba4] ss:$16 sps:$4 sm:$0xff]   ;;  %v6203_v28 = vld [vmem:[%s8594_s1 + $0xbac] ss:$16 sps:$4 sm:$0xff]  }
 0x13b   :  { %3846 = vmatpush1.bf16.msra.mxu0 %v6108_v29  ;;  %4215 = vmatpush1.bf16.msra.mxu1 %v6111_v14  ;;  %v6198_v29 = vld [vmem:[%s8594_s1 + $0xba0] ss:$16 sps:$4 sm:$0xff]   ;;  %v6201_v14 = vld [vmem:[%s8594_s1 + $0xba8] ss:$16 sps:$4 sm:$0xff]  }
 0x13c   :  { %3847 = vmatprep.subr.bf16.mxu0 %v6116_v30  ;;  %4216 = vmatprep.subr.bf16.mxu1 %v6119_v31  ;;  %v6206_v30 = vld [vmem:[%s8594_s1 + $0xbc4] ss:$16 sps:$4 sm:$0xff]   ;;  %v6209_v31 = vld [vmem:[%s8594_s1 + $0xbcc] ss:$16 sps:$4 sm:$0xff]  }
 0x13f   :  { %3848 = vmatpush1.bf16.msra.mxu0 %v6114_v25  ;;  %4217 = vmatpush1.bf16.msra.mxu1 %v6117_v32  ;;  %v6545_v25 = vld [vmem:[%s8593_s0 + $0x8] sm:$0xff] }
 0x140   :  { %3858 = vmatprep.subr.bf16.mxu0 %v6122_v33  ;;  %4227 = vmatprep.subr.bf16.mxu1 %v6125_v26  ;;  %v684_v32 = vcombine.high %v6545_v25, %v6545_v25  ;;  %v6204_v33 = vld [vmem:[%s8594_s1 + $0xbc0] ss:$16 sps:$4 sm:$0xff]   ;;  %v6207_v26 = vld [vmem:[%s8594_s1 + $0xbc8] ss:$16 sps:$4 sm:$0xff]  }
 0x142   :  { %3850 = vmatmul.mubr.bf16.vlgmr.msra.gmra.mrb[0].mxu0 %v7642_v35  ;;  %4219 = vmatmul.mubr.bf16.vlgmr.msra.gmra.mrb[0].mxu1 %v7642_v35 }
 0x143   :  { %3859 = vmatpush1.bf16.msra.mxu0 %v6120_v36  ;;  %4228 = vmatpush1.bf16.msra.mxu1 %v6123_v37  ;;  %v6212_v36 = vld [vmem:[%s8594_s1 + $0xbe4] ss:$16 sps:$4 sm:$0xff]   ;;  %v6215_v37 = vld [vmem:[%s8594_s1 + $0xbec] ss:$16 sps:$4 sm:$0xff]  }
 0x144   :  { %3860 = vmatprep.subr.bf16.mxu0 %v6128_v38  ;;  %4229 = vmatprep.subr.bf16.mxu1 %v6131_v21  ;;  %v7832_v38 = vrot.slane %v684_v32, %v6755_v49  ;;  %v6210_v21 = vld [vmem:[%s8594_s1 + $0xbe0] ss:$16 sps:$4 sm:$0xff]  }
 0x145   :  { %3890 = vmatprep.mubr.bf16.mxu0 %v731_v39  ;;  %4259 = vmatprep.mubr.bf16.mxu1 %v731_v39  ;;  %v6213_v39 = vld [vmem:[%s8594_s1 + $0xbe8] ss:$16 sps:$4 sm:$0xff]  }
 0x147   :  { %3861 = vmatpush1.bf16.msra.mxu0 %v6126_v40  ;;  %4230 = vmatpush1.bf16.msra.mxu1 %v6129_v41  ;;  %v6218_v40 = vld [vmem:[%s8594_s1 + $0xc04] ss:$16 sps:$4 sm:$0xff]   ;;  %v6221_v41 = vld [vmem:[%s8594_s1 + $0xc0c] ss:$16 sps:$4 sm:$0xff]  }
 0x148   :  { %3862 = vmatprep.subr.bf16.mxu0 %v6134_v34  ;;  %4231 = vmatprep.subr.bf16.mxu1 %v6137_v43  ;;  %v700_v34 = vcombine.high %v7832_v38, %v7832_v38  ;;  %v729_v43 = vcombine.high %v7642_v35, %v7642_v35  ;;  %v6227_v35 = vld [vmem:[%s8594_s1 + $0xc2c] ss:$16 sps:$4 sm:$0xff]  }
 0x14b   :  { %3863 = vmatpush1.bf16.msra.mxu0 %v6132_v44  ;;  %4232 = vmatpush1.bf16.msra.mxu1 %v6135_v45  ;;  %v6216_v44 = vld [vmem:[%s8594_s1 + $0xc00] ss:$16 sps:$4 sm:$0xff]   ;;  %v6219_v45 = vld [vmem:[%s8594_s1 + $0xc08] ss:$16 sps:$4 sm:$0xff]  }
 0x14c   :  { %3864 = vmatprep.subr.bf16.mxu0 %v6140_v46  ;;  %4233 = vmatprep.subr.bf16.mxu1 %v6143_v47  ;;  %v6224_v46 = vld [vmem:[%s8594_s1 + $0xc24] ss:$16 sps:$4 sm:$0xff]   ;;  %v7863_v47 = vrot.slane %v700_v34, %v6755_v49 }
 0x14f   :  { %3865 = vmatpush1.bf16.msra.mxu0 %v6138_v48  ;;  %4234 = vmatpush1.bf16.msra.mxu1 %v6141_v50  ;;  %v6222_v48 = vld [vmem:[%s8594_s1 + $0xc20] ss:$16 sps:$4 sm:$0xff]   ;;  %v6225_v50 = vld [vmem:[%s8594_s1 + $0xc28] ss:$16 sps:$4 sm:$0xff]  }
 0x150   :  { %3866 = vmatprep.subr.bf16.mxu0 %v6146_v51  ;;  %4235 = vmatprep.subr.bf16.mxu1 %v6149_v53  ;;  %v6230_v51 = vld [vmem:[%s8594_s1 + $0xc44] ss:$16 sps:$4 sm:$0xff]   ;;  %v6233_v53 = vld [vmem:[%s8594_s1 + $0xc4c] ss:$16 sps:$4 sm:$0xff]  }
 0x153   :  { %3867 = vmatpush1.bf16.msra.mxu0 %v6144_v54  ;;  %4236 = vmatpush1.bf16.msra.mxu1 %v6147_v55  ;;  %v6228_v54 = vld [vmem:[%s8594_s1 + $0xc40] ss:$16 sps:$4 sm:$0xff]   ;;  %v6231_v55 = vld [vmem:[%s8594_s1 + $0xc48] ss:$16 sps:$4 sm:$0xff]  }
 0x154   :  { %3868 = vmatprep.subr.bf16.mxu0 %v6152_v56  ;;  %4237 = vmatprep.subr.bf16.mxu1 %v6155_v57  ;;  %v6236_v56 = vld [vmem:[%s8594_s1 + $0xc64] ss:$16 sps:$4 sm:$0xff]   ;;  %v6239_v57 = vld [vmem:[%s8594_s1 + $0xc6c] ss:$16 sps:$4 sm:$0xff]  }
 0x157   :  { %3869 = vmatpush1.bf16.msra.mxu0 %v6150_v58  ;;  %4238 = vmatpush1.bf16.msra.mxu1 %v6153_v59 }
 0x158   :  { %3870 = vmatprep.subr.bf16.mxu0 %v6158_v60  ;;  %4239 = vmatprep.subr.bf16.mxu1 %v6161_v61 }
 0x15b   :  { %3871 = vmatpush1.bf16.msra.mxu0 %v6156_v62  ;;  %4240 = vmatpush1.bf16.msra.mxu1 %v6159_v63 }
 0x15c   :  { %3872 = vmatprep.subr.bf16.mxu0 %v6164_v0  ;;  %4241 = vmatprep.subr.bf16.mxu1 %v6167_v1 }
 0x15f   :  { %3873 = vmatpush1.bf16.msra.mxu0 %v6162_v2  ;;  %4242 = vmatpush1.bf16.msra.mxu1 %v6165_v3 }
 0x160   :  { %3874 = vmatprep.subr.bf16.mxu0 %v6170_v4  ;;  %4243 = vmatprep.subr.bf16.mxu1 %v6173_v5 }
 0x163   :  { %3875 = vmatpush1.bf16.msra.mxu0 %v6168_v6  ;;  %4244 = vmatpush1.bf16.msra.mxu1 %v6171_v7 }
 0x164   :  { %3876 = vmatprep.subr.bf16.mxu0 %v6176_v8  ;;  %4245 = vmatprep.subr.bf16.mxu1 %v6179_v9 }
 0x167   :  { %3877 = vmatpush1.bf16.msra.mxu0 %v6174_v10  ;;  %4246 = vmatpush1.bf16.msra.mxu1 %v6177_v11 }
 0x168   :  { %3878 = vmatprep.subr.bf16.mxu0 %v6182_v12  ;;  %4247 = vmatprep.subr.bf16.mxu1 %v6185_v52 }
 0x16b   :  { %3879 = vmatpush1.bf16.msra.mxu0 %v6180_v15  ;;  %4248 = vmatpush1.bf16.msra.mxu1 %v6183_v16 }
 0x16c   :  { %3880 = vmatprep.subr.bf16.mxu0 %v6188_v17  ;;  %4249 = vmatprep.subr.bf16.mxu1 %v6191_v18 }
 0x16f   :  { %3881 = vmatpush1.bf16.msra.mxu0 %v6186_v19  ;;  %4250 = vmatpush1.bf16.msra.mxu1 %v6189_v20 }
 0x170   :  { %3882 = vmatprep.subr.bf16.mxu0 %v6194_v22  ;;  %4251 = vmatprep.subr.bf16.mxu1 %v6197_v23 }
 0x173   :  { %3883 = vmatpush1.bf16.msra.mxu0 %v6192_v24  ;;  %4252 = vmatpush1.bf16.msra.mxu1 %v6195_v13 }
 0x174   :  { %3884 = vmatprep.subr.bf16.mxu0 %v6200_v27  ;;  %4253 = vmatprep.subr.bf16.mxu1 %v6203_v28 }
 0x177   :  { %3885 = vmatpush1.bf16.msra.mxu0 %v6198_v29  ;;  %4254 = vmatpush1.bf16.msra.mxu1 %v6201_v14 }
 0x178   :  { %3886 = vmatprep.subr.bf16.mxu0 %v6206_v30  ;;  %4255 = vmatprep.subr.bf16.mxu1 %v6209_v31 }
 0x17b   :  { %3887 = vmatpush1.bf16.msra.mxu0 %v6204_v33  ;;  %4256 = vmatpush1.bf16.msra.mxu1 %v6207_v26 }
 0x17c   :  { %3888 = vmatprep.subr.bf16.mxu0 %v6212_v36  ;;  %4257 = vmatprep.subr.bf16.mxu1 %v6215_v37 }
 0x17f   :  { %3889 = vmatpush1.bf16.msra.mxu0 %v6210_v21  ;;  %4258 = vmatpush1.bf16.msra.mxu1 %v6213_v39 }
 0x180   :  { %3899 = vmatprep.subr.bf16.mxu0 %v6218_v40  ;;  %4268 = vmatprep.subr.bf16.mxu1 %v6221_v41 }
 0x182   :  { %3891 = vmatmul.mubr.bf16.vlgmr.msra.gmra.mrb[0].mxu0 %v729_v43  ;;  %4260 = vmatmul.mubr.bf16.vlgmr.msra.gmra.mrb[0].mxu1 %v729_v43 }
 0x183   :  { %3900 = vmatpush1.bf16.msra.mxu0 %v6216_v44  ;;  %4269 = vmatpush1.bf16.msra.mxu1 %v6219_v45 }
 0x184   :  { %3901 = vmatprep.subr.bf16.mxu0 %v6224_v46  ;;  %4270 = vmatprep.subr.bf16.mxu1 %v6227_v35 }
 0x185   :  { %3931 = vmatprep.mubr.bf16.mxu0 %v7863_v47  ;;  %4300 = vmatprep.mubr.bf16.mxu1 %v7863_v47 }
 0x187   :  { %3902 = vmatpush1.bf16.msra.mxu0 %v6222_v48  ;;  %4271 = vmatpush1.bf16.msra.mxu1 %v6225_v50 }
 0x188   :  { %3903 = vmatprep.subr.bf16.mxu0 %v6230_v51  ;;  %4272 = vmatprep.subr.bf16.mxu1 %v6233_v53 }
 0x189   :  { %13 = vsyncpa [#allocation3], 0  ;;  %v6234_v58 = vld [vmem:[%s8594_s1 + $0xc60] ss:$16 sps:$4 sm:$0xff]   ;;  %v6237_v59 = vld [vmem:[%s8594_s1 + $0xc68] ss:$16 sps:$4 sm:$0xff]   ;;  %v8049_v48 = vrot.slane %v7832_v38, %v6755_v49 }
 0x18a   :  { %v6242_v60 = vld [vmem:[%s8594_s1 + $0xc84] ss:$16 sps:$4 sm:$0xff]   ;;  %v6245_v61 = vld [vmem:[%s8594_s1 + $0xc8c] ss:$16 sps:$4 sm:$0xff]   ;;  %v6240_v62 = vld [vmem:[%s8594_s1 + $0xc80] ss:$16 sps:$4 sm:$0xff]  }
 0x18b   :  { %3904 = vmatpush1.bf16.msra.mxu0 %v6228_v54  ;;  %4273 = vmatpush1.bf16.msra.mxu1 %v6231_v55  ;;  %v6243_v63 = vld [vmem:[%s8594_s1 + $0xc88] ss:$16 sps:$4 sm:$0xff]   ;;  %v6248_v0 = vld [vmem:[%s8594_s1 + $0xca4] ss:$16 sps:$4 sm:$0xff]   ;;  %v6251_v1 = vld [vmem:[%s8594_s1 + $0xcac] ss:$16 sps:$4 sm:$0xff]   ;;  %v732_v54 = vcombine.high %v7863_v47, %v7863_v47 }
 0x18c   :  { %3905 = vmatprep.subr.bf16.mxu0 %v6236_v56  ;;  %4274 = vmatprep.subr.bf16.mxu1 %v6239_v57  ;;  %v6246_v2 = vld [vmem:[%s8594_s1 + $0xca0] ss:$16 sps:$4 sm:$0xff]   ;;  %v6249_v3 = vld [vmem:[%s8594_s1 + $0xca8] ss:$16 sps:$4 sm:$0xff]   ;;  %v6254_v4 = vld [vmem:[%s8594_s1 + $0xcc4] ss:$16 sps:$4 sm:$0xff]  }
 0x18d   :  { %v6257_v5 = vld [vmem:[%s8594_s1 + $0xccc] ss:$16 sps:$4 sm:$0xff]   ;;  %v6252_v6 = vld [vmem:[%s8594_s1 + $0xcc0] ss:$16 sps:$4 sm:$0xff]   ;;  %v6255_v7 = vld [vmem:[%s8594_s1 + $0xcc8] ss:$16 sps:$4 sm:$0xff]  }
 0x18e   :  { %v6260_v8 = vld [vmem:[%s8594_s1 + $0xce4] ss:$16 sps:$4 sm:$0xff]   ;;  %v6263_v9 = vld [vmem:[%s8594_s1 + $0xcec] ss:$16 sps:$4 sm:$0xff]   ;;  %v6258_v10 = vld [vmem:[%s8594_s1 + $0xce0] ss:$16 sps:$4 sm:$0xff]  }
 0x18f   :  { %3906 = vmatpush1.bf16.msra.mxu0 %v6234_v58  ;;  %4275 = vmatpush1.bf16.msra.mxu1 %v6237_v59  ;;  %v6261_v11 = vld [vmem:[%s8594_s1 + $0xce8] ss:$16 sps:$4 sm:$0xff]   ;;  %v6266_v12 = vld [vmem:[%s8594_s1 + $0xd04] ss:$16 sps:$4 sm:$0xff]   ;;  %v6269_v52 = vld [vmem:[%s8594_s1 + $0xd0c] ss:$16 sps:$4 sm:$0xff]  }
 0x190   :  { %3907 = vmatprep.subr.bf16.mxu0 %v6242_v60  ;;  %4276 = vmatprep.subr.bf16.mxu1 %v6245_v61  ;;  %v6264_v15 = vld [vmem:[%s8594_s1 + $0xd00] ss:$16 sps:$4 sm:$0xff]   ;;  %v6267_v16 = vld [vmem:[%s8594_s1 + $0xd08] ss:$16 sps:$4 sm:$0xff]   ;;  %v6272_v17 = vld [vmem:[%s8594_s1 + $0xd24] ss:$16 sps:$4 sm:$0xff]  }
 0x191   :  { %v6275_v18 = vld [vmem:[%s8594_s1 + $0xd2c] ss:$16 sps:$4 sm:$0xff]   ;;  %v6270_v19 = vld [vmem:[%s8594_s1 + $0xd20] ss:$16 sps:$4 sm:$0xff]   ;;  %v6273_v20 = vld [vmem:[%s8594_s1 + $0xd28] ss:$16 sps:$4 sm:$0xff]  }
 0x192   :  { %v6278_v22 = vld [vmem:[%s8594_s1 + $0xd44] ss:$16 sps:$4 sm:$0xff]   ;;  %v6281_v23 = vld [vmem:[%s8594_s1 + $0xd4c] ss:$16 sps:$4 sm:$0xff]   ;;  %v6276_v24 = vld [vmem:[%s8594_s1 + $0xd40] ss:$16 sps:$4 sm:$0xff]  }
 0x193   :  { %3908 = vmatpush1.bf16.msra.mxu0 %v6240_v62  ;;  %4277 = vmatpush1.bf16.msra.mxu1 %v6243_v63  ;;  %v6279_v13 = vld [vmem:[%s8594_s1 + $0xd48] ss:$16 sps:$4 sm:$0xff]   ;;  %v6284_v27 = vld [vmem:[%s8594_s1 + $0xd64] ss:$16 sps:$4 sm:$0xff]   ;;  %v6287_v28 = vld [vmem:[%s8594_s1 + $0xd6c] ss:$16 sps:$4 sm:$0xff]  }
 0x194   :  { %3909 = vmatprep.subr.bf16.mxu0 %v6248_v0  ;;  %4278 = vmatprep.subr.bf16.mxu1 %v6251_v1  ;;  %v6282_v29 = vld [vmem:[%s8594_s1 + $0xd60] ss:$16 sps:$4 sm:$0xff]   ;;  %v6285_v14 = vld [vmem:[%s8594_s1 + $0xd68] ss:$16 sps:$4 sm:$0xff]   ;;  %v6290_v30 = vld [vmem:[%s8594_s1 + $0xd84] ss:$16 sps:$4 sm:$0xff]  }
 0x195   :  { %v6293_v31 = vld [vmem:[%s8594_s1 + $0xd8c] ss:$16 sps:$4 sm:$0xff]   ;;  %v6288_v25 = vld [vmem:[%s8594_s1 + $0xd80] ss:$16 sps:$4 sm:$0xff]   ;;  %v6291_v32 = vld [vmem:[%s8594_s1 + $0xd88] ss:$16 sps:$4 sm:$0xff]  }
 0x196   :  { %v6296_v33 = vld [vmem:[%s8594_s1 + $0xda4] ss:$16 sps:$4 sm:$0xff]   ;;  %v6299_v26 = vld [vmem:[%s8594_s1 + $0xdac] ss:$16 sps:$4 sm:$0xff]   ;;  %v6294_v36 = vld [vmem:[%s8594_s1 + $0xda0] ss:$16 sps:$4 sm:$0xff]  }
 0x197   :  { %3910 = vmatpush1.bf16.msra.mxu0 %v6246_v2  ;;  %4279 = vmatpush1.bf16.msra.mxu1 %v6249_v3  ;;  %v6297_v37 = vld [vmem:[%s8594_s1 + $0xda8] ss:$16 sps:$4 sm:$0xff]   ;;  %v6302_v21 = vld [vmem:[%s8594_s1 + $0xdc4] ss:$16 sps:$4 sm:$0xff]   ;;  %v6305_v39 = vld [vmem:[%s8594_s1 + $0xdcc] ss:$16 sps:$4 sm:$0xff]  }
 0x198   :  { %3911 = vmatprep.subr.bf16.mxu0 %v6254_v4  ;;  %4280 = vmatprep.subr.bf16.mxu1 %v6257_v5  ;;  %v6300_v40 = vld [vmem:[%s8594_s1 + $0xdc0] ss:$16 sps:$4 sm:$0xff]   ;;  %v6303_v41 = vld [vmem:[%s8594_s1 + $0xdc8] ss:$16 sps:$4 sm:$0xff]   ;;  %v6308_v34 = vld [vmem:[%s8594_s1 + $0xde4] ss:$16 sps:$4 sm:$0xff]  }
 0x199   :  { %v6311_v43 = vld [vmem:[%s8594_s1 + $0xdec] ss:$16 sps:$4 sm:$0xff]   ;;  %v6306_v44 = vld [vmem:[%s8594_s1 + $0xde0] ss:$16 sps:$4 sm:$0xff]   ;;  %v6309_v45 = vld [vmem:[%s8594_s1 + $0xde8] ss:$16 sps:$4 sm:$0xff]  }
 0x19a   :  { %v6315_v46 = vld [vmem:[%s8594_s1 + $0xe04] ss:$16 sps:$4 sm:$0xff]   ;;  %v6318_v35 = vld [vmem:[%s8594_s1 + $0xe0c] ss:$16 sps:$4 sm:$0xff]   ;;  %v6313_v50 = vld [vmem:[%s8594_s1 + $0xe00] ss:$16 sps:$4 sm:$0xff]  }
 0x19b   :  { %3912 = vmatpush1.bf16.msra.mxu0 %v6252_v6  ;;  %4281 = vmatpush1.bf16.msra.mxu1 %v6255_v7  ;;  %v6316_v51 = vld [vmem:[%s8594_s1 + $0xe08] ss:$16 sps:$4 sm:$0xff]   ;;  %v6321_v53 = vld [vmem:[%s8594_s1 + $0xe24] ss:$16 sps:$4 sm:$0xff]   ;;  %v6324_v38 = vld [vmem:[%s8594_s1 + $0xe2c] ss:$16 sps:$4 sm:$0xff]  }
 0x19c   :  { %3913 = vmatprep.subr.bf16.mxu0 %v6260_v8  ;;  %4282 = vmatprep.subr.bf16.mxu1 %v6263_v9  ;;  %v6319_v55 = vld [vmem:[%s8594_s1 + $0xe20] ss:$16 sps:$4 sm:$0xff]   ;;  %v6322_v56 = vld [vmem:[%s8594_s1 + $0xe28] ss:$16 sps:$4 sm:$0xff]   ;;  %v6327_v47 = vld [vmem:[%s8594_s1 + $0xe44] ss:$16 sps:$4 sm:$0xff]  }
 0x19d   :  { %v6330_v57 = vld [vmem:[%s8594_s1 + $0xe4c] ss:$16 sps:$4 sm:$0xff]   ;;  %v6325_v58 = vld [vmem:[%s8594_s1 + $0xe40] ss:$16 sps:$4 sm:$0xff]   ;;  %v6328_v59 = vld [vmem:[%s8594_s1 + $0xe48] ss:$16 sps:$4 sm:$0xff]  }
 0x19e   :  { %v6333_v60 = vld [vmem:[%s8594_s1 + $0xe64] ss:$16 sps:$4 sm:$0xff]   ;;  %v6336_v61 = vld [vmem:[%s8594_s1 + $0xe6c] ss:$16 sps:$4 sm:$0xff]   ;;  %v6331_v62 = vld [vmem:[%s8594_s1 + $0xe60] ss:$16 sps:$4 sm:$0xff]  }
 0x19f   :  { %3914 = vmatpush1.bf16.msra.mxu0 %v6258_v10  ;;  %4283 = vmatpush1.bf16.msra.mxu1 %v6261_v11  ;;  %v6334_v63 = vld [vmem:[%s8594_s1 + $0xe68] ss:$16 sps:$4 sm:$0xff]   ;;  %v6339_v0 = vld [vmem:[%s8594_s1 + $0xe84] ss:$16 sps:$4 sm:$0xff]   ;;  %v6342_v1 = vld [vmem:[%s8594_s1 + $0xe8c] ss:$16 sps:$4 sm:$0xff]  }
 0x1a0   :  { %3915 = vmatprep.subr.bf16.mxu0 %v6266_v12  ;;  %4284 = vmatprep.subr.bf16.mxu1 %v6269_v52  ;;  %v6337_v2 = vld [vmem:[%s8594_s1 + $0xe80] ss:$16 sps:$4 sm:$0xff]   ;;  %v6340_v3 = vld [vmem:[%s8594_s1 + $0xe88] ss:$16 sps:$4 sm:$0xff]   ;;  %v6345_v4 = vld [vmem:[%s8594_s1 + $0xea4] ss:$16 sps:$4 sm:$0xff]  }
 0x1a1   :  { %v6348_v5 = vld [vmem:[%s8594_s1 + $0xeac] ss:$16 sps:$4 sm:$0xff]   ;;  %v6343_v6 = vld [vmem:[%s8594_s1 + $0xea0] ss:$16 sps:$4 sm:$0xff]   ;;  %v6346_v7 = vld [vmem:[%s8594_s1 + $0xea8] ss:$16 sps:$4 sm:$0xff]  }
 0x1a2   :  { %v6351_v8 = vld [vmem:[%s8594_s1 + $0xec4] ss:$16 sps:$4 sm:$0xff]   ;;  %v6354_v9 = vld [vmem:[%s8594_s1 + $0xecc] ss:$16 sps:$4 sm:$0xff]   ;;  %v6349_v10 = vld [vmem:[%s8594_s1 + $0xec0] ss:$16 sps:$4 sm:$0xff]  }
 0x1a3   :  { %3916 = vmatpush1.bf16.msra.mxu0 %v6264_v15  ;;  %4285 = vmatpush1.bf16.msra.mxu1 %v6267_v16  ;;  %v6352_v11 = vld [vmem:[%s8594_s1 + $0xec8] ss:$16 sps:$4 sm:$0xff]   ;;  %v6357_v12 = vld [vmem:[%s8594_s1 + $0xee4] ss:$16 sps:$4 sm:$0xff]   ;;  %v6360_v52 = vld [vmem:[%s8594_s1 + $0xeec] ss:$16 sps:$4 sm:$0xff]  }
 0x1a4   :  { %3917 = vmatprep.subr.bf16.mxu0 %v6272_v17  ;;  %4286 = vmatprep.subr.bf16.mxu1 %v6275_v18  ;;  %v6355_v15 = vld [vmem:[%s8594_s1 + $0xee0] ss:$16 sps:$4 sm:$0xff]   ;;  %v6358_v16 = vld [vmem:[%s8594_s1 + $0xee8] ss:$16 sps:$4 sm:$0xff]   ;;  %v6363_v17 = vld [vmem:[%s8594_s1 + $0xf04] ss:$16 sps:$4 sm:$0xff]  }
 0x1a5   :  { %v6366_v18 = vld [vmem:[%s8594_s1 + $0xf0c] ss:$16 sps:$4 sm:$0xff]   ;;  %vm6573_vm0 = vmmov 0   ;;  %s6574_s27 = smov [#allocation2]  }
 0x1a6   :  { %s4866_s28 = sshll.u32 %s6574_s27, 4  ;;  %s4867_s28 = int_to_ptr.vmem [resolvable:$true] %s4866_s28 }
 0x1a7   :  { %3918 = vmatpush1.bf16.msra.mxu0 %v6270_v19  ;;  %4287 = vmatpush1.bf16.msra.mxu1 %v6273_v20  ;;  %v6361_v19 = vld [vmem:[%s8594_s1 + $0xf00] ss:$16 sps:$4 sm:$0xff]   ;;  %v6364_v20 = vld [vmem:[%s8594_s1 + $0xf08] ss:$16 sps:$4 sm:$0xff]   ;;  %p6552_p1 = scmp.lt.s32.totalorder %s4867_s28, %s4867_s28 }
 0x1a8   :  { %3919 = vmatprep.subr.bf16.mxu0 %v6278_v22  ;;  %4288 = vmatprep.subr.bf16.mxu1 %v6281_v23  ;;  %v6369_v22 = vld [vmem:[%s8594_s1 + $0xf24] ss:$16 sps:$4 sm:$0xff]   ;;  %v6372_v23 = vld [vmem:[%s8594_s1 + $0xf2c] ss:$16 sps:$4 sm:$0xff]  }
 0x1ab   :  { %3920 = vmatpush1.bf16.msra.mxu0 %v6276_v24  ;;  %4289 = vmatpush1.bf16.msra.mxu1 %v6279_v13  ;;  %v6367_v24 = vld [vmem:[%s8594_s1 + $0xf20] ss:$16 sps:$4 sm:$0xff]   ;;  %v6370_v13 = vld [vmem:[%s8594_s1 + $0xf28] ss:$16 sps:$4 sm:$0xff]  }
 0x1ac   :  { %3921 = vmatprep.subr.bf16.mxu0 %v6284_v27  ;;  %4290 = vmatprep.subr.bf16.mxu1 %v6287_v28  ;;  %v6375_v27 = vld [vmem:[%s8594_s1 + $0xf44] ss:$16 sps:$4 sm:$0xff]   ;;  %v6378_v28 = vld [vmem:[%s8594_s1 + $0xf4c] ss:$16 sps:$4 sm:$0xff]  }
 0x1af   :  { %3922 = vmatpush1.bf16.msra.mxu0 %v6282_v29  ;;  %4291 = vmatpush1.bf16.msra.mxu1 %v6285_v14  ;;  %v6373_v29 = vld [vmem:[%s8594_s1 + $0xf40] ss:$16 sps:$4 sm:$0xff]   ;;  %v6376_v14 = vld [vmem:[%s8594_s1 + $0xf48] ss:$16 sps:$4 sm:$0xff]  }
 0x1b0   :  { %3923 = vmatprep.subr.bf16.mxu0 %v6290_v30  ;;  %4292 = vmatprep.subr.bf16.mxu1 %v6293_v31  ;;  %v6381_v30 = vld [vmem:[%s8594_s1 + $0xf64] ss:$16 sps:$4 sm:$0xff]   ;;  %v6384_v31 = vld [vmem:[%s8594_s1 + $0xf6c] ss:$16 sps:$4 sm:$0xff]  }
 0x1b3   :  { %3924 = vmatpush1.bf16.msra.mxu0 %v6288_v25  ;;  %4293 = vmatpush1.bf16.msra.mxu1 %v6291_v32  ;;  %v6379_v25 = vld [vmem:[%s8594_s1 + $0xf60] ss:$16 sps:$4 sm:$0xff]   ;;  %v6382_v32 = vld [vmem:[%s8594_s1 + $0xf68] ss:$16 sps:$4 sm:$0xff]  }
 0x1b4   :  { %3925 = vmatprep.subr.bf16.mxu0 %v6296_v33  ;;  %4294 = vmatprep.subr.bf16.mxu1 %v6299_v26  ;;  %v6387_v33 = vld [vmem:[%s8594_s1 + $0xf84] ss:$16 sps:$4 sm:$0xff]   ;;  %v6390_v26 = vld [vmem:[%s8594_s1 + $0xf8c] ss:$16 sps:$4 sm:$0xff]  }
 0x1b7   :  { %3926 = vmatpush1.bf16.msra.mxu0 %v6294_v36  ;;  %4295 = vmatpush1.bf16.msra.mxu1 %v6297_v37  ;;  %v6385_v36 = vld [vmem:[%s8594_s1 + $0xf80] ss:$16 sps:$4 sm:$0xff]   ;;  %v6388_v37 = vld [vmem:[%s8594_s1 + $0xf88] ss:$16 sps:$4 sm:$0xff]  }
 0x1b8   :  { %3927 = vmatprep.subr.bf16.mxu0 %v6302_v21  ;;  %4296 = vmatprep.subr.bf16.mxu1 %v6305_v39  ;;  %v6393_v21 = vld [vmem:[%s8594_s1 + $0xfa4] ss:$16 sps:$4 sm:$0xff]   ;;  %v6396_v39 = vld [vmem:[%s8594_s1 + $0xfac] ss:$16 sps:$4 sm:$0xff]  }
 0x1bb   :  { %3928 = vmatpush1.bf16.msra.mxu0 %v6300_v40  ;;  %4297 = vmatpush1.bf16.msra.mxu1 %v6303_v41  ;;  %v6391_v40 = vld [vmem:[%s8594_s1 + $0xfa0] ss:$16 sps:$4 sm:$0xff]   ;;  %v6394_v41 = vld [vmem:[%s8594_s1 + $0xfa8] ss:$16 sps:$4 sm:$0xff]  }
 0x1bc   :  { %3929 = vmatprep.subr.bf16.mxu0 %v6308_v34  ;;  %4298 = vmatprep.subr.bf16.mxu1 %v6311_v43  ;;  %v6399_v34 = vld [vmem:[%s8594_s1 + $0xfc4] ss:$16 sps:$4 sm:$0xff]   ;;  %v6402_v43 = vld [vmem:[%s8594_s1 + $0xfcc] ss:$16 sps:$4 sm:$0xff]  }
 0x1bf   :  { %3930 = vmatpush1.bf16.msra.mxu0 %v6306_v44  ;;  %4299 = vmatpush1.bf16.msra.mxu1 %v6309_v45  ;;  %v6397_v44 = vld [vmem:[%s8594_s1 + $0xfc0] ss:$16 sps:$4 sm:$0xff]   ;;  %v6400_v45 = vld [vmem:[%s8594_s1 + $0xfc8] ss:$16 sps:$4 sm:$0xff]  }
 0x1c0   :  { %3940 = vmatprep.subr.bf16.mxu0 %v6315_v46  ;;  %4309 = vmatprep.subr.bf16.mxu1 %v6318_v35  ;;  %v6405_v46 = vld [vmem:[%s8594_s1 + $0xfe4] ss:$16 sps:$4 sm:$0xff]   ;;  %v6408_v35 = vld [vmem:[%s8594_s1 + $0xfec] ss:$16 sps:$4 sm:$0xff]  }
 0x1c2   :  { %3932 = vmatmul.mubr.bf16.vlgmr.msra.gmra.mrb[0].mxu0 %v8049_v48  ;;  %4301 = vmatmul.mubr.bf16.vlgmr.msra.gmra.mrb[0].mxu1 %v8049_v48 }
 0x1c3   :  { %3941 = vmatpush1.bf16.msra.mxu0 %v6313_v50  ;;  %4310 = vmatpush1.bf16.msra.mxu1 %v6316_v51  ;;  %v8238_v50 = vld.sshfl [vmem:[%s8593_s0 + $0x10] sm:$0x11 pattern:$0x75316420] }
 0x1c4   :  { %3942 = vmatprep.subr.bf16.mxu0 %v6321_v53  ;;  %4311 = vmatprep.subr.bf16.mxu1 %v6324_v38  ;;  %v6403_v51 = vld [vmem:[%s8594_s1 + $0xfe0] ss:$16 sps:$4 sm:$0xff]   ;;  %v6406_v53 = vld [vmem:[%s8594_s1 + $0xfe8] ss:$16 sps:$4 sm:$0xff]   ;;  %v6411_v38 = vld [vmem:[%s8594_s1 + $0x1004] ss:$16 sps:$4 sm:$0xff]  }
 0x1c5   :  { %3972 = vmatprep.mubr.bf16.mxu0 %v732_v54  ;;  %4341 = vmatprep.mubr.bf16.mxu1 %v732_v54  ;;  %v6414_v54 = vld [vmem:[%s8594_s1 + $0x100c] ss:$16 sps:$4 sm:$0xff]  }
 0x1c7   :  { %3943 = vmatpush1.bf16.msra.mxu0 %v6319_v55  ;;  %4312 = vmatpush1.bf16.msra.mxu1 %v6322_v56  ;;  %v740_v55 = vcombine.high %v8238_v50, %v8238_v50  ;;  %v730_v56 = vcombine.high %v8049_v48, %v8049_v48  ;;  %v6420_v48 = vld [vmem:[%s8594_s1 + $0x102c] ss:$16 sps:$4 sm:$0xff]  }
 0x1c8   :  { %3944 = vmatprep.subr.bf16.mxu0 %v6327_v47  ;;  %4313 = vmatprep.subr.bf16.mxu1 %v6330_v57  ;;  %v6409_v47 = vld [vmem:[%s8594_s1 + $0x1000] ss:$16 sps:$4 sm:$0xff]   ;;  %v6412_v57 = vld [vmem:[%s8594_s1 + $0x1008] ss:$16 sps:$4 sm:$0xff]  }
 0x1cb   :  { %3945 = vmatpush1.bf16.msra.mxu0 %v6325_v58  ;;  %4314 = vmatpush1.bf16.msra.mxu1 %v6328_v59  ;;  %v6417_v58 = vld [vmem:[%s8594_s1 + $0x1024] ss:$16 sps:$4 sm:$0xff]   ;;  %v754_v59 = vrot.slane %v740_v55, %v6755_v49 }
 0x1cc   :  { %3946 = vmatprep.subr.bf16.mxu0 %v6333_v60  ;;  %4315 = vmatprep.subr.bf16.mxu1 %v6336_v61  ;;  %v6415_v60 = vld [vmem:[%s8594_s1 + $0x1020] ss:$16 sps:$4 sm:$0xff]   ;;  %v6418_v61 = vld [vmem:[%s8594_s1 + $0x1028] ss:$16 sps:$4 sm:$0xff]   ;;  %v6501_v55 = vld [vmem:[%s8594_s1 + $0x11e4] ss:$16 sps:$4 sm:$0xff]  }
 0x1cf   :  { %3947 = vmatpush1.bf16.msra.mxu0 %v6331_v62  ;;  %4316 = vmatpush1.bf16.msra.mxu1 %v6334_v63  ;;  %v6423_v62 = vld [vmem:[%s8594_s1 + $0x1044] ss:$16 sps:$4 sm:$0xff]   ;;  %v6426_v63 = vld [vmem:[%s8594_s1 + $0x104c] ss:$16 sps:$4 sm:$0xff]  }
 0x1d0   :  { %3948 = vmatprep.subr.bf16.mxu0 %v6339_v0  ;;  %4317 = vmatprep.subr.bf16.mxu1 %v6342_v1  ;;  %v6421_v0 = vld [vmem:[%s8594_s1 + $0x1040] ss:$16 sps:$4 sm:$0xff]   ;;  %v6424_v1 = vld [vmem:[%s8594_s1 + $0x1048] ss:$16 sps:$4 sm:$0xff]  }
 0x1d3   :  { %3949 = vmatpush1.bf16.msra.mxu0 %v6337_v2  ;;  %4318 = vmatpush1.bf16.msra.mxu1 %v6340_v3  ;;  %v6429_v2 = vld [vmem:[%s8594_s1 + $0x1064] ss:$16 sps:$4 sm:$0xff]   ;;  %v6432_v3 = vld [vmem:[%s8594_s1 + $0x106c] ss:$16 sps:$4 sm:$0xff]  }
 0x1d4   :  { %3950 = vmatprep.subr.bf16.mxu0 %v6345_v4  ;;  %4319 = vmatprep.subr.bf16.mxu1 %v6348_v5  ;;  %v6427_v4 = vld [vmem:[%s8594_s1 + $0x1060] ss:$16 sps:$4 sm:$0xff]   ;;  %v6430_v5 = vld [vmem:[%s8594_s1 + $0x1068] ss:$16 sps:$4 sm:$0xff]  }
 0x1d7   :  { %3951 = vmatpush1.bf16.msra.mxu0 %v6343_v6  ;;  %4320 = vmatpush1.bf16.msra.mxu1 %v6346_v7  ;;  %v6435_v6 = vld [vmem:[%s8594_s1 + $0x1084] ss:$16 sps:$4 sm:$0xff]   ;;  %v6438_v7 = vld [vmem:[%s8594_s1 + $0x108c] ss:$16 sps:$4 sm:$0xff]  }
 0x1d8   :  { %3952 = vmatprep.subr.bf16.mxu0 %v6351_v8  ;;  %4321 = vmatprep.subr.bf16.mxu1 %v6354_v9  ;;  %v6433_v8 = vld [vmem:[%s8594_s1 + $0x1080] ss:$16 sps:$4 sm:$0xff]   ;;  %v6436_v9 = vld [vmem:[%s8594_s1 + $0x1088] ss:$16 sps:$4 sm:$0xff]  }
 0x1db   :  { %3953 = vmatpush1.bf16.msra.mxu0 %v6349_v10  ;;  %4322 = vmatpush1.bf16.msra.mxu1 %v6352_v11  ;;  %v6441_v10 = vld [vmem:[%s8594_s1 + $0x10a4] ss:$16 sps:$4 sm:$0xff]   ;;  %v6444_v11 = vld [vmem:[%s8594_s1 + $0x10ac] ss:$16 sps:$4 sm:$0xff]  }
 0x1dc   :  { %3954 = vmatprep.subr.bf16.mxu0 %v6357_v12  ;;  %4323 = vmatprep.subr.bf16.mxu1 %v6360_v52  ;;  %v6439_v12 = vld [vmem:[%s8594_s1 + $0x10a0] ss:$16 sps:$4 sm:$0xff]   ;;  %v6442_v52 = vld [vmem:[%s8594_s1 + $0x10a8] ss:$16 sps:$4 sm:$0xff]  }
 0x1df   :  { %3955 = vmatpush1.bf16.msra.mxu0 %v6355_v15  ;;  %4324 = vmatpush1.bf16.msra.mxu1 %v6358_v16  ;;  %v6447_v15 = vld [vmem:[%s8594_s1 + $0x10c4] ss:$16 sps:$4 sm:$0xff]   ;;  %v6450_v16 = vld [vmem:[%s8594_s1 + $0x10cc] ss:$16 sps:$4 sm:$0xff]  }
 0x1e0   :  { %3956 = vmatprep.subr.bf16.mxu0 %v6363_v17  ;;  %4325 = vmatprep.subr.bf16.mxu1 %v6366_v18  ;;  %v6445_v17 = vld [vmem:[%s8594_s1 + $0x10c0] ss:$16 sps:$4 sm:$0xff]   ;;  %v6448_v18 = vld [vmem:[%s8594_s1 + $0x10c8] ss:$16 sps:$4 sm:$0xff]  }
 0x1e3   :  { %3957 = vmatpush1.bf16.msra.mxu0 %v6361_v19  ;;  %4326 = vmatpush1.bf16.msra.mxu1 %v6364_v20  ;;  %v6453_v19 = vld [vmem:[%s8594_s1 + $0x10e4] ss:$16 sps:$4 sm:$0xff]   ;;  %v6456_v20 = vld [vmem:[%s8594_s1 + $0x10ec] ss:$16 sps:$4 sm:$0xff]  }
 0x1e4   :  { %3958 = vmatprep.subr.bf16.mxu0 %v6369_v22  ;;  %4327 = vmatprep.subr.bf16.mxu1 %v6372_v23  ;;  %v6451_v22 = vld [vmem:[%s8594_s1 + $0x10e0] ss:$16 sps:$4 sm:$0xff]   ;;  %v6454_v23 = vld [vmem:[%s8594_s1 + $0x10e8] ss:$16 sps:$4 sm:$0xff]  }
 0x1e7   :  { %3959 = vmatpush1.bf16.msra.mxu0 %v6367_v24  ;;  %4328 = vmatpush1.bf16.msra.mxu1 %v6370_v13  ;;  %v6459_v24 = vld [vmem:[%s8594_s1 + $0x1104] ss:$16 sps:$4 sm:$0xff]   ;;  %v6462_v13 = vld [vmem:[%s8594_s1 + $0x110c] ss:$16 sps:$4 sm:$0xff]  }
 0x1e8   :  { %3960 = vmatprep.subr.bf16.mxu0 %v6375_v27  ;;  %4329 = vmatprep.subr.bf16.mxu1 %v6378_v28  ;;  %v6457_v27 = vld [vmem:[%s8594_s1 + $0x1100] ss:$16 sps:$4 sm:$0xff]   ;;  %v6460_v28 = vld [vmem:[%s8594_s1 + $0x1108] ss:$16 sps:$4 sm:$0xff]  }
 0x1eb   :  { %3961 = vmatpush1.bf16.msra.mxu0 %v6373_v29  ;;  %4330 = vmatpush1.bf16.msra.mxu1 %v6376_v14  ;;  %v6465_v29 = vld [vmem:[%s8594_s1 + $0x1124] ss:$16 sps:$4 sm:$0xff]   ;;  %v6468_v14 = vld [vmem:[%s8594_s1 + $0x112c] ss:$16 sps:$4 sm:$0xff]  }
 0x1ec   :  { %3962 = vmatprep.subr.bf16.mxu0 %v6381_v30  ;;  %4331 = vmatprep.subr.bf16.mxu1 %v6384_v31  ;;  %v6463_v30 = vld [vmem:[%s8594_s1 + $0x1120] ss:$16 sps:$4 sm:$0xff]   ;;  %v6466_v31 = vld [vmem:[%s8594_s1 + $0x1128] ss:$16 sps:$4 sm:$0xff]  }
 0x1ef   :  { %3963 = vmatpush1.bf16.msra.mxu0 %v6379_v25  ;;  %4332 = vmatpush1.bf16.msra.mxu1 %v6382_v32  ;;  %v6471_v25 = vld [vmem:[%s8594_s1 + $0x1144] ss:$16 sps:$4 sm:$0xff]   ;;  %v6474_v32 = vld [vmem:[%s8594_s1 + $0x114c] ss:$16 sps:$4 sm:$0xff]  }
 0x1f0   :  { %3964 = vmatprep.subr.bf16.mxu0 %v6387_v33  ;;  %4333 = vmatprep.subr.bf16.mxu1 %v6390_v26  ;;  %v6469_v33 = vld [vmem:[%s8594_s1 + $0x1140] ss:$16 sps:$4 sm:$0xff]   ;;  %v6472_v26 = vld [vmem:[%s8594_s1 + $0x1148] ss:$16 sps:$4 sm:$0xff]  }
 0x1f3   :  { %3965 = vmatpush1.bf16.msra.mxu0 %v6385_v36  ;;  %4334 = vmatpush1.bf16.msra.mxu1 %v6388_v37  ;;  %v6477_v36 = vld [vmem:[%s8594_s1 + $0x1164] ss:$16 sps:$4 sm:$0xff]   ;;  %v6480_v37 = vld [vmem:[%s8594_s1 + $0x116c] ss:$16 sps:$4 sm:$0xff]  }
 0x1f4   :  { %3966 = vmatprep.subr.bf16.mxu0 %v6393_v21  ;;  %4335 = vmatprep.subr.bf16.mxu1 %v6396_v39  ;;  %v6475_v21 = vld [vmem:[%s8594_s1 + $0x1160] ss:$16 sps:$4 sm:$0xff]   ;;  %v6478_v39 = vld [vmem:[%s8594_s1 + $0x1168] ss:$16 sps:$4 sm:$0xff]  }
 0x1f7   :  { %3967 = vmatpush1.bf16.msra.mxu0 %v6391_v40  ;;  %4336 = vmatpush1.bf16.msra.mxu1 %v6394_v41  ;;  %v6483_v40 = vld [vmem:[%s8594_s1 + $0x1184] ss:$16 sps:$4 sm:$0xff]   ;;  %v6486_v41 = vld [vmem:[%s8594_s1 + $0x118c] ss:$16 sps:$4 sm:$0xff]  }
 0x1f8   :  { %3968 = vmatprep.subr.bf16.mxu0 %v6399_v34  ;;  %4337 = vmatprep.subr.bf16.mxu1 %v6402_v43  ;;  %v6481_v34 = vld [vmem:[%s8594_s1 + $0x1180] ss:$16 sps:$4 sm:$0xff]   ;;  %v6484_v43 = vld [vmem:[%s8594_s1 + $0x1188] ss:$16 sps:$4 sm:$0xff]  }
 0x1fb   :  { %3969 = vmatpush1.bf16.msra.mxu0 %v6397_v44  ;;  %4338 = vmatpush1.bf16.msra.mxu1 %v6400_v45  ;;  %v6489_v44 = vld [vmem:[%s8594_s1 + $0x11a4] ss:$16 sps:$4 sm:$0xff]   ;;  %v6492_v45 = vld [vmem:[%s8594_s1 + $0x11ac] ss:$16 sps:$4 sm:$0xff]  }
 0x1fc   :  { %3970 = vmatprep.subr.bf16.mxu0 %v6405_v46  ;;  %4339 = vmatprep.subr.bf16.mxu1 %v6408_v35  ;;  %v6487_v46 = vld [vmem:[%s8594_s1 + $0x11a0] ss:$16 sps:$4 sm:$0xff]   ;;  %v6490_v35 = vld [vmem:[%s8594_s1 + $0x11a8] ss:$16 sps:$4 sm:$0xff]  }
 0x1ff   :  { %3971 = vmatpush1.bf16.msra.mxu0 %v6403_v51  ;;  %4340 = vmatpush1.bf16.msra.mxu1 %v6406_v53  ;;  %v6495_v51 = vld [vmem:[%s8594_s1 + $0x11c4] ss:$16 sps:$4 sm:$0xff]   ;;  %v6498_v53 = vld [vmem:[%s8594_s1 + $0x11cc] ss:$16 sps:$4 sm:$0xff]  }
 0x200   :  { %3981 = vmatprep.subr.bf16.mxu0 %v6411_v38  ;;  %4350 = vmatprep.subr.bf16.mxu1 %v6414_v54  ;;  %v6493_v38 = vld [vmem:[%s8594_s1 + $0x11c0] ss:$16 sps:$4 sm:$0xff]   ;;  %v6496_v54 = vld [vmem:[%s8594_s1 + $0x11c8] ss:$16 sps:$4 sm:$0xff]  }
 0x202   :  { %3973 = vmatmul.mubr.bf16.vlgmr.msra.gmra.mrb[0].mxu0 %v730_v56  ;;  %4342 = vmatmul.mubr.bf16.vlgmr.msra.gmra.mrb[0].mxu1 %v730_v56  ;;  %v6504_v56 = vld [vmem:[%s8594_s1 + $0x11ec] ss:$16 sps:$4 sm:$0xff]  }
 0x203   :  { %3982 = vmatpush1.bf16.msra.mxu0 %v6409_v47  ;;  %4351 = vmatpush1.bf16.msra.mxu1 %v6412_v57  ;;  %v6499_v47 = vld [vmem:[%s8594_s1 + $0x11e0] ss:$16 sps:$4 sm:$0xff]   ;;  %v6502_v57 = vld [vmem:[%s8594_s1 + $0x11e8] ss:$16 sps:$4 sm:$0xff]  }
 0x204   :  { %3983 = vmatprep.subr.bf16.mxu0 %v6417_v58  ;;  %4352 = vmatprep.subr.bf16.mxu1 %v6420_v48  ;;  %v6505_v58 = vld [vmem:[%s8596_s3 + $0x40] sm:$0xff]  }
 0x205   :  { %4013 = vmatprep.mubr.bf16.mxu0 %v754_v59  ;;  %4382 = vmatprep.mubr.bf16.mxu1 %v754_v59  ;;  %v6506_v48 = vld [vmem:[%s8596_s3 + $0xc0] sm:$0xff]   ;;  %v747_v59 = vrot.slane %v8238_v50, %v6755_v49  ;;  %v6510_v49 = vld [vmem:[%s8596_s3 + $0xc8] sm:$0xff]  }
 0x206   :  { %v6511_v50 = vld [vmem:[%s8596_s3 + $0x8] sm:$0xff]  }
 0x207   :  { %3984 = vmatpush1.bf16.msra.mxu0 %v6415_v60  ;;  %4353 = vmatpush1.bf16.msra.mxu1 %v6418_v61  ;;  %v6507_v60 = vld [vmem:[%s8596_s3] sm:$0xff]  }
 0x208   :  { %3985 = vmatprep.subr.bf16.mxu0 %v6423_v62  ;;  %4354 = vmatprep.subr.bf16.mxu1 %v6426_v63  ;;  %v6508_v61 = vld [vmem:[%s8596_s3 + $0x80] sm:$0xff]   ;;  %v6509_v62 = vld [vmem:[%s8596_s3 + $0x48] sm:$0xff]  }
 0x209   :  { %v6512_v63 = vld [vmem:[%s8596_s3 + $0x88] sm:$0xff]  }
 0x20b   :  { %3986 = vmatpush1.bf16.msra.mxu0 %v6421_v0  ;;  %4355 = vmatpush1.bf16.msra.mxu1 %v6424_v1  ;;  %v6513_v0 = vld [vmem:[%s8596_s3 + $0x50] sm:$0xff]  }
 0x20c   :  { %3987 = vmatprep.subr.bf16.mxu0 %v6429_v2  ;;  %4356 = vmatprep.subr.bf16.mxu1 %v6432_v3  ;;  %v6514_v1 = vld [vmem:[%s8596_s3 + $0xd0] sm:$0xff]  }
 0x20d   :  { %v6515_v2 = vld [vmem:[%s8596_s3 + $0x10] sm:$0xff]  }
 0x20e   :  { %v6516_v3 = vld [vmem:[%s8596_s3 + $0x90] sm:$0xff]  }
 0x20f   :  { %3988 = vmatpush1.bf16.msra.mxu0 %v6427_v4  ;;  %4357 = vmatpush1.bf16.msra.mxu1 %v6430_v5  ;;  %v6517_v4 = vld [vmem:[%s8596_s3 + $0x58] sm:$0xff]  }
 0x210   :  { %3989 = vmatprep.subr.bf16.mxu0 %v6435_v6  ;;  %4358 = vmatprep.subr.bf16.mxu1 %v6438_v7  ;;  %v6518_v5 = vld [vmem:[%s8596_s3 + $0xd8] sm:$0xff]  }
 0x211   :  { %v6519_v6 = vld [vmem:[%s8596_s3 + $0x18] sm:$0xff]  }
 0x212   :  { %v6520_v7 = vld [vmem:[%s8596_s3 + $0x98] sm:$0xff]  }
 0x213   :  { %3990 = vmatpush1.bf16.msra.mxu0 %v6433_v8  ;;  %4359 = vmatpush1.bf16.msra.mxu1 %v6436_v9  ;;  %v6521_v8 = vld [vmem:[%s8596_s3 + $0x60] sm:$0xff]  }
 0x214   :  { %3991 = vmatprep.subr.bf16.mxu0 %v6441_v10  ;;  %4360 = vmatprep.subr.bf16.mxu1 %v6444_v11  ;;  %v6522_v9 = vld [vmem:[%s8596_s3 + $0xe0] sm:$0xff]  }
 0x215   :  { %v6523_v10 = vld [vmem:[%s8596_s3 + $0x20] sm:$0xff]  }
 0x216   :  { %v6524_v11 = vld [vmem:[%s8596_s3 + $0xa0] sm:$0xff]  }
 0x217   :  { %3992 = vmatpush1.bf16.msra.mxu0 %v6439_v12  ;;  %4361 = vmatpush1.bf16.msra.mxu1 %v6442_v52  ;;  %v6525_v12 = vld [vmem:[%s8596_s3 + $0x68] sm:$0xff]  }
 0x218   :  { %3993 = vmatprep.subr.bf16.mxu0 %v6447_v15  ;;  %4362 = vmatprep.subr.bf16.mxu1 %v6450_v16  ;;  %v6526_v52 = vld [vmem:[%s8596_s3 + $0xe8] sm:$0xff]  }
 0x219   :  { %v6527_v15 = vld [vmem:[%s8596_s3 + $0x28] sm:$0xff]  }
 0x21a   :  { %v6528_v16 = vld [vmem:[%s8596_s3 + $0xa8] sm:$0xff]  }
 0x21b   :  { %3994 = vmatpush1.bf16.msra.mxu0 %v6445_v17  ;;  %4363 = vmatpush1.bf16.msra.mxu1 %v6448_v18  ;;  %v6529_v17 = vld [vmem:[%s8596_s3 + $0x70] sm:$0xff]  }
 0x21c   :  { %3995 = vmatprep.subr.bf16.mxu0 %v6453_v19  ;;  %4364 = vmatprep.subr.bf16.mxu1 %v6456_v20  ;;  %v6530_v18 = vld [vmem:[%s8596_s3 + $0xf0] sm:$0xff]  }
 0x21d   :  { %v6531_v19 = vld [vmem:[%s8596_s3 + $0x30] sm:$0xff]  }
 0x21e   :  { %v6532_v20 = vld [vmem:[%s8596_s3 + $0xb0] sm:$0xff]  }
 0x21f   :  { %3996 = vmatpush1.bf16.msra.mxu0 %v6451_v22  ;;  %4365 = vmatpush1.bf16.msra.mxu1 %v6454_v23  ;;  %v6533_v22 = vld [vmem:[%s8596_s3 + $0x78] sm:$0xff]  }
 0x220   :  { %3997 = vmatprep.subr.bf16.mxu0 %v6459_v24  ;;  %4366 = vmatprep.subr.bf16.mxu1 %v6462_v13  ;;  %v6534_v23 = vld [vmem:[%s8596_s3 + $0xf8] sm:$0xff]  }
 0x221   :  { %v6535_v24 = vld [vmem:[%s8596_s3 + $0x38] sm:$0xff]  }
 0x222   :  { %v6536_v13 = vld [vmem:[%s8596_s3 + $0xb8] sm:$0xff]  }
 0x223   :  { %3998 = vmatpush1.bf16.msra.mxu0 %v6457_v27  ;;  %4367 = vmatpush1.bf16.msra.mxu1 %v6460_v28  ;;  %v6572_v27 = vmov 0.0   ;;  %v614_v28 = vsub.s32 0, %v6737_v42 }
 0x224   :  { %3999 = vmatprep.subr.bf16.mxu0 %v6465_v29  ;;  %4368 = vmatprep.subr.bf16.mxu1 %v6468_v14  ;;  %v622_v29 = vsub.s32 2, %v6737_v42  ;;  %v610_v14 = vld [vmem:[%s8595_s2] sm:$0xf] }
 0x227   :  { %4000 = vmatpush1.bf16.msra.mxu0 %v6463_v30  ;;  %4369 = vmatpush1.bf16.msra.mxu1 %v6466_v31  ;;  %v618_v30 = vsub.s32 1, %v6737_v42  ;;  %v626_v31 = vsub.s32 3, %v6737_v42  ;;  %v6537_v42 = vld [vmem:[%s8599_s6] sm:$0xff]  }
 0x228   :  { %4001 = vmatprep.subr.bf16.mxu0 %v6471_v25  ;;  %4370 = vmatprep.subr.bf16.mxu1 %v6474_v32  ;;  %v615_v25 = vrot.slane %v610_v14, %v614_v28  ;;  %v623_v32 = vrot.slane %v610_v14, %v622_v29 }
 0x22b   :  { %4002 = vmatpush1.bf16.msra.mxu0 %v6469_v33  ;;  %4371 = vmatpush1.bf16.msra.mxu1 %v6472_v26  ;;  %v619_v33 = vrot.slane %v610_v14, %v618_v30  ;;  %v627_v26 = vrot.slane %v610_v14, %v626_v31 }
 0x22c   :  { %4003 = vmatprep.subr.bf16.mxu0 %v6477_v36  ;;  %4372 = vmatprep.subr.bf16.mxu1 %v6480_v37 }
 0x22f   :  { %4004 = vmatpush1.bf16.msra.mxu0 %v6475_v21  ;;  %4373 = vmatpush1.bf16.msra.mxu1 %v6478_v39 }
 0x230   :  { %4005 = vmatprep.subr.bf16.mxu0 %v6483_v40  ;;  %4374 = vmatprep.subr.bf16.mxu1 %v6486_v41 }
 0x233   :  { %4006 = vmatpush1.bf16.msra.mxu0 %v6481_v34  ;;  %4375 = vmatpush1.bf16.msra.mxu1 %v6484_v43 }
 0x234   :  { %4007 = vmatprep.subr.bf16.mxu0 %v6489_v44  ;;  %4376 = vmatprep.subr.bf16.mxu1 %v6492_v45 }
 0x237   :  { %4008 = vmatpush1.bf16.msra.mxu0 %v6487_v46  ;;  %4377 = vmatpush1.bf16.msra.mxu1 %v6490_v35 }
 0x238   :  { %4009 = vmatprep.subr.bf16.mxu0 %v6495_v51  ;;  %4378 = vmatprep.subr.bf16.mxu1 %v6498_v53 }
 0x23b   :  { %4010 = vmatpush1.bf16.msra.mxu0 %v6493_v38  ;;  %4379 = vmatpush1.bf16.msra.mxu1 %v6496_v54 }
 0x23c   :  { %4011 = vmatprep.subr.bf16.mxu0 %v6501_v55  ;;  %4380 = vmatprep.subr.bf16.mxu1 %v6504_v56  ;;  %v6538_v55 = vld [vmem:[%s8599_s6 + $0x8] sm:$0xff]   ;;  %v6539_v56 = vld [vmem:[%s8599_s6 + $0x10] sm:$0xff]  }
 0x23f   :  { %4012 = vmatpush1.bf16.msra.mxu0 %v6499_v47  ;;  %4381 = vmatpush1.bf16.msra.mxu1 %v6502_v57  ;;  %v6540_v47 = vld [vmem:[%s8599_s6 + $0x18] sm:$0xff]   ;;  %v6541_v57 = vld [vmem:[%s8599_s6 + $0x20] sm:$0xff]  }
 0x240   :  { %5494 = vmatprep.subr.bf16.mxu0 %v6505_v58  ;;  %5516 = vmatprep.subr.bf16.mxu1 %v6506_v48  ;;  %v6542_v58 = vld [vmem:[%s8599_s6 + $0x28] sm:$0xff]   ;;  %v6543_v48 = vld [vmem:[%s8599_s6 + $0x30] sm:$0xff]  }
 0x242   :  { %4014 = vmatmul.mubr.bf16.vlgmr.msra.gmra.mrb[0].mxu0 %v747_v59  ;;  %4383 = vmatmul.mubr.bf16.vlgmr.msra.gmra.mrb[0].mxu1 %v747_v59  ;;  %v6544_v59 = vld [vmem:[%s8599_s6 + $0x38] sm:$0xff]  }
 0x243   :  { %5495 = vmatpush3.bf16.msra.mxu0 %v6507_v60  ;;  %5517 = vmatpush3.bf16.msra.mxu1 %v6508_v61 }
 0x244   :  { %5496 = vmatprep.subr.bf16.mxu0 %v6509_v62  ;;  %5518 = vmatprep.subr.bf16.mxu1 %v6510_v49 }
 0x247   :  { %5497 = vmatpush3.bf16.msra.mxu0 %v6511_v50  ;;  %5519 = vmatpush3.bf16.msra.mxu1 %v6512_v63 }
 0x248   :  { %5498 = vmatprep.subr.bf16.mxu0 %v6513_v0  ;;  %5520 = vmatprep.subr.bf16.mxu1 %v6514_v1 }
 0x24b   :  { %5499 = vmatpush3.bf16.msra.mxu0 %v6515_v2  ;;  %5521 = vmatpush3.bf16.msra.mxu1 %v6516_v3  ;;  %v5483_v2 = vld [vmem:[%s8597_s4] ss:$0 sm:$0xff]  ;;  %s6547_s4 = scalar_lea.vmem %s4867_s28, 32 }
 0x24c   :  { %5500 = vmatprep.subr.bf16.mxu0 %v6517_v4  ;;  %5522 = vmatprep.subr.bf16.mxu1 %v6518_v5  ;;  %p6548_p0 = scmp.ne.s32.totalorder %s4867_s28, %s6547_s4  ;;  %p6553_p2 = scmp.lt.s32.totalorder %s6547_s4, %s6547_s4 }
 0x24e   :  { %p6554_p3 = por %p6553_p2, %p6552_p1 }
 0x24f   :  { %5501 = vmatpush3.bf16.msra.mxu0 %v6519_v6  ;;  %5523 = vmatpush3.bf16.msra.mxu1 %v6520_v7  ;;  %v5484_v6 = vld [vmem:[%s8598_s5] ss:$0 sm:$0xff] }
 0x250   :  { %5502 = vmatprep.subr.bf16.mxu0 %v6521_v8  ;;  %5524 = vmatprep.subr.bf16.mxu1 %v6522_v9  ;;  %p6555_p4 = pnand %p6554_p3, %p6548_p0 }
 0x253   :  { %5503 = vmatpush3.bf16.msra.mxu0 %v6523_v10  ;;  %5525 = vmatpush3.bf16.msra.mxu1 %v6524_v11  ;;  %v5485_v10 = vld [vmem:[%s8600_s7] ss:$0 sm:$0xff] }
 0x254   :  { %5504 = vmatprep.subr.bf16.mxu0 %v6525_v12  ;;  %5526 = vmatprep.subr.bf16.mxu1 %v6526_v52 }
 0x257   :  { %5505 = vmatpush3.bf16.msra.mxu0 %v6527_v15  ;;  %5527 = vmatpush3.bf16.msra.mxu1 %v6528_v16 }
 0x258   :  { %5506 = vmatprep.subr.bf16.mxu0 %v6529_v17  ;;  %5528 = vmatprep.subr.bf16.mxu1 %v6530_v18 }
 0x25b   :  { %5507 = vmatpush3.bf16.msra.mxu0 %v6531_v19  ;;  %5529 = vmatpush3.bf16.msra.mxu1 %v6532_v20 }
 0x25c   :  { %5508 = vmatprep.subr.bf16.mxu0 %v6533_v22  ;;  %5530 = vmatprep.subr.bf16.mxu1 %v6534_v23 }
 0x25f   :  { %5509 = vmatpush3.bf16.msra.mxu0 %v6535_v24  ;;  %5531 = vmatpush3.bf16.msra.mxu1 %v6536_v13 }
 0x260   :  { %5547 = vmatprep.subr.bf16.mxu0 %v6572_v27 }
 0x315   :  { %v4015_v36 = vpop.f32.mrb[0].mxu0  ;;  %v4384_v37 = vpop.f32.mrb[0].mxu1 }
 0x316   :  { %v5567_v21 = vadd.f32 %v4015_v36, %v615_v25  ;;  %v5569_v39 = vadd.f32 %v4384_v37, %v623_v32  ;;  %v4017_v40 = vpop.f32.mrb[1].mxu0  ;;  %v4386_v41 = vpop.f32.mrb[1].mxu1 }
 0x317   :  { %v5568_v34 = vadd.f32 %v4017_v40, %v619_v33  ;;  %v5570_v43 = vadd.f32 %v4386_v41, %v627_v26  ;;  %v4019_v44 = vpop.f32.mrb[2].mxu0  ;;  %v4388_v45 = vpop.f32.mrb[2].mxu1 }
 0x318   :  { %v4020_v46 = vpop.f32.mrb[3].mxu0  ;;  %v4389_v35 = vpop.f32.mrb[3].mxu1  ;;  %v4391_v38 = vpack.c.bf16 %v5567_v21, %v5567_v21  ;;  %v4393_v54 = vpack.c.bf16 %v5569_v39, %v5569_v39 }
 0x319   :  { %v4392_v51 = vpack.c.bf16 %v5568_v34, %v5568_v34  ;;  %v4394_v53 = vpack.c.bf16 %v5570_v43, %v5570_v43 }
 0x31b   :  { %4683 = vmatprep.mubr.bf16.mxu0 %v4392_v51  ;;  %4723 = vmatprep.mubr.bf16.mxu1 %v4394_v53 }
 0x31c   :  { %4684 = vmatmul.mubr.bf16.vlgmr.msra.gmra.mrb[4].mxu0 %v4391_v38  ;;  %4724 = vmatmul.mubr.bf16.vlgmr.msra.gmra.mrb[4].mxu1 %v4393_v54 }
 0x31d   :  { %5548 = vmatpush3.bf16.msra.mxu0 %v6537_v42  ;;  %5563 = vmatprep.mubr.msk.bf16.mxu0 %vm6573_vm0, %v6572_v27 }
 0x31e   :  { %5549 = vmatprep.subr.bf16.mxu0 %v6572_v27 }
 0x321   :  { %5550 = vmatpush3.bf16.msra.mxu0 %v6538_v55 }
 0x322   :  { %5551 = vmatprep.subr.bf16.mxu0 %v6572_v27 }
 0x325   :  { %5552 = vmatpush3.bf16.msra.mxu0 %v6539_v56 }
 0x326   :  { %5553 = vmatprep.subr.bf16.mxu0 %v6572_v27 }
 0x329   :  { %5554 = vmatpush3.bf16.msra.mxu0 %v6540_v47 }
 0x32a   :  { %5555 = vmatprep.subr.bf16.mxu0 %v6572_v27 }
 0x32d   :  { %5556 = vmatpush3.bf16.msra.mxu0 %v6541_v57 }
 0x32e   :  { %5557 = vmatprep.subr.bf16.mxu0 %v6572_v27 }
 0x331   :  { %5558 = vmatpush3.bf16.msra.mxu0 %v6542_v58 }
 0x332   :  { %5559 = vmatprep.subr.bf16.mxu0 %v6572_v27 }
 0x335   :  { %5560 = vmatpush3.bf16.msra.mxu0 %v6543_v48 }
 0x336   :  { %5561 = vmatprep.subr.bf16.mxu0 %v6572_v27 }
 0x339   :  { %5562 = vmatpush3.bf16.msra.mxu0 %v6544_v59 }
 0x3ef   :  { %v5510_v60 = vpop.f32.mrb[4].mxu0  ;;  %v5532_v61 = vpop.f32.mrb[4].mxu1 }
 0x3f0   :  { %v5511_v62 = vpop.f32.mrb[5].mxu0  ;;  %v5533_v49 = vpop.f32.mrb[5].mxu1 }
 0x3f1   :  { %v5512_v50 = vadd.f32 %v5511_v62, %v5510_v60  ;;  %v5534_v63 = vadd.f32 %v5533_v49, %v5532_v61  ;;  %v5513_v0 = vpop.f32.mrb[6].mxu0  ;;  %v5535_v1 = vpop.f32.mrb[6].mxu1 }
 0x3f2   :  { %v5514_v3 = vpop.f32.mrb[7].mxu0  ;;  %v5536_v4 = vpop.f32.mrb[7].mxu1 }
 0x3f3   :  { %v4726_v5 = vadd.f32 %v5534_v63, %v5512_v50 }
 0x3f5   :  { %v4738_v7 = vmul.f32 %v5483_v2, %v4726_v5 }
 0x3f7   :  { %v4746_v8 = vadd.f32 %v5484_v6, %v4738_v7 }
 0x3f9   :  { %v4747_v9 = vpack.c.bf16 %v4746_v8, %v4746_v8 }
 0x3fb   :  { %5564 = vmatmul.mubr.bf16.vlgmr.msra.gmra.mrb[8].mxu0 %v4747_v9 }
 0x4ce   :  { %v4853_v11 = vpop.f32.mrb[8].mxu0 }
 0x4cf   :  { %v4854_v12 = vadd.f32 %v5485_v10, %v4853_v11  ;;  %v5565_v52 = vpop.f32.mrb[9].mxu0 }
 0x4d0   :  { %v4856_v15 = vpop.f32.mrb[10].mxu0 }
 0x4d1   :  { %4859 = vst [vmem:[#allocation2] sm:$0x3] %v4854_v12  ;;  %v5566_v16 = vpop.f32.mrb[11].mxu0 }
 0x4d2   :  { %6558 = shalt.err (!%p6555_p4)
}
 0x4d3   :  { %s6559_s7 = scalar_lea.hbm %s8601_s8, 32 }
 0x4d4   :  { %p6560_p5 = scmp.ne.s32.totalorder %s8601_s8, %s6559_s7  ;;  %p6563_p6 = scmp.lt.u32.totalorder %s6559_s7, %s8601_s8 }
 0x4d6   :  { %p6565_p7 = pnand %p6563_p6, %p6560_p5 }
 0x4d8   :  { %6568 = shalt.err (!%p6565_p7)
}
 0x4d9   :  { %4869 = dma.vmem_to_hbm [thread:$0]  %s4867_s28, 32, %s8601_s8, [#allocation3]  }
 0x4da   :  { %6569 = dma.done.wait [#allocation3], 32  }
 0x4db   :  { %6570 = vsyncadd [#allocation3], 4294967264 }
 0x4dc   :  { %4873 = vsyncpa [#allocation3], 1 }

</bundles_post_ra>
